<compile_context>
chip_gen: v6e
topology: v6e:2x2x1
jax: 0.10.0
libtpu: 0.0.40
codegen_flags: <defaults>
</compile_context>

<pallas_src>
import jax
import jax.numpy as jnp
from jax import lax
from jax.experimental import pallas as pl
from jax.experimental.pallas import tpu as pltpu

LANES = 128


def _round_up(n, m):
    return ((n + m - 1) // m) * m


def bottleneck_kernel(x_ref, w1_ref, b1_ref, w2_ref, b2_ref, w3_ref, b3_ref,
                      o_ref, pad_ref):
    """One batch element per grid step.  Channel dims are 128-lane padded."""
    _, H, W, C = x_ref.shape          # C = padded inplanes == padded 4*planes
    P = w1_ref.shape[1]               # padded planes

    # ---- conv1 (1x1) + bn1 (scale folded into w1) + relu.
    x2d = x_ref[0].reshape(H * W, C)                               # f32
    h1 = jnp.dot(x2d.astype(jnp.bfloat16), w1_ref[...],
                 preferred_element_type=jnp.float32)
    h1 = jnp.maximum(h1 + b1_ref[...], 0.0)                        # (H*W, P)

    # ---- stage h1 into the halo scratch.  Only the border is zeroed (the
    #      interior is fully overwritten right after), saving a full
    #      (H+2)(W+2)*Pp store pass per image on the scarce vst slot.
    #      Border is re-zeroed every step (cheap) so megacore 'parallel'
    #      sharding with per-core scratch stays correct.
    zrow = jnp.zeros((1, W + 2, P), jnp.bfloat16)
    zcol = jnp.zeros((H, 1, P), jnp.bfloat16)
    pad_ref[0:1, :, :] = zrow                       # top halo row
    pad_ref[H + 1:H + 2, :, :] = zrow               # bottom halo row
    pad_ref[1:H + 1, 0:1, :] = zcol                 # left halo column
    pad_ref[1:H + 1, W + 1:W + 2, :] = zcol         # right halo column
    pad_ref[1:H + 1, 1:W + 1, :] = h1.reshape(H, W, P).astype(jnp.bfloat16)

    # ---- conv2 (3x3, stride=1, pad=1) + bn2 + relu.
    # Nine matmuls of K = Pp reading the shifted windows of the halo scratch
    # directly (no concatenate-built patches -> no extra image-sized copies).
    acc = None
    for kh in range(3):
        for kw in range(3):
            patch = pad_ref[kh:kh + H, kw:kw + W, :].reshape(H * W, P)
            part = jnp.dot(patch, w2_ref[kh, kw],
                           preferred_element_type=jnp.float32)
            acc = part if acc is None else acc + part
    h2 = jnp.maximum(acc + b2_ref[...], 0.0)                       # (H*W, P)

    # ---- conv3 (1x1) + bn3 (scale folded into w3).
    h3 = jnp.dot(h2.astype(jnp.bfloat16), w3_ref[...],
                 preferred_element_type=jnp.float32) + b3_ref[...]  # (H*W, C)

    # ---- identity residual (re-read x block from VMEM, full f32) + relu.
    out = jnp.maximum(h3 + x_ref[0].reshape(H * W, C), 0.0)
    o_ref[0] = out.reshape(H, W, C).astype(o_ref.dtype)


def _vmem_limit_bytes(H, W, Cp, Pp, weight_bytes):
    """Shape-dependent VMEM budget, capped per TPU generation."""
    blk = H * W * Cp * 4                                   # one f32 act block
    scratch = (H + 2) * (W + 2) * Pp * 2                   # bf16 halo scratch
    # Live in-kernel intermediates: h1(bf16) + acc(f32) + h2(bf16) + h3(f32)
    # + residual/x2d(f32) + one window temporary (bf16).
    work = H * W * (Pp * 2 + Pp * 4 + Pp * 2 + Cp * 4 + Cp * 4 + Pp * 2)
    need = 2 * 2 * blk + 2 * weight_bytes + scratch + work + (4 << 20)
    try:
        phys = pltpu.get_tpu_info().vmem_capacity_bytes    # 128 MiB v5e/v6e, 64 MiB v7x
    except Exception:
        phys = 64 * 1024 * 1024
    cap = int(phys * 3 // 4)
    return int(max(min(need, cap), 32 * 1024 * 1024))


def bottleneck_pallas(x_nchw, params):
    """x_nchw: (N, Cin, H, W) float32.  Returns (N, 4*planes, H, W) float32."""
    w1, s1, b1, w2, s2, b2, w3, s3, b3 = params
    N, Cin, H, W = x_nchw.shape
    P = w1.shape[1]
    Cout = w3.shape[1]
    assert Cin == w1.shape[0]
    # Identity residual requires inplanes == 4*planes (downsample=None).
    assert Cin == Cout, "identity residual requires inplanes == 4*planes"

    Cp = _round_up(Cin, LANES)     # padded in/out channels
    Pp = _round_up(P, LANES)       # padded bottleneck width

    # ---- Fold BN scales into conv weights (host side, once per trace).
    w1f = w1 * s1.reshape(1, P)                    # (Cin, P)
    w2f = w2 * s2.reshape(1, 1, 1, P)              # (3, 3, P, P) HWIO
    w3f = w3 * s3.reshape(1, Cout)                 # (P, Cout)

    # ---- Pad channel dims to 128-lane multiples; cast weights to bf16.
    w1p = jnp.pad(w1f, ((0, Cp - Cin), (0, Pp - P))).astype(jnp.bfloat16)
    w3p = jnp.pad(w3f, ((0, Pp - P), (0, Cp - Cout))).astype(jnp.bfloat16)
    w2p = jnp.pad(w2f, ((0, 0), (0, 0), (0, Pp - P),
                        (0, Pp - P))).astype(jnp.bfloat16)   # (3,3,Pp,Pp)
    b1p = jnp.pad(b1, ((0, 0), (0, Pp - P))).astype(jnp.float32)
    b2p = jnp.pad(b2, ((0, 0), (0, Pp - P))).astype(jnp.float32)
    b3p = jnp.pad(b3, ((0, 0), (0, Cp - Cout))).astype(jnp.float32)

    weight_bytes = (w1p.size * 2 + w2p.size * 2 + w3p.size * 2
                    + b1p.size * 4 + b2p.size * 4 + b3p.size * 4)

    # ---- NCHW -> NHWC, pad channels with zeros.
    # TODO(synk): if the caller can supply NHWC directly these transposes
    #             (full HBM read+write each) disappear.
    x = jnp.transpose(x_nchw, (0, 2, 3, 1))
    x = jnp.pad(x, ((0, 0), (0, 0), (0, 0), (0, Cp - Cin)))

    def replicated(arr):
        zeros = (0,) * arr.ndim
        return pl.BlockSpec(arr.shape, lambda n, _z=zeros: _z)

    cost = pl.CostEstimate(
        flops=2 * N * H * W * (Cp * Pp + 9 * Pp * Pp + Pp * Cp),
        transcendentals=0,
        bytes_accessed=N * H * W * Cp * 4 * 2 + weight_bytes)

    out_nhwc = pl.pallas_call(
        bottleneck_kernel,
        out_shape=jax.ShapeDtypeStruct((N, H, W, Cp), jnp.float32),
        grid_spec=pltpu.PrefetchScalarGridSpec(
            num_scalar_prefetch=0,
            grid=(N,),
            in_specs=[
                pl.BlockSpec((1, H, W, Cp), lambda n: (n, 0, 0, 0)),   # x
                replicated(w1p), replicated(b1p),
                replicated(w2p), replicated(b2p),
                replicated(w3p), replicated(b3p),
            ],
            out_specs=pl.BlockSpec((1, H, W, Cp), lambda n: (n, 0, 0, 0)),
            scratch_shapes=[pltpu.VMEM((H + 2, W + 2, Pp), jnp.bfloat16)],
        ),
        compiler_params=pltpu.CompilerParams(
            dimension_semantics=("parallel",),
            vmem_limit_bytes=_vmem_limit_bytes(H, W, Cp, Pp, weight_bytes)),
        cost_estimate=cost,
    )(x, w1p, b1p, w2p, b2p, w3p, b3p)

    out = out_nhwc[..., :Cout]                      # drop lane padding
    return jnp.transpose(out, (0, 3, 1, 2))         # NHWC -> NCHW


# ---------------------------------------------------------------------------
# Pure-JAX f32 reference (faithful eval-mode folded-BN Bottleneck).
# ---------------------------------------------------------------------------
def bottleneck_ref(x_nchw, params):
    w1, s1, b1, w2, s2, b2, w3, s3, b3 = params
    x = jnp.transpose(x_nchw, (0, 2, 3, 1))
    dn = ("NHWC", "HWIO", "NHWC")

    h = lax.conv_general_dilated(x, w1[None, None], (1, 1), "VALID",
                                 dimension_numbers=dn)
    h = jnp.maximum(h * s1[0] + b1[0], 0.0)
    h = lax.conv_general_dilated(h, w2, (1, 1), ((1, 1), (1, 1)),
                                 dimension_numbers=dn)
    h = jnp.maximum(h * s2[0] + b2[0], 0.0)
    h = lax.conv_general_dilated(h, w3[None, None], (1, 1), "VALID",
                                 dimension_numbers=dn)
    h = h * s3[0] + b3[0]
    out = jnp.maximum(h + x, 0.0)
    return jnp.transpose(out, (0, 3, 1, 2))


def make_params(key, inplanes, planes):
    """Deterministic synthetic weights.  BN folded to (scale, shift)."""
    ks = jax.random.split(key, 12)
    eps = 1e-5

    def bn(kg, kb, km, kv, c):
        gamma = 1.0 + 0.1 * jax.random.normal(kg, (c,), jnp.float32)
        beta = 0.1 * jax.random.normal(kb, (c,), jnp.float32)
        mean = 0.1 * jax.random.normal(km, (c,), jnp.float32)
        var = jnp.abs(jax.random.normal(kv, (c,), jnp.float32)) + 0.5
        scale = gamma / jnp.sqrt(var + eps)
        shift = beta - mean * scale
        return scale[None, :], shift[None, :]          # (1, C) rows

    cout = planes * 4
    # conv weights in matmul-friendly layouts:
    #   w1: (Cin, P)   w2: (3, 3, P, P)  (HWIO)   w3: (P, Cout)
    w1 = 0.1 * jax.random.normal(ks[0], (inplanes, planes), jnp.float32)
    w2 = 0.1 * jax.random.normal(ks[1], (3, 3, planes, planes), jnp.float32)
    w3 = 0.1 * jax.random.normal(ks[2], (planes, cout), jnp.float32)
    s1, b1 = bn(ks[3], ks[4], ks[5], ks[6], planes)
    s2, b2 = bn(ks[7], ks[8], ks[9], ks[10], planes)
    s3, b3 = bn(ks[11], ks[3], ks[7], ks[0], cout)
    return (w1, s1, b1, w2, s2, b2, w3, s3, b3)


if __name__ == "__main__":
    key = jax.random.PRNGKey(0)
    k_x, k_p = jax.random.split(key)

    planes = 4
    inplanes = planes * 4          # identity residual requires Cin == 4*planes
    N, H, W = 2, 16, 16

    x = jax.random.normal(k_x, (N, inplanes, H, W), jnp.float32)   # NCHW
    params = make_params(k_p, inplanes, planes)

    out = jax.block_until_ready(bottleneck_pallas(x, params))
    ref = jax.block_until_ready(bottleneck_ref(x, params))

    assert out.shape == (N, planes * 4, H, W), out.shape
    # Kernel feeds the MXU bf16 inputs (f32 accumulation); compare against the
    # f32 reference at a bf16-appropriate tolerance.
    err = float(jnp.max(jnp.abs(out - ref)))
    assert jnp.allclose(out, ref, rtol=2e-2, atol=2e-2), err

    print("KERNEL_OK")
</pallas_src>

<mosaic_0001>
module attributes {stable_mosaic.version = 11 : i64} {
  func.func @bottleneck_kernel(%arg0: i32, %arg1: memref<1x16x16x128xf32, #tpu.memory_space<vmem>>, %arg2: memref<128x128xbf16, #tpu.memory_space<vmem>>, %arg3: memref<1x128xf32, #tpu.memory_space<vmem>>, %arg4: memref<3x3x128x128xbf16, #tpu.memory_space<vmem>>, %arg5: memref<1x128xf32, #tpu.memory_space<vmem>>, %arg6: memref<128x128xbf16, #tpu.memory_space<vmem>>, %arg7: memref<1x128xf32, #tpu.memory_space<vmem>>, %arg8: memref<1x16x16x128xf32, #tpu.memory_space<vmem>>, %arg9: memref<18x18x128xbf16, #tpu.memory_space<vmem>>) attributes {dimension_semantics = [#tpu.dimension_semantics<parallel>], iteration_bounds = array<i64: 2>, scalar_prefetch = 0 : i64, scratch_operands = 1 : i64, tpu.core_type = #tpu.core_type<tc>, window_params = [{transform_indices = @transform_0, window_bounds = array<i64: 1, 16, 16, 128>}, {pipeline_mode = #tpu.pipeline_mode<synchronous>, transform_indices = @transform_1, window_bounds = array<i64: 128, 128>}, {pipeline_mode = #tpu.pipeline_mode<synchronous>, transform_indices = @transform_2, window_bounds = array<i64: 1, 128>}, {pipeline_mode = #tpu.pipeline_mode<synchronous>, transform_indices = @transform_3, window_bounds = array<i64: 3, 3, 128, 128>}, {pipeline_mode = #tpu.pipeline_mode<synchronous>, transform_indices = @transform_4, window_bounds = array<i64: 1, 128>}, {pipeline_mode = #tpu.pipeline_mode<synchronous>, transform_indices = @transform_5, window_bounds = array<i64: 128, 128>}, {pipeline_mode = #tpu.pipeline_mode<synchronous>, transform_indices = @transform_6, window_bounds = array<i64: 1, 128>}, {transform_indices = @transform_7, window_bounds = array<i64: 1, 16, 16, 128>}]} {
    %c0 = arith.constant 0 : index
    %c0_0 = arith.constant 0 : index
    %c0_1 = arith.constant 0 : index
    %c0_2 = arith.constant 0 : index
    %0 = vector.load %arg1[%c0, %c0_0, %c0_1, %c0_2] : memref<1x16x16x128xf32, #tpu.memory_space<vmem>>, vector<1x16x16x128xf32>
    %1 = vector.shape_cast %0 : vector<1x16x16x128xf32> to vector<16x16x128xf32>
    %2 = vector.shape_cast %1 : vector<16x16x128xf32> to vector<256x128xf32>
    %3 = arith.truncf %2 : vector<256x128xf32> to vector<256x128xbf16>
    %c0_3 = arith.constant 0 : index
    %c0_4 = arith.constant 0 : index
    %4 = vector.load %arg2[%c0_3, %c0_4] : memref<128x128xbf16, #tpu.memory_space<vmem>>, vector<128x128xbf16>
    %cst = arith.constant dense<0.000000e+00> : vector<256x128xf32>
    %5 = tpu.matmul %3, %4, %cst {dimension_numbers = #tpu.dot_dimension_numbers<[1], [0], [0], [1], [0, 0, 1, 1], [], []>} : vector<256x128xbf16>, vector<128x128xbf16>, vector<256x128xf32> -> vector<256x128xf32>
    %c0_5 = arith.constant 0 : index
    %c0_6 = arith.constant 0 : index
    %6 = vector.load %arg3[%c0_5, %c0_6] : memref<1x128xf32, #tpu.memory_space<vmem>>, vector<1x128xf32>
    %7 = vector.broadcast %6 : vector<1x128xf32> to vector<256x128xf32>
    %8 = arith.addf %5, %7 : vector<256x128xf32>
    %cst_7 = arith.constant 0.000000e+00 : f32
    %9 = vector.broadcast %cst_7 : f32 to vector<256x128xf32>
    %10 = arith.maximumf %8, %9 : vector<256x128xf32>
    %cst_8 = arith.constant 0.000000e+00 : bf16
    %11 = vector.broadcast %cst_8 : bf16 to vector<1x18x128xbf16>
    %cst_9 = arith.constant 0.000000e+00 : bf16
    %12 = vector.broadcast %cst_9 : bf16 to vector<16x1x128xbf16>
    %c0_10 = arith.constant 0 : index
    %c0_11 = arith.constant 0 : index
    %c0_12 = arith.constant 0 : index
    %13 = vector.load %arg9[%c0_10, %c0_11, %c0_12] : memref<18x18x128xbf16, #tpu.memory_space<vmem>>, vector<1x18x128xbf16>
    tpu.vector_store %arg9[%c0_10, %c0_11, %c0_12], %11 {strides = array<i32>} : memref<18x18x128xbf16, #tpu.memory_space<vmem>>, vector<1x18x128xbf16>,
    %c17 = arith.constant 17 : index
    %c0_13 = arith.constant 0 : index
    %c0_14 = arith.constant 0 : index
    %14 = vector.load %arg9[%c17, %c0_13, %c0_14] : memref<18x18x128xbf16, #tpu.memory_space<vmem>>, vector<1x18x128xbf16>
    tpu.vector_store %arg9[%c17, %c0_13, %c0_14], %11 {strides = array<i32>} : memref<18x18x128xbf16, #tpu.memory_space<vmem>>, vector<1x18x128xbf16>,
    %c1 = arith.constant 1 : index
    %c0_15 = arith.constant 0 : index
    %c0_16 = arith.constant 0 : index
    %15 = vector.load %arg9[%c1, %c0_15, %c0_16] : memref<18x18x128xbf16, #tpu.memory_space<vmem>>, vector<16x1x128xbf16>
    tpu.vector_store %arg9[%c1, %c0_15, %c0_16], %12 {strides = array<i32>} : memref<18x18x128xbf16, #tpu.memory_space<vmem>>, vector<16x1x128xbf16>,
    %c1_17 = arith.constant 1 : index
    %c17_18 = arith.constant 17 : index
    %c0_19 = arith.constant 0 : index
    %16 = vector.load %arg9[%c1_17, %c17_18, %c0_19] : memref<18x18x128xbf16, #tpu.memory_space<vmem>>, vector<16x1x128xbf16>
    tpu.vector_store %arg9[%c1_17, %c17_18, %c0_19], %12 {strides = array<i32>} : memref<18x18x128xbf16, #tpu.memory_space<vmem>>, vector<16x1x128xbf16>,
    %17 = vector.shape_cast %10 : vector<256x128xf32> to vector<16x16x128xf32>
    %18 = arith.truncf %17 : vector<16x16x128xf32> to vector<16x16x128xbf16>
    %c1_20 = arith.constant 1 : index
    %c1_21 = arith.constant 1 : index
    %c0_22 = arith.constant 0 : index
    %19 = vector.load %arg9[%c1_20, %c1_21, %c0_22] : memref<18x18x128xbf16, #tpu.memory_space<vmem>>, vector<16x16x128xbf16>
    tpu.vector_store %arg9[%c1_20, %c1_21, %c0_22], %18 {strides = array<i32>} : memref<18x18x128xbf16, #tpu.memory_space<vmem>>, vector<16x16x128xbf16>,
    %c0_23 = arith.constant 0 : index
    %c0_24 = arith.constant 0 : index
    %c0_25 = arith.constant 0 : index
    %20 = vector.load %arg9[%c0_23, %c0_24, %c0_25] : memref<18x18x128xbf16, #tpu.memory_space<vmem>>, vector<16x16x128xbf16>
    %21 = vector.shape_cast %20 : vector<16x16x128xbf16> to vector<256x128xbf16>
    %c0_26 = arith.constant 0 : index
    %c0_27 = arith.constant 0 : index
    %c0_28 = arith.constant 0 : index
    %c0_29 = arith.constant 0 : index
    %22 = vector.load %arg4[%c0_26, %c0_27, %c0_28, %c0_29] : memref<3x3x128x128xbf16, #tpu.memory_space<vmem>>, vector<1x1x128x128xbf16>
    %23 = vector.shape_cast %22 : vector<1x1x128x128xbf16> to vector<128x128xbf16>
    %cst_30 = arith.constant dense<0.000000e+00> : vector<256x128xf32>
    %24 = tpu.matmul %21, %23, %cst_30 {dimension_numbers = #tpu.dot_dimension_numbers<[1], [0], [0], [1], [0, 0, 1, 1], [], []>} : vector<256x128xbf16>, vector<128x128xbf16>, vector<256x128xf32> -> vector<256x128xf32>
    %c0_31 = arith.constant 0 : index
    %c1_32 = arith.constant 1 : index
    %c0_33 = arith.constant 0 : index
    %25 = vector.load %arg9[%c0_31, %c1_32, %c0_33] : memref<18x18x128xbf16, #tpu.memory_space<vmem>>, vector<16x16x128xbf16>
    %26 = vector.shape_cast %25 : vector<16x16x128xbf16> to vector<256x128xbf16>
    %c0_34 = arith.constant 0 : index
    %c1_35 = arith.constant 1 : index
    %c0_36 = arith.constant 0 : index
    %c0_37 = arith.constant 0 : index
    %27 = vector.load %arg4[%c0_34, %c1_35, %c0_36, %c0_37] : memref<3x3x128x128xbf16, #tpu.memory_space<vmem>>, vector<1x1x128x128xbf16>
    %28 = vector.shape_cast %27 : vector<1x1x128x128xbf16> to vector<128x128xbf16>
    %cst_38 = arith.constant dense<0.000000e+00> : vector<256x128xf32>
    %29 = tpu.matmul %26, %28, %cst_38 {dimension_numbers = #tpu.dot_dimension_numbers<[1], [0], [0], [1], [0, 0, 1, 1], [], []>} : vector<256x128xbf16>, vector<128x128xbf16>, vector<256x128xf32> -> vector<256x128xf32>
    %30 = arith.addf %24, %29 : vector<256x128xf32>
    %c0_39 = arith.constant 0 : index
    %c2 = arith.constant 2 : index
    %c0_40 = arith.constant 0 : index
    %31 = vector.load %arg9[%c0_39, %c2, %c0_40] : memref<18x18x128xbf16, #tpu.memory_space<vmem>>, vector<16x16x128xbf16>
    %32 = vector.shape_cast %31 : vector<16x16x128xbf16> to vector<256x128xbf16>
    %c0_41 = arith.constant 0 : index
    %c2_42 = arith.constant 2 : index
    %c0_43 = arith.constant 0 : index
    %c0_44 = arith.constant 0 : index
    %33 = vector.load %arg4[%c0_41, %c2_42, %c0_43, %c0_44] : memref<3x3x128x128xbf16, #tpu.memory_space<vmem>>, vector<1x1x128x128xbf16>
    %34 = vector.shape_cast %33 : vector<1x1x128x128xbf16> to vector<128x128xbf16>
    %cst_45 = arith.constant dense<0.000000e+00> : vector<256x128xf32>
    %35 = tpu.matmul %32, %34, %cst_45 {dimension_numbers = #tpu.dot_dimension_numbers<[1], [0], [0], [1], [0, 0, 1, 1], [], []>} : vector<256x128xbf16>, vector<128x128xbf16>, vector<256x128xf32> -> vector<256x128xf32>
    %36 = arith.addf %30, %35 : vector<256x128xf32>
    %c1_46 = arith.constant 1 : index
    %c0_47 = arith.constant 0 : index
    %c0_48 = arith.constant 0 : index
    %37 = vector.load %arg9[%c1_46, %c0_47, %c0_48] : memref<18x18x128xbf16, #tpu.memory_space<vmem>>, vector<16x16x128xbf16>
    %38 = vector.shape_cast %37 : vector<16x16x128xbf16> to vector<256x128xbf16>
    %c1_49 = arith.constant 1 : index
    %c0_50 = arith.constant 0 : index
    %c0_51 = arith.constant 0 : index
    %c0_52 = arith.constant 0 : index
    %39 = vector.load %arg4[%c1_49, %c0_50, %c0_51, %c0_52] : memref<3x3x128x128xbf16, #tpu.memory_space<vmem>>, vector<1x1x128x128xbf16>
    %40 = vector.shape_cast %39 : vector<1x1x128x128xbf16> to vector<128x128xbf16>
    %cst_53 = arith.constant dense<0.000000e+00> : vector<256x128xf32>
    %41 = tpu.matmul %38, %40, %cst_53 {dimension_numbers = #tpu.dot_dimension_numbers<[1], [0], [0], [1], [0, 0, 1, 1], [], []>} : vector<256x128xbf16>, vector<128x128xbf16>, vector<256x128xf32> -> vector<256x128xf32>
    %42 = arith.addf %36, %41 : vector<256x128xf32>
    %c1_54 = arith.constant 1 : index
    %c1_55 = arith.constant 1 : index
    %c0_56 = arith.constant 0 : index
    %43 = vector.load %arg9[%c1_54, %c1_55, %c0_56] : memref<18x18x128xbf16, #tpu.memory_space<vmem>>, vector<16x16x128xbf16>
    %44 = vector.shape_cast %43 : vector<16x16x128xbf16> to vector<256x128xbf16>
    %c1_57 = arith.constant 1 : index
    %c1_58 = arith.constant 1 : index
    %c0_59 = arith.constant 0 : index
    %c0_60 = arith.constant 0 : index
    %45 = vector.load %arg4[%c1_57, %c1_58, %c0_59, %c0_60] : memref<3x3x128x128xbf16, #tpu.memory_space<vmem>>, vector<1x1x128x128xbf16>
    %46 = vector.shape_cast %45 : vector<1x1x128x128xbf16> to vector<128x128xbf16>
    %cst_61 = arith.constant dense<0.000000e+00> : vector<256x128xf32>
    %47 = tpu.matmul %44, %46, %cst_61 {dimension_numbers = #tpu.dot_dimension_numbers<[1], [0], [0], [1], [0, 0, 1, 1], [], []>} : vector<256x128xbf16>, vector<128x128xbf16>, vector<256x128xf32> -> vector<256x128xf32>
    %48 = arith.addf %42, %47 : vector<256x128xf32>
    %c1_62 = arith.constant 1 : index
    %c2_63 = arith.constant 2 : index
    %c0_64 = arith.constant 0 : index
    %49 = vector.load %arg9[%c1_62, %c2_63, %c0_64] : memref<18x18x128xbf16, #tpu.memory_space<vmem>>, vector<16x16x128xbf16>
    %50 = vector.shape_cast %49 : vector<16x16x128xbf16> to vector<256x128xbf16>
    %c1_65 = arith.constant 1 : index
    %c2_66 = arith.constant 2 : index
    %c0_67 = arith.constant 0 : index
    %c0_68 = arith.constant 0 : index
    %51 = vector.load %arg4[%c1_65, %c2_66, %c0_67, %c0_68] : memref<3x3x128x128xbf16, #tpu.memory_space<vmem>>, vector<1x1x128x128xbf16>
    %52 = vector.shape_cast %51 : vector<1x1x128x128xbf16> to vector<128x128xbf16>
    %cst_69 = arith.constant dense<0.000000e+00> : vector<256x128xf32>
    %53 = tpu.matmul %50, %52, %cst_69 {dimension_numbers = #tpu.dot_dimension_numbers<[1], [0], [0], [1], [0, 0, 1, 1], [], []>} : vector<256x128xbf16>, vector<128x128xbf16>, vector<256x128xf32> -> vector<256x128xf32>
    %54 = arith.addf %48, %53 : vector<256x128xf32>
    %c2_70 = arith.constant 2 : index
    %c0_71 = arith.constant 0 : index
    %c0_72 = arith.constant 0 : index
    %55 = vector.load %arg9[%c2_70, %c0_71, %c0_72] : memref<18x18x128xbf16, #tpu.memory_space<vmem>>, vector<16x16x128xbf16>
    %56 = vector.shape_cast %55 : vector<16x16x128xbf16> to vector<256x128xbf16>
    %c2_73 = arith.constant 2 : index
    %c0_74 = arith.constant 0 : index
    %c0_75 = arith.constant 0 : index
    %c0_76 = arith.constant 0 : index
    %57 = vector.load %arg4[%c2_73, %c0_74, %c0_75, %c0_76] : memref<3x3x128x128xbf16, #tpu.memory_space<vmem>>, vector<1x1x128x128xbf16>
    %58 = vector.shape_cast %57 : vector<1x1x128x128xbf16> to vector<128x128xbf16>
    %cst_77 = arith.constant dense<0.000000e+00> : vector<256x128xf32>
    %59 = tpu.matmul %56, %58, %cst_77 {dimension_numbers = #tpu.dot_dimension_numbers<[1], [0], [0], [1], [0, 0, 1, 1], [], []>} : vector<256x128xbf16>, vector<128x128xbf16>, vector<256x128xf32> -> vector<256x128xf32>
    %60 = arith.addf %54, %59 : vector<256x128xf32>
    %c2_78 = arith.constant 2 : index
    %c1_79 = arith.constant 1 : index
    %c0_80 = arith.constant 0 : index
    %61 = vector.load %arg9[%c2_78, %c1_79, %c0_80] : memref<18x18x128xbf16, #tpu.memory_space<vmem>>, vector<16x16x128xbf16>
    %62 = vector.shape_cast %61 : vector<16x16x128xbf16> to vector<256x128xbf16>
    %c2_81 = arith.constant 2 : index
    %c1_82 = arith.constant 1 : index
    %c0_83 = arith.constant 0 : index
    %c0_84 = arith.constant 0 : index
    %63 = vector.load %arg4[%c2_81, %c1_82, %c0_83, %c0_84] : memref<3x3x128x128xbf16, #tpu.memory_space<vmem>>, vector<1x1x128x128xbf16>
    %64 = vector.shape_cast %63 : vector<1x1x128x128xbf16> to vector<128x128xbf16>
    %cst_85 = arith.constant dense<0.000000e+00> : vector<256x128xf32>
    %65 = tpu.matmul %62, %64, %cst_85 {dimension_numbers = #tpu.dot_dimension_numbers<[1], [0], [0], [1], [0, 0, 1, 1], [], []>} : vector<256x128xbf16>, vector<128x128xbf16>, vector<256x128xf32> -> vector<256x128xf32>
    %66 = arith.addf %60, %65 : vector<256x128xf32>
    %c2_86 = arith.constant 2 : index
    %c2_87 = arith.constant 2 : index
    %c0_88 = arith.constant 0 : index
    %67 = vector.load %arg9[%c2_86, %c2_87, %c0_88] : memref<18x18x128xbf16, #tpu.memory_space<vmem>>, vector<16x16x128xbf16>
    %68 = vector.shape_cast %67 : vector<16x16x128xbf16> to vector<256x128xbf16>
    %c2_89 = arith.constant 2 : index
    %c2_90 = arith.constant 2 : index
    %c0_91 = arith.constant 0 : index
    %c0_92 = arith.constant 0 : index
    %69 = vector.load %arg4[%c2_89, %c2_90, %c0_91, %c0_92] : memref<3x3x128x128xbf16, #tpu.memory_space<vmem>>, vector<1x1x128x128xbf16>
    %70 = vector.shape_cast %69 : vector<1x1x128x128xbf16> to vector<128x128xbf16>
    %cst_93 = arith.constant dense<0.000000e+00> : vector<256x128xf32>
    %71 = tpu.matmul %68, %70, %cst_93 {dimension_numbers = #tpu.dot_dimension_numbers<[1], [0], [0], [1], [0, 0, 1, 1], [], []>} : vector<256x128xbf16>, vector<128x128xbf16>, vector<256x128xf32> -> vector<256x128xf32>
    %72 = arith.addf %66, %71 : vector<256x128xf32>
    %c0_94 = arith.constant 0 : index
    %c0_95 = arith.constant 0 : index
    %73 = vector.load %arg5[%c0_94, %c0_95] : memref<1x128xf32, #tpu.memory_space<vmem>>, vector<1x128xf32>
    %74 = vector.broadcast %73 : vector<1x128xf32> to vector<256x128xf32>
    %75 = arith.addf %72, %74 : vector<256x128xf32>
    %cst_96 = arith.constant 0.000000e+00 : f32
    %76 = vector.broadcast %cst_96 : f32 to vector<256x128xf32>
    %77 = arith.maximumf %75, %76 : vector<256x128xf32>
    %78 = arith.truncf %77 : vector<256x128xf32> to vector<256x128xbf16>
    %c0_97 = arith.constant 0 : index
    %c0_98 = arith.constant 0 : index
    %79 = vector.load %arg6[%c0_97, %c0_98] : memref<128x128xbf16, #tpu.memory_space<vmem>>, vector<128x128xbf16>
    %cst_99 = arith.constant dense<0.000000e+00> : vector<256x128xf32>
    %80 = tpu.matmul %78, %79, %cst_99 {dimension_numbers = #tpu.dot_dimension_numbers<[1], [0], [0], [1], [0, 0, 1, 1], [], []>} : vector<256x128xbf16>, vector<128x128xbf16>, vector<256x128xf32> -> vector<256x128xf32>
    %c0_100 = arith.constant 0 : index
    %c0_101 = arith.constant 0 : index
    %81 = vector.load %arg7[%c0_100, %c0_101] : memref<1x128xf32, #tpu.memory_space<vmem>>, vector<1x128xf32>
    %82 = vector.broadcast %81 : vector<1x128xf32> to vector<256x128xf32>
    %83 = arith.addf %80, %82 : vector<256x128xf32>
    %c0_102 = arith.constant 0 : index
    %c0_103 = arith.constant 0 : index
    %c0_104 = arith.constant 0 : index
    %c0_105 = arith.constant 0 : index
    %84 = vector.load %arg1[%c0_102, %c0_103, %c0_104, %c0_105] : memref<1x16x16x128xf32, #tpu.memory_space<vmem>>, vector<1x16x16x128xf32>
    %85 = vector.shape_cast %84 : vector<1x16x16x128xf32> to vector<16x16x128xf32>
    %86 = vector.shape_cast %85 : vector<16x16x128xf32> to vector<256x128xf32>
    %87 = arith.addf %83, %86 : vector<256x128xf32>
    %cst_106 = arith.constant 0.000000e+00 : f32
    %88 = vector.broadcast %cst_106 : f32 to vector<256x128xf32>
    %89 = arith.maximumf %87, %88 : vector<256x128xf32>
    %90 = vector.shape_cast %89 : vector<256x128xf32> to vector<16x16x128xf32>
    %c0_107 = arith.constant 0 : index
    %c0_108 = arith.constant 0 : index
    %c0_109 = arith.constant 0 : index
    %c0_110 = arith.constant 0 : index
    %91 = vector.load %arg8[%c0_107, %c0_108, %c0_109, %c0_110] : memref<1x16x16x128xf32, #tpu.memory_space<vmem>>, vector<1x16x16x128xf32>
    %92 = vector.shape_cast %91 : vector<1x16x16x128xf32> to vector<16x16x128xf32>
    %93 = vector.shape_cast %90 : vector<16x16x128xf32> to vector<1x16x16x128xf32>
    tpu.vector_store %arg8[%c0_107, %c0_108, %c0_109, %c0_110], %93 {strides = array<i32>} : memref<1x16x16x128xf32, #tpu.memory_space<vmem>>, vector<1x16x16x128xf32>,
    return
  }
  func.func @transform_0(%arg0: i32) -> (i32, i32, i32, i32) {
    %c0_i32 = arith.constant 0 : i32
    %c0_i32_0 = arith.constant 0 : i32
    %c0_i32_1 = arith.constant 0 : i32
    %c0_i32_2 = arith.constant 0 : i32
    return %arg0, %c0_i32, %c0_i32_0, %c0_i32_1 : i32, i32, i32, i32
  }
  func.func @transform_1(%arg0: i32) -> (i32, i32) {
    %c0_i32 = arith.constant 0 : i32
    %c0_i32_0 = arith.constant 0 : i32
    %c0_i32_1 = arith.constant 0 : i32
    return %c0_i32, %c0_i32_0 : i32, i32
  }
  func.func @transform_2(%arg0: i32) -> (i32, i32) {
    %c0_i32 = arith.constant 0 : i32
    %c0_i32_0 = arith.constant 0 : i32
    %c0_i32_1 = arith.constant 0 : i32
    return %c0_i32, %c0_i32_0 : i32, i32
  }
  func.func @transform_3(%arg0: i32) -> (i32, i32, i32, i32) {
    %c0_i32 = arith.constant 0 : i32
    %c0_i32_0 = arith.constant 0 : i32
    %c0_i32_1 = arith.constant 0 : i32
    %c0_i32_2 = arith.constant 0 : i32
    %c0_i32_3 = arith.constant 0 : i32
    return %c0_i32, %c0_i32_0, %c0_i32_1, %c0_i32_2 : i32, i32, i32, i32
  }
  func.func @transform_4(%arg0: i32) -> (i32, i32) {
    %c0_i32 = arith.constant 0 : i32
    %c0_i32_0 = arith.constant 0 : i32
    %c0_i32_1 = arith.constant 0 : i32
    return %c0_i32, %c0_i32_0 : i32, i32
  }
  func.func @transform_5(%arg0: i32) -> (i32, i32) {
    %c0_i32 = arith.constant 0 : i32
    %c0_i32_0 = arith.constant 0 : i32
    %c0_i32_1 = arith.constant 0 : i32
    return %c0_i32, %c0_i32_0 : i32, i32
  }
  func.func @transform_6(%arg0: i32) -> (i32, i32) {
    %c0_i32 = arith.constant 0 : i32
    %c0_i32_0 = arith.constant 0 : i32
    %c0_i32_1 = arith.constant 0 : i32
    return %c0_i32, %c0_i32_0 : i32, i32
  }
  func.func @transform_7(%arg0: i32) -> (i32, i32, i32, i32) {
    %c0_i32 = arith.constant 0 : i32
    %c0_i32_0 = arith.constant 0 : i32
    %c0_i32_1 = arith.constant 0 : i32
    %c0_i32_2 = arith.constant 0 : i32
    return %arg0, %c0_i32, %c0_i32_0, %c0_i32_1 : i32, i32, i32, i32
  }
}

</mosaic_0001>

<bundles_post_ra>
// kernel: tpu_custom_call.1
= control target key start
LH: loop header
LB: loop body
LE: loop exit
PB: predicated region body
PF: predicated region fallthrough
CT: control target
= control target key end

     0   :  { %s10961_s0 = inlined_call_operand.hbm [shape: f32[2,16,16,128], index: 0, kind: input, shape index: {}]   ;;  %s10962_s1 = inlined_call_operand.hbm [shape: bf16[128,128], index: 1, kind: input, shape index: {}]   ;;  %s10963_s2 = inlined_call_operand.vmem [shape: f32[1,128], index: 2, kind: input, shape index: {}]   ;;  %s10964_s3 = inlined_call_operand.hbm [shape: bf16[3,3,128,128], index: 3, kind: input, shape index: {}]   ;;  %s10965_s4 = inlined_call_operand.vmem [shape: f32[1,128], index: 4, kind: input, shape index: {}]   ;;  %s10966_s5 = inlined_call_operand.hbm [shape: bf16[128,128], index: 5, kind: input, shape index: {}]   ;;  %s10967_s6 = inlined_call_operand.vmem [shape: f32[1,128], index: 6, kind: input, shape index: {}]   ;;  %s10968_s7 = inlined_call_operand.hbm [shape: f32[2,16,16,128], index: 7, kind: output, shape index: {}]  }
   0x1   :  { %10981 = sst [smem:[#allocation49_spill]] %s10962_s1 }
   0x2   :  { %12 = vsyncpa [#allocation4], 0 }
   0x3   :  { %14 = vsyncpa [#allocation4 + $0x1], 0 }
   0x4   :  { %15 = vsyncpa [#allocation7], 0 }
   0x5   :  { %16 = vsyncpa [#allocation10], 0 }
   0x6   :  { %17 = vsyncpa [#allocation5], 0 }
   0x7   :  { %19 = vsyncpa [#allocation5 + $0x1], 0  ;;  %s8303_s24 = smov 0   ;;  %s8305_s25 = smov 0  }
   0x8   :  { %s8307_s26 = smov 0   ;;  %s8309_s27 = smov 0  }
   0x9 LB: > { %s8324_s28 = sadd.s32 4294967295, %s8249_s27   ;;  %s6666_s29 = sadd.s32 4294967294, %s8249_s27   ;;  %s8249_s27 = sphi %s8309_s27, %s11142_s27   ;;  %s8245_s26 = sphi %s8307_s26, %s11141_s26   ;;  %s8241_s25 = sphi %s8305_s25, %s11140_s25   ;;  %s8237_s24 = sphi %s8303_s24, %s11139_s24  }
   0xa   : > { %p45_p0 = scmp.ne.s32.totalorder %s8241_s25, %s8237_s24  ;;  %p10969_p1 = scmp.eq.s32.totalorder %s8324_s28, 0 }
   0xb   : > { %p201_p3 = scmp.eq.s32.totalorder %s6666_s29, 1  ;;  %p6667_p5 = scmp.ge.s32.totalorder %s8249_s27, 1 }
   0xc   : > { %p8333_p4 = por %p10969_p1, %p45_p0  ;;  %p208_p7 = scmp.lt.s32.totalorder %s8249_s27, 3 }
   0xd   : > { %p8338_p6 = por %p201_p3, %p45_p0  ;;  %s8251_s10 = smov [#allocation6]  }
   0xe   : > { %s10982_s30 = scalar_select %p8333_p4, 1, 0 }
   0xf   : > { %s10983_s8 = scalar_select %p8338_p6, 1, 0 }
  0x10   : > { %p8343_p8 = pnand %p6667_p5, %p208_p7  ;;  %s220_s11 = sshll.u32 %s8251_s10, 4  ;;  %s221_s11 = int_to_ptr.vmem [resolvable:$true] %s220_s11 }
  0x11   : > { %s8252_s13 = smov [#allocation8]   ;;  %s8253_s15 = smov [#allocation9]  }
  0x12   : > { %s10984_s9 = scalar_select %p8343_p8, 1, 0 }
  0x13   : > { %p7859_p9 = pneg %p8343_p8  ;;  %s236_s14 = sshll.u32 %s8252_s13, 4  ;;  %s237_s14 = int_to_ptr.vmem [resolvable:$true] %s236_s14 }
  0x14   : > { %s252_s16 = sshll.u32 %s8253_s15, 4  ;;  %s8082_s17 = scalar_lea.vmem %s221_s11, 1024  ;;  %s253_s16 = int_to_ptr.vmem [resolvable:$true] %s252_s16 }
  0x15   : > { %p8352_p11 = pnand %p7859_p9, %p10969_p1  ;;  %p8083_p13 = scmp.ne.s32.totalorder %s221_s11, %s8082_s17 }
  0x16   : > { %p8090_p5 = scmp.lt.s32.totalorder %s221_s11, %s221_s11  ;;  %p8091_p7 = scmp.lt.s32.totalorder %s8082_s17, %s8082_s17 }
  0x17   : > { %p8073_p12 = pneg %p8352_p11 }
  0x18   : > { %p8092_p9 = por %p8091_p7, %p8090_p5 }
  0x19   : > { %p8085_p0 = pnand %p8083_p13, %p8073_p12 }
  0x1b   : > { %p8086_p3 = pneg %p8085_p0 }
  0x1d   : > { %p8093_p10 = pnand %p8092_p9, %p8086_p3 }
  0x1f   : > { %8096 = shalt.err (!%p8093_p10)
}
  0x20   : > { %s8254_s18 = smov 64   ;;  %s8255_s19 = smov 4  }
  0x21   : > { %s10986_s1 = sld [smem:[#allocation49_spill]]  ;;  %s8108_s22 = scalar_lea.vmem %s237_s14, 9216 }
  0x22   : > { %p8109_p1 = scmp.ne.s32.totalorder %s237_s14, %s8108_s22  ;;  %p8116_p2 = scmp.lt.s32.totalorder %s237_s14, %s237_s14 }
  0x23   : > { %p8117_p6 = scmp.lt.s32.totalorder %s8108_s22, %s8108_s22 }
  0x24   : > { %p8111_p13 = pnand %p8109_p1, %p8073_p12 }
  0x25   : > { %p8118_p5 = por %p8117_p6, %p8116_p2 }
  0x26   : > { %p8112_p0 = pneg %p8111_p13 }
  0x27   : > { %7862 = dma.hbm_to_vmem [thread:$0]  (!%p8352_p11), %s10986_s1, 1024, %s221_s11, [#allocation7], %s8254_s18, %s8254_s18, %s8255_s19  }
  0x28   : > { %p8119_p3 = pnand %p8118_p5, %p8112_p0 }
  0x2a   : > { %8122 = shalt.err (!%p8119_p3)
}
  0x2b   : > { %7865 = dma.hbm_to_vmem [thread:$0]  (!%p8352_p11), %s10964_s3, 9216, %s237_s14, [#allocation7], %s8254_s18, %s8254_s18, %s8255_s19  }
  0x2c   : > { %s8134_s10 = scalar_lea.vmem %s253_s16, 1024  ;;  %p8142_p9 = scmp.lt.s32.totalorder %s253_s16, %s253_s16 }
  0x2d   : > { %p8135_p10 = scmp.ne.s32.totalorder %s253_s16, %s8134_s10  ;;  %p8143_p13 = scmp.lt.s32.totalorder %s8134_s10, %s8134_s10 }
  0x2f   : > { %p8137_p7 = pnand %p8135_p10, %p8073_p12  ;;  %p8144_p4 = por %p8143_p13, %p8142_p9 }
  0x31   : > { %p8138_p1 = pneg %p8137_p7 }
  0x33   : > { %p8145_p2 = pnand %p8144_p4, %p8138_p1 }
  0x35   : > { %8148 = shalt.err (!%p8145_p2)
}
  0x36   : > { %7868 = dma.hbm_to_vmem [thread:$0]  (!%p8352_p11), %s10966_s5, 1024, %s253_s16, [#allocation10], %s8254_s18, %s8254_s18, %s8255_s19  }
  0x37   : > { %s8383_s14 = sadd.s32 1, %s8249_s27   ;;  %s32_s12 = sadd.s32 1, %s8245_s26 }
  0x38   : > { %s29_s15 = ssub.s32 %s8249_s27, %s8383_s14  ;;  %p39_p6 = scmp.ne.s32.totalorder %s8245_s26, %s8241_s25 }
  0x39   : > { %p30_p4 = scmp.eq.s32.totalorder %s29_s15, 0  ;;  %p40_p12 = scmp.eq.s32.totalorder %s8249_s27, 0 }
  0x3a   : > { %p7880_p0 = scmp.lt.s32.totalorder %s8249_s27, 2  ;;  %p10987_p3 = scmp.eq.s32.totalorder %s8324_s28, 1 }
  0x3b   : > { %s8393_s17 = scalar_select %p30_p4, %s8245_s26, %s32_s12  }
  0x3c   : > { %p41_p5 = por %p40_p12, %p39_p6  ;;  %p8397_p10 = por %p10987_p3, %p39_p6 }
  0x3d   : > { %s269_s21 = sand.u32 1, %s8245_s26   ;;  %s7001_s22 = sshll.u32 %s8249_s27, 12 }
  0x3e   : > { %s10988_s20 = scalar_select %p8397_p10, 1, 0 }
  0x3f   : > { %s6672_s16 = sshll.u32 %s269_s21, 8  ;;  %s8406_s23 = scalar_lea.hbm %s10961_s0, %s7001_s22 }
  0x40   : > { %s273_s29 = scalar_lea.vmem [#allocation3], %s6672_s16  ;;  %p8408_p11 = pnand %p7880_p0, %p41_p5 }
  0x41   : > { %s280_s10 = sshll.u32 %s273_s29, 4  ;;  %s8414_s13 = scalar_lea.sflag [#allocation4], %s269_s21  ;;  %s8412_s10 = int_to_ptr.vmem [resolvable:$true] %s280_s10 }
  0x42   : > { %s8149_s15 = scalar_lea.hbm %s8406_s23, 4096  ;;  %p8151_p1 = pneg %p8408_p11 }
  0x43   : > { %p8150_p7 = scmp.ne.s32.totalorder %s8406_s23, %s8149_s15  ;;  %s8154_s16 = scalar_lea.hbm %s10961_s0, 8192 }
  0x44   : > { %p8155_p2 = scmp.lt.s32.totalorder %s8406_s23, %s10961_s0  ;;  %p8156_p4 = scmp.lt.s32.totalorder %s8154_s16, %s8149_s15 }
  0x45   : > { %p8152_p9 = pnand %p8151_p1, %p8150_p7 }
  0x46   : > { %p8157_p6 = por %p8156_p4, %p8155_p2 }
  0x47   : > { %p8153_p13 = pneg %p8152_p9 }
  0x49   : > { %p8158_p12 = pnand %p8157_p6, %p8153_p13 }
  0x4b   : > { %8161 = shalt.err (!%p8158_p12)
}
  0x4c   : > { %s8162_s21 = scalar_lea.vmem %s8412_s10, 4096  ;;  %s8256_s29 = smov [#allocation3]  }
  0x4d   : > { %p8163_p0 = scmp.ne.s32.totalorder %s8412_s10, %s8162_s21  ;;  %s8167_s1 = sshll.u32 %s8256_s29, 4  ;;  %s8168_s1 = int_to_ptr.vmem [resolvable:$false] %s8167_s1 }
  0x4e   : > { %s8169_s12 = scalar_lea.vmem %s8168_s1, 8192  ;;  %p8170_p7 = scmp.lt.s32.totalorder %s8412_s10, %s8168_s1 }
  0x4f   : > { %p8165_p5 = pnand %p8163_p0, %p8151_p1  ;;  %p8171_p9 = scmp.lt.s32.totalorder %s8169_s12, %s8162_s21 }
  0x51   : > { %p8166_p3 = pneg %p8165_p5  ;;  %p8172_p10 = por %p8171_p9, %p8170_p7 }
  0x53   : > { %p8173_p8 = pnand %p8172_p10, %p8166_p3 }
  0x55   : > { %8176 = shalt.err (!%p8173_p8)
}
  0x56   : > { %s8257_s15 = smov 128   ;;  %s8258_s22 = smov 8  }
  0x57   : > { %7872 = dma.hbm_to_vmem [thread:$0]  (!%p8408_p11), %s8406_s23, 4096, %s8412_s10, %s8414_s13, %s8257_s15, %s8257_s15, %s8258_s22  }
  0x58   : > { %p10990_p1 = scmp.ne.s32.totalorder %s10984_s9, 0 }
  0x5a   : > { %292 = sbr.rel (%p10990_p1) target bundleno = 1170 (0x492), region = 48 }
  0x5f   : > { %s8438_s16 = sand.u32 1, %s8241_s25   ;;  %p10991_p8 = scmp.ne.s32.totalorder %s10982_s30, 0 }
  0x60   : > { %s6676_s1 = sshll.u32 %s8438_s16, 8  ;;  %s295_s18 = scalar_lea.sflag [#allocation4], %s8438_s16 }
  0x61   : > { %s8444_s19 = scalar_lea.vmem [#allocation3], %s6676_s1 }
  0x62   : > { %8220 = dma.done.wait (%p10991_p8), %s295_s18, 4096  }
  0x63   : > { %8222 = vsyncadd (%p10991_p8), %s295_s18, 4294963200  ;;  %p10992_p10 = scmp.eq.s32.totalorder %s8324_s28, 0 }
  0x65   : > { %8224 = dma.done.wait (%p10992_p10), [#allocation7], 10240   ;;  %p10993_p11 = pmov %p10992_p10 }
  0x66   : > { %p10994_p13 = pmov %p10992_p10 }
  0x67   : > { %8226 = vsyncadd (%p10993_p11), [#allocation7], 4294957056 }
  0x68   : > { %8228 = dma.done.wait (%p10994_p13), [#allocation10], 1024   ;;  %p10995_p2 = pmov %p10992_p10 }
  0x69   : > { %v7927_v0 = vld [vmem:[#allocation6 + $0x38] sm:$0xff]   ;;  %v7928_v1 = vld [vmem:[#allocation6 + $0x30] sm:$0xff]   ;;  %v7929_v2 = vld [vmem:[#allocation6 + $0x28] sm:$0xff]   ;;  %vm662_vm0 = vcmask 1040384   ;;  %vm663_vm1 = vsmask.f32 256 }
  0x6a   : > { %8230 = vsyncadd (%p10995_p2), [#allocation10], 4294966272  ;;  %7299 = vmatprep.subr.bf16.mxu0 %v7927_v0  ;;  %7827 = vmatprep.subr.bf16.mxu1 %v7927_v0  ;;  %v7930_v3 = vld [vmem:[#allocation6 + $0x20] sm:$0xff]   ;;  %v343_v5 = vld [vmem:[%s8444_s19 + $0x8] sm:$0xff]  ;;  %vm713_vm3 = vsmask.f32 7938 }
  0x6b   : > { %7300 = vmatpush3.bf16.msra.mxu0 %v7927_v0  ;;  %7835 = vmatpush3.bf16.msra.mxu1 %v7927_v0  ;;  %v342_v4 = vld [vmem:[%s8444_s19] sm:$0xff]  ;;  %v7931_v7 = vld [vmem:[#allocation6 + $0x18] sm:$0xff]   ;;  %v359_v9 = vld [vmem:[%s8444_s19 + $0x88] sm:$0xff]  ;;  %vm1359_vm5 = vsmask.f32 3328  ;;  %vm1181_vm8 = vcmask 1043456  }
  0x6c   : > { %7301 = vmatprep.subr.bf16.mxu0 %v7928_v1  ;;  %7828 = vmatprep.subr.bf16.mxu1 %v7928_v1  ;;  %v374_v6 = vpack.c.bf16 %v343_v5, %v342_v4  ;;  %v358_v8 = vld [vmem:[%s8444_s19 + $0x80] sm:$0xff]  ;;  %v7932_v11 = vld [vmem:[#allocation6 + $0x10] sm:$0xff]   ;;  %v7933_v12 = vld [vmem:[#allocation6 + $0x8] sm:$0xff]   ;;  %vm1360_vm6 = vsmask.f32 7440  ;;  %vm2389_vm12 = vcmask 1042432  }
  0x6d   : > { %v382_v10 = vpack.c.bf16 %v359_v9, %v358_v8  ;;  %v7934_v13 = vld [vmem:[#allocation6] sm:$0xff]   ;;  %v344_v14 = vld [vmem:[%s8444_s19 + $0x10] sm:$0xff]  ;;  %v345_v15 = vld [vmem:[%s8444_s19 + $0x18] sm:$0xff]  ;;  %vm859_vm9 = vsmask.f32 4368  ;;  %vm2390_vm13 = vcmask 1046532  }
  0x6e   : > { %7315 = vmatprep.mubr.bf16.mxu0 %v374_v6  ;;  %v360_v16 = vld [vmem:[%s8444_s19 + $0x90] sm:$0xff]  ;;  %v361_v17 = vld [vmem:[%s8444_s19 + $0x98] sm:$0xff]  ;;  %v346_v18 = vld [vmem:[%s8444_s19 + $0x20] sm:$0xff]  ;;  %v375_v23 = vpack.c.bf16 %v345_v15, %v344_v14  ;;  %s10820_s12 = scalar_lea.vmem [#allocation11], %s6676_s1  ;;  %s7034_s15 = sshll.u32 %s8324_s28, 12 }
  0x6f   : > { %7302 = vmatpush3.bf16.msra.mxu0 %v7928_v1  ;;  %7836 = vmatpush3.bf16.msra.mxu1 %v7928_v1  ;;  %v347_v19 = vld [vmem:[%s8444_s19 + $0x28] sm:$0xff]  ;;  %v362_v20 = vld [vmem:[%s8444_s19 + $0xa0] sm:$0xff]  ;;  %v7935_v22 = vld [vmem:[#allocation8 + $0x38] sm:$0xff]   ;;  %v383_v24 = vpack.c.bf16 %v361_v17, %v360_v16  ;;  %s6564_s22 = sshll.u32 %s10820_s12, 4  ;;  %s10914_s30 = scalar_lea.hbm %s10968_s7, %s7034_s15  ;;  %s10916_s22 = int_to_ptr.vmem [resolvable:$true] %s6564_s22 }
  0x70   : > { %7303 = vmatprep.subr.bf16.mxu0 %v7929_v2  ;;  %7829 = vmatprep.subr.bf16.mxu1 %v7929_v2  ;;  %v363_v21 = vld [vmem:[%s8444_s19 + $0xa8] sm:$0xff]  ;;  %v376_v25 = vpack.c.bf16 %v347_v19, %v346_v18  ;;  %v348_v27 = vld [vmem:[%s8444_s19 + $0x30] sm:$0xff]  ;;  %v349_v28 = vld [vmem:[%s8444_s19 + $0x38] sm:$0xff]  ;;  %s8177_s9 = scalar_lea.vmem %s10916_s22, 4096  ;;  %p11136_p6 = scmp.ne.s32.totalorder %s10988_s20, 0 }
  0x71   : > { %7331 = vmatprep.mubr.bf16.mxu1 %v382_v10  ;;  %v384_v26 = vpack.c.bf16 %v363_v21, %v362_v20  ;;  %v364_v29 = vld [vmem:[%s8444_s19 + $0xb0] sm:$0xff]  ;;  %v365_v30 = vld [vmem:[%s8444_s19 + $0xb8] sm:$0xff]  ;;  %v350_v31 = vld [vmem:[%s8444_s19 + $0x40] sm:$0xff]  ;;  %v377_v35 = vpack.c.bf16 %v349_v28, %v348_v27  ;;  %p8178_p4 = scmp.ne.s32.totalorder %s10916_s22, %s8177_s9  ;;  %s8260_s28 = smov [#allocation11]  }
  0x72   : > { %v351_v32 = vld [vmem:[%s8444_s19 + $0x48] sm:$0xff]  ;;  %v366_v33 = vld [vmem:[%s8444_s19 + $0xc0] sm:$0xff]  ;;  %v385_v36 = vpack.c.bf16 %v365_v30, %v364_v29  ;;  %v352_v39 = vld [vmem:[%s8444_s19 + $0x50] sm:$0xff]  ;;  %v8259_v29 = vmov 0   ;;  %s8181_s23 = sshll.u32 %s8260_s28, 4  ;;  %s8182_s23 = int_to_ptr.vmem [resolvable:$false] %s8181_s23 }
  0x73   : > { %7304 = vmatpush3.bf16.msra.mxu0 %v7929_v2  ;;  %7837 = vmatpush3.bf16.msra.mxu1 %v7929_v2  ;;  %v367_v34 = vld [vmem:[%s8444_s19 + $0xc8] sm:$0xff]  ;;  %v378_v37 = vpack.c.bf16 %v351_v32, %v350_v31  ;;  %v353_v40 = vld [vmem:[%s8444_s19 + $0x58] sm:$0xff]  ;;  %v368_v41 = vld [vmem:[%s8444_s19 + $0xd0] sm:$0xff]  ;;  %654 = vst [vmem:[#allocation2] sm:$0xf] %v8259_v29  ;;  %p8179_p12 = pnand %p8178_p4, %p11136_p6  ;;  %s8183_s10 = scalar_lea.vmem %s8182_s23, 8192 }
  0x74   : > { %7305 = vmatprep.subr.bf16.mxu0 %v7930_v3  ;;  %7830 = vmatprep.subr.bf16.mxu1 %v7930_v3  ;;  %v386_v38 = vpack.c.bf16 %v367_v34, %v366_v33  ;;  %v369_v42 = vld [vmem:[%s8444_s19 + $0xd8] sm:$0xff]  ;;  %v354_v43 = vld [vmem:[%s8444_s19 + $0x60] sm:$0xff]  ;;  %v355_v44 = vld [vmem:[%s8444_s19 + $0x68] sm:$0xff]  ;;  %v379_v47 = vpack.c.bf16 %v353_v40, %v352_v39  ;;  %655 = vst [vmem:[#allocation2 + $0x4] sm:$0xf] %v8259_v29  ;;  %p8184_p5 = scmp.lt.s32.totalorder %s10916_s22, %s8182_s23  ;;  %p8185_p3 = scmp.lt.s32.totalorder %s8183_s10, %s8177_s9 }
  0x75   : > { %v370_v45 = vld [vmem:[%s8444_s19 + $0xe0] sm:$0xff]  ;;  %v371_v46 = vld [vmem:[%s8444_s19 + $0xe8] sm:$0xff]  ;;  %v387_v48 = vpack.c.bf16 %v369_v42, %v368_v41  ;;  %v380_v49 = vpack.c.bf16 %v355_v44, %v354_v43  ;;  %v356_v51 = vld [vmem:[%s8444_s19 + $0x70] sm:$0xff]  ;;  %656 = vst [vmem:[#allocation2 + $0x8] sm:$0x1] %v8259_v29  ;;  %p8180_p0 = pneg %p8179_p12 }
  0x76   : > { %v388_v50 = vpack.c.bf16 %v371_v46, %v370_v45  ;;  %v357_v52 = vld [vmem:[%s8444_s19 + $0x78] sm:$0xff]  ;;  %v372_v53 = vld [vmem:[%s8444_s19 + $0xf0] sm:$0xff]  ;;  %vm8491_vm2 = vmand %vm662_vm0, %vm663_vm1  ;;  %658 = vst [vmem:[#allocation2 + $0xcc] sm:$0xf] %v8259_v29  ;;  %p8186_p7 = por %p8185_p3, %p8184_p5 }
  0x77   : > { %7306 = vmatpush3.bf16.msra.mxu0 %v7930_v3  ;;  %7838 = vmatpush3.bf16.msra.mxu1 %v7930_v3  ;;  %v373_v54 = vld [vmem:[%s8444_s19 + $0xf8] sm:$0xff]  ;;  %v381_v55 = vpack.c.bf16 %v357_v52, %v356_v51  ;;  %v7936_v57 = vld [vmem:[#allocation8 + $0x30] sm:$0xff]   ;;  %v668_v59 = vld [vmem:[#allocation2 + $0x18] sm:$0x1]  ;;  %659 = vst [vmem:[#allocation2 + $0xd0] sm:$0xf] %v8259_v29 }
  0x78   : > { %7307 = vmatprep.subr.bf16.mxu0 %v7931_v7  ;;  %7831 = vmatprep.subr.bf16.mxu1 %v7931_v7  ;;  %v389_v56 = vpack.c.bf16 %v373_v54, %v372_v53  ;;  %v669_v60 = vsel %vm8491_vm2, 0, %v668_v59  ;;  %vm8498_vm4 = vmand %vm662_vm0, %vm713_vm3  ;;  %v665_v62 = vld [vmem:[#allocation2 + $0xc] sm:$0x1]  ;;  %v7938_v63 = vld [vmem:[#allocation8 + $0x28] sm:$0xff]   ;;  %660 = vst [vmem:[#allocation2 + $0xd4] sm:$0x1] %v8259_v29  ;;  %p8187_p9 = pnand %p8186_p7, %p8180_p0 }
  0x79   : > { %670 = vst [vmem:[#allocation2 + $0x18] sm:$0x1] %v669_v60  ;;  %v666_v0 = vsel %vm8491_vm2, 0, %v665_v62  ;;  %v7937_v1 = vld [vmem:[#allocation8 + $0x78] sm:$0xff]   ;;  %v718_v2 = vld [vmem:[#allocation2 + $0x20] sm:$0x1]  ;;  %vm8546_vm7 = vmor %vm1359_vm5, %vm1360_vm6 }
  0x7a   : > { %667 = vst [vmem:[#allocation2 + $0xc] sm:$0x1] %v666_v0  ;;  %v719_v3 = vsel %vm8498_vm4, 0, %v718_v2  ;;  %v715_v4 = vld [vmem:[#allocation2 + $0x14] sm:$0x1]  ;;  %v7940_v5 = vld [vmem:[#allocation8 + $0x20] sm:$0xff]   ;;  %vm8600_vm10 = vmand %vm1181_vm8, %vm713_vm3 }
  0x7b   : > { %7308 = vmatpush3.bf16.msra.mxu0 %v7931_v7  ;;  %7839 = vmatpush3.bf16.msra.mxu1 %v7931_v7  ;;  %720 = vst [vmem:[#allocation2 + $0x20] sm:$0x1] %v719_v3  ;;  %v716_v6 = vsel %vm8498_vm4, 0, %v715_v4  ;;  %v7939_v7 = vld [vmem:[#allocation8 + $0x70] sm:$0xff]   ;;  %v674_v8 = vld [vmem:[#allocation2 + $0x30] sm:$0x1]  ;;  %vm8613_vm11 = vmor %vm663_vm1, %vm859_vm9 }
  0x7c   : > { %7309 = vmatprep.subr.bf16.mxu0 %v7932_v11  ;;  %7832 = vmatprep.subr.bf16.mxu1 %v7932_v11  ;;  %717 = vst [vmem:[#allocation2 + $0x14] sm:$0x1] %v716_v6  ;;  %v675_v9 = vsel %vm8491_vm2, 0, %v674_v8  ;;  %v671_v10 = vld [vmem:[#allocation2 + $0x24] sm:$0x1]  ;;  %v7944_v17 = vld [vmem:[#allocation8 + $0x10] sm:$0xff]   ;;  %vm9061_vm14 = vmor %vm2389_vm12, %vm2390_vm13 }
  0x7d   : > { %676 = vst [vmem:[#allocation2 + $0x30] sm:$0x1] %v675_v9  ;;  %v724_v14 = vld [vmem:[#allocation2 + $0x38] sm:$0x1]  ;;  %v721_v16 = vld [vmem:[#allocation2 + $0x2c] sm:$0x1] }
  0x7e   : > { %v725_v15 = vsel %vm8498_vm4, 0, %v724_v14  ;;  %v722_v18 = vsel %vm8498_vm4, 0, %v721_v16  ;;  %v7943_v19 = vld [vmem:[#allocation8 + $0x60] sm:$0xff]   ;;  %v680_v20 = vld [vmem:[#allocation2 + $0x48] sm:$0x1]  ;;  %v7945_v27 = vld [vmem:[#allocation8 + $0x58] sm:$0xff]  }
  0x7f   : > { %7310 = vmatpush3.bf16.msra.mxu0 %v7932_v11  ;;  %7840 = vmatpush3.bf16.msra.mxu1 %v7932_v11  ;;  %v672_v11 = vsel %vm8491_vm2, 0, %v671_v10  ;;  %726 = vst [vmem:[#allocation2 + $0x38] sm:$0x1] %v725_v15  ;;  %723 = vst [vmem:[#allocation2 + $0x2c] sm:$0x1] %v722_v18  ;;  %v681_v21 = vsel %vm8491_vm2, 0, %v680_v20 }
  0x80   : > { %7311 = vmatprep.subr.bf16.mxu0 %v7933_v12  ;;  %7833 = vmatprep.subr.bf16.mxu1 %v7933_v12  ;;  %673 = vst [vmem:[#allocation2 + $0x24] sm:$0x1] %v672_v11  ;;  %682 = vst [vmem:[#allocation2 + $0x48] sm:$0x1] %v681_v21  ;;  %v692_v28 = vld [vmem:[#allocation2 + $0x78] sm:$0x1] }
  0x81   : > { %v693_v30 = vsel %vm8491_vm2, 0, %v692_v28  ;;  %v727_v31 = vld [vmem:[#allocation2 + $0x44] sm:$0x1]  ;;  %v7948_v33 = vld [vmem:[#allocation8] sm:$0xff]   ;;  %v7947_v34 = vld [vmem:[#allocation8 + $0x50] sm:$0xff]  }
  0x82   : > { %694 = vst [vmem:[#allocation2 + $0x78] sm:$0x1] %v693_v30  ;;  %v728_v32 = vsel %vm8498_vm4, 0, %v727_v31  ;;  %v683_v39 = vld [vmem:[#allocation2 + $0x54] sm:$0x1]  ;;  %v7953_v9 = vld [vmem:[#allocation8 + $0x40] sm:$0xff]  }
  0x83   : > { %7312 = vmatpush3.bf16.msra.mxu0 %v7933_v12  ;;  %7841 = vmatpush3.bf16.msra.mxu1 %v7933_v12  ;;  %v7942_v12 = vld [vmem:[#allocation8 + $0x18] sm:$0xff]   ;;  %729 = vst [vmem:[#allocation2 + $0x44] sm:$0x1] %v728_v32  ;;  %v684_v40 = vsel %vm8491_vm2, 0, %v683_v39  ;;  %v1295_v41 = vld [vmem:[#allocation2] sm:$0xf] }
  0x84   : > { %7313 = vmatprep.subr.bf16.mxu0 %v7934_v13  ;;  %7834 = vmatprep.subr.bf16.mxu1 %v7934_v13  ;;  %v1296_v42 = vld [vmem:[#allocation2 + $0x4] sm:$0xf]  ;;  %685 = vst [vmem:[#allocation2 + $0x54] sm:$0x1] %v684_v40  ;;  %v736_v44 = vld [vmem:[#allocation2 + $0x68] sm:$0x1] }
  0x85   : > { %v6746_v43 = vcombine.low %v1295_v41, %v1296_v42  ;;  %v742_v45 = vld [vmem:[#allocation2 + $0x80] sm:$0x1]  ;;  %v739_v46 = vld [vmem:[#allocation2 + $0x74] sm:$0x1]  ;;  %v733_v51 = vld [vmem:[#allocation2 + $0x5c] sm:$0x1] }
  0x86   : > { %v734_v52 = vsel %vm8498_vm4, 0, %v733_v51  ;;  %v698_v53 = vld [vmem:[#allocation2 + $0x90] sm:$0x1]  ;;  %v1366_v59 = vshll.u32 %v1295_v41, 16  ;;  %v1376_v60 = vshrl.u32 %v1296_v42, 16  ;;  %v1372_v0 = vshll.u32 %v1296_v42, 16 }
  0x87   : > { %7314 = vmatpush3.bf16.msra.mxu0 %v7934_v13  ;;  %7842 = vmatpush3.bf16.msra.mxu1 %v7934_v13  ;;  %v7941_v13 = vld [vmem:[#allocation8 + $0x68] sm:$0xff]   ;;  %735 = vst [vmem:[#allocation2 + $0x5c] sm:$0x1] %v734_v52  ;;  %v699_v54 = vsel %vm8491_vm2, 0, %v698_v53  ;;  %v704_v18 = vld [vmem:[#allocation2 + $0xa8] sm:$0x1] }
  0x88   : > { %7395 = vmatprep.subr.bf16.mxu0 %v7935_v22  ;;  %7347 = vmatprep.subr.bf16.mxu1 %v7937_v1  ;;  %700 = vst [vmem:[#allocation2 + $0x90] sm:$0x1] %v699_v54  ;;  %v1374_v3 = vrot.slane %v1372_v0, 5  ;;  %v1378_v4 = vrot.slane %v1376_v60, 4  ;;  %v705_v20 = vsel %vm8491_vm2, 0, %v704_v18 }
  0x89   : > { %v701_v21 = vld [vmem:[#allocation2 + $0x9c] sm:$0x1]  ;;  %706 = vst [vmem:[#allocation2 + $0xa8] sm:$0x1] %v705_v20  ;;  %v710_v28 = vld [vmem:[#allocation2 + $0xc0] sm:$0x1] }
  0x8a   : > { %7316 = vmatmul.mubr.bf16.vlgmr.msra.gmra.mxu0 %v375_v23  ;;  %7332 = vmatmul.mubr.bf16.vlgmr.msra.gmra.mxu1 %v383_v24  ;;  %v730_v24 = vld [vmem:[#allocation2 + $0x50] sm:$0x1]  ;;  %v707_v29 = vld [vmem:[#allocation2 + $0xb4] sm:$0x1]  ;;  %v711_v30 = vsel %vm8491_vm2, 0, %v710_v28 }
  0x8b   : > { %7319 = vmatprep.mubr.bf16.mxu0 %v376_v25  ;;  %7335 = vmatprep.mubr.bf16.mxu1 %v384_v26  ;;  %v731_v25 = vsel %vm8498_vm4, 0, %v730_v24  ;;  %v7946_v26 = vld [vmem:[#allocation8 + $0x8] sm:$0xff]   ;;  %v754_v24 = vld [vmem:[#allocation2 + $0xb0] sm:$0x1]  ;;  %v708_v31 = vsel %vm8491_vm2, 0, %v707_v29 }
  0x8c   : > { %7396 = vmatpush3.bf16.msra.mxu0 %v7935_v22  ;;  %7348 = vmatpush3.bf16.msra.mxu1 %v7937_v1  ;;  %v677_v22 = vld [vmem:[#allocation2 + $0x3c] sm:$0x1]  ;;  %732 = vst [vmem:[#allocation2 + $0x50] sm:$0x1] %v731_v25  ;;  %v748_v1 = vld [vmem:[#allocation2 + $0x98] sm:$0x1] }
  0x8d   : > { %7397 = vmatprep.subr.bf16.mxu0 %v7936_v57  ;;  %7349 = vmatprep.subr.bf16.mxu1 %v7939_v7  ;;  %v678_v23 = vsel %vm8491_vm2, 0, %v677_v22  ;;  %v749_v2 = vsel %vm8498_vm4, 0, %v748_v1  ;;  %v8558_v22 = vld [vmem:[#allocation8 + $0xb8] sm:$0xff]   ;;  %v755_v25 = vsel %vm8498_vm4, 0, %v754_v24  ;;  %712 = vst [vmem:[#allocation2 + $0xc0] sm:$0x1] %v711_v30 }
  0x8e   : > { %679 = vst [vmem:[#allocation2 + $0x3c] sm:$0x1] %v678_v23  ;;  %750 = vst [vmem:[#allocation2 + $0x98] sm:$0x1] %v749_v2  ;;  %v702_v23 = vsel %vm8491_vm2, 0, %v701_v21 }
  0x8f   : > { %703 = vst [vmem:[#allocation2 + $0x9c] sm:$0x1] %v702_v23  ;;  %756 = vst [vmem:[#allocation2 + $0xb0] sm:$0x1] %v755_v25  ;;  %v760_v32 = vld [vmem:[#allocation2 + $0xc8] sm:$0x1] }
  0x90   : > { %7398 = vmatpush3.bf16.msra.mxu0 %v7936_v57  ;;  %7350 = vmatpush3.bf16.msra.mxu1 %v7939_v7  ;;  %v1363_v57 = vshrl.u32 %v1295_v41, 16  ;;  %v1379_v7 = vor.u32 %v1378_v4, %v1374_v3  ;;  %709 = vst [vmem:[#allocation2 + $0xb4] sm:$0x1] %v708_v31  ;;  %v1194_v31 = vld [vmem:[#allocation2 + $0x20] sm:$0x1] }
  0x91   : > { %7399 = vmatprep.subr.bf16.mxu0 %v7938_v63  ;;  %7351 = vmatprep.subr.bf16.mxu1 %v7941_v13 }
  0x92   : > { %7320 = vmatmul.mubr.bf16.gmra.mxu0 %v377_v35  ;;  %7336 = vmatmul.mubr.bf16.gmra.mxu1 %v385_v36  ;;  %v686_v35 = vld [vmem:[#allocation2 + $0x60] sm:$0x1]  ;;  %v689_v36 = vld [vmem:[#allocation2 + $0x6c] sm:$0x1]  ;;  %v1365_v62 = vrot.slane %v1363_v57, 4  ;;  %v1380_v11 = vrot.slane %v1379_v7, 4 }
  0x93   : > { %7323 = vmatprep.mubr.bf16.mxu0 %v378_v37  ;;  %7339 = vmatprep.mubr.bf16.mxu1 %v386_v38  ;;  %v687_v37 = vsel %vm8491_vm2, 0, %v686_v35  ;;  %v690_v38 = vsel %vm8491_vm2, 0, %v689_v36  ;;  %v8575_v36 = vld [vmem:[#allocation8 + $0xf8] sm:$0xff]  }
  0x94   : > { %7400 = vmatpush3.bf16.msra.mxu0 %v7938_v63  ;;  %7352 = vmatpush3.bf16.msra.mxu1 %v7941_v13  ;;  %688 = vst [vmem:[#allocation2 + $0x60] sm:$0x1] %v687_v37  ;;  %691 = vst [vmem:[#allocation2 + $0x6c] sm:$0x1] %v690_v38  ;;  %v1368_v63 = vrot.slane %v1366_v59, 5 }
  0x95   : > { %7401 = vmatprep.subr.bf16.mxu0 %v7940_v5  ;;  %7353 = vmatprep.subr.bf16.mxu1 %v7943_v19  ;;  %v8581_v37 = vld [vmem:[%s10963_s2] ss:$0 sm:$0xff] }
  0x96   : > { %v1369_v6 = vor.u32 %v1368_v63, %v1365_v62 }
  0x98   : > { %7402 = vmatpush3.bf16.msra.mxu0 %v7940_v5  ;;  %7354 = vmatpush3.bf16.msra.mxu1 %v7943_v19  ;;  %v1343_v5 = vld [vmem:[#allocation2 + $0x8] sm:$0x1]  ;;  %v1370_v10 = vrot.slane %v1369_v6, 4 }
  0x99   : > { %7403 = vmatprep.subr.bf16.mxu0 %v7942_v12  ;;  %7355 = vmatprep.subr.bf16.mxu1 %v7945_v27  ;;  %v1382_v8 = vshll.u32 %v1343_v5, 16 }
  0x9a   : > { %7324 = vmatmul.mubr.bf16.gmra.mxu0 %v379_v47  ;;  %7340 = vmatmul.mubr.bf16.gmra.mxu1 %v387_v48  ;;  %v743_v47 = vsel %vm8498_vm4, 0, %v742_v45  ;;  %v740_v48 = vsel %vm8498_vm4, 0, %v739_v46  ;;  %v1375_v14 = vsel %vm8546_vm7, %v1370_v10, %v1374_v3 }
  0x9b   : > { %7327 = vmatprep.mubr.bf16.mxu0 %v380_v49  ;;  %7343 = vmatprep.mubr.bf16.mxu1 %v388_v50  ;;  %v737_v49 = vsel %vm8498_vm4, 0, %v736_v44  ;;  %744 = vst [vmem:[#allocation2 + $0x80] sm:$0x1] %v743_v47  ;;  %741 = vst [vmem:[#allocation2 + $0x74] sm:$0x1] %v740_v48  ;;  %v7950_v50 = vld [vmem:[#allocation8 + $0x48] sm:$0xff]  }
  0x9c   : > { %7404 = vmatpush3.bf16.msra.mxu0 %v7942_v12  ;;  %7356 = vmatpush3.bf16.msra.mxu1 %v7945_v27  ;;  %738 = vst [vmem:[#allocation2 + $0x68] sm:$0x1] %v737_v49  ;;  %v1384_v12 = vrot.slane %v1382_v8, 5  ;;  %v1190_v8 = vld [vmem:[#allocation2 + $0x18] sm:$0xf] }
  0x9d   : > { %7405 = vmatprep.subr.bf16.mxu0 %v7944_v17  ;;  %7357 = vmatprep.subr.bf16.mxu1 %v7947_v34 }
  0x9e   : > { %v1385_v15 = vsel %vm8546_vm7, %v1380_v11, %v1384_v12 }
  0x9f   : > { %v6722_v16 = vcombine.low %v1375_v14, %v1385_v15 }
  0xa0   : > { %7406 = vmatpush3.bf16.msra.mxu0 %v7944_v17  ;;  %7358 = vmatpush3.bf16.msra.mxu1 %v7947_v34  ;;  %v745_v17 = vld [vmem:[#allocation2 + $0x8c] sm:$0x1]  ;;  %v757_v34 = vld [vmem:[#allocation2 + $0xbc] sm:$0x1] }
  0xa1   : > { %7407 = vmatprep.subr.bf16.mxu0 %v7946_v26  ;;  %7359 = vmatprep.subr.bf16.mxu1 %v7950_v50  ;;  %v746_v19 = vsel %vm8498_vm4, 0, %v745_v17  ;;  %v758_v35 = vsel %vm8498_vm4, 0, %v757_v34 }
  0xa2   : > { %7328 = vmatmul.mubr.bf16.gmra.mxu0 %v381_v55  ;;  %7344 = vmatmul.mubr.bf16.gmra.mxu1 %v389_v56  ;;  %v695_v55 = vld [vmem:[#allocation2 + $0x84] sm:$0x1]  ;;  %747 = vst [vmem:[#allocation2 + $0x8c] sm:$0x1] %v746_v19  ;;  %759 = vst [vmem:[#allocation2 + $0xbc] sm:$0x1] %v758_v35 }
  0xa3   : > { %7411 = vmatprep.mubr.bf16.mxu0 %v6746_v43  ;;  %v696_v56 = vsel %vm8491_vm2, 0, %v695_v55  ;;  %7363 = vmatprep.mubr.bf16.mxu1 %v6722_v16  ;;  %v1183_v19 = vld [vmem:[#allocation2 + $0xc] sm:$0xf] }
  0xa4   : > { %7408 = vmatpush3.bf16.msra.mxu0 %v7946_v26  ;;  %7360 = vmatpush3.bf16.msra.mxu1 %v7950_v50  ;;  %697 = vst [vmem:[#allocation2 + $0x84] sm:$0x1] %v696_v56  ;;  %v751_v26 = vld [vmem:[#allocation2 + $0xa4] sm:$0x1] }
  0xa5   : > { %7409 = vmatprep.subr.bf16.mxu0 %v7948_v33  ;;  %7361 = vmatprep.subr.bf16.mxu1 %v7953_v9  ;;  %v752_v27 = vsel %vm8498_vm4, 0, %v751_v26 }
  0xa6   : > { %753 = vst [vmem:[#allocation2 + $0xa4] sm:$0x1] %v752_v27 }
  0xa8   : > { %7410 = vmatpush3.bf16.msra.mxu0 %v7948_v33  ;;  %7362 = vmatpush3.bf16.msra.mxu1 %v7953_v9  ;;  %v761_v33 = vsel %vm8498_vm4, 0, %v760_v32 }
  0xa9   : > { %7443 = vmatprep.subr.bf16.mxu1 %v8558_v22  ;;  %762 = vst [vmem:[#allocation2 + $0xc8] sm:$0x1] %v761_v33  ;;  %7491 = vmatprep.subr.bf16.mxu0 %v8575_v36 }
 0x14a   : > { %v7317_v38 = vpop.f32.mrf.mxu0  ;;  %v7333_v39 = vpop.f32.mrf.mxu1 }
 0x14b   : > { %v504_v40 = vadd.f32 %v7317_v38, %v8581_v37  ;;  %v568_v41 = vadd.f32 %v7333_v39, %v8581_v37 }
 0x14c   : > { %v495_v42 = vpop.f32.mrf.mxu0  ;;  %v559_v43 = vpop.f32.mrf.mxu1 }
 0x14d   : > { %v624_v61 = vmax.f32 %v504_v40, 0.0  ;;  %v496_v44 = vadd.f32 %v8581_v37, %v495_v42  ;;  %v640_v45 = vmax.f32 %v568_v41, 0.0  ;;  %v560_v46 = vadd.f32 %v8581_v37, %v559_v43 }
 0x14e   : > { %v7318_v47 = vpop.f32.mrf.mxu0  ;;  %v7334_v52 = vpop.f32.mrf.mxu1 }
 0x14f   : > { %v7004_v48 = vpack.c.bf16 %v624_v61, %v624_v61  ;;  %v622_v49 = vmax.f32 %v496_v44, 0.0  ;;  %v507_v50 = vadd.f32 %v7318_v47, %v8581_v37  ;;  %v8588_v51 = vpack.c.bf16 %v640_v45, %v640_v45 }
 0x150   : > { %v498_v53 = vpop.f32.mrf.mxu0  ;;  %v638_v54 = vmax.f32 %v560_v46, 0.0  ;;  %v8591_v55 = vadd.f32 %v7334_v52, %v8581_v37 }
 0x151   : > { %v879_v56 = vshrl.u32 %v7004_v48, 16  ;;  %v882_v57 = vshll.u32 %v7004_v48, 16  ;;  %v7002_v59 = vpack.c.bf16 %v622_v49, %v622_v49  ;;  %v625_v60 = vmax.f32 %v507_v50, 0.0  ;;  %v1187_v49 = vld [vmem:[#allocation2 + $0x14] sm:$0x1] }
 0x152   : > { %v499_v62 = vadd.f32 %v8581_v37, %v498_v53  ;;  %v7321_v63 = vpop.f32.mrf.mxu0  ;;  %v1015_v0 = vshrl.u32 %v8588_v51, 16  ;;  %v1018_v1 = vshll.u32 %v8588_v51, 16  ;;  %v8596_v2 = vpack.c.bf16 %v638_v54, %v638_v54 }
 0x153   : > { %v881_v3 = vrot.slane %v879_v56, 7  ;;  %v862_v4 = vshrl.u32 %v7002_v59, 16  ;;  %v865_v5 = vshll.u32 %v7002_v59, 16  ;;  %v7005_v6 = vpack.c.bf16 %v625_v60, %v625_v60  ;;  %v1204_v60 = vld [vmem:[#allocation2 + $0x30] sm:$0xf] }
 0x154   : > { %v623_v9 = vmax.f32 %v499_v62, 0.0  ;;  %v520_v10 = vadd.f32 %v7321_v63, %v8581_v37  ;;  %v511_v11 = vpop.f32.mrf.mxu0  ;;  %v8605_v12 = vrot.slane %v1015_v0, 7  ;;  %v998_v14 = vshrl.u32 %v8596_v2, 16 }
 0x155   : > { %v884_v15 = vor.u32 %v882_v57, %v881_v3  ;;  %v885_v16 = vrot.slane %v881_v3, 4  ;;  %v864_v17 = vrot.slane %v862_v4, 7  ;;  %v887_v18 = vshrl.u32 %v7005_v6, 16 }
 0x156   : > { %v890_v20 = vshll.u32 %v7005_v6, 16  ;;  %v7003_v21 = vpack.c.bf16 %v623_v9, %v623_v9  ;;  %v628_v23 = vmax.f32 %v520_v10, 0.0  ;;  %v512_v24 = vadd.f32 %v8581_v37, %v511_v11  ;;  %v7322_v25 = vpop.f32.mrf.mxu0 }
 0x157   : > { %v1191_v26 = vsel %vm8600_vm10, %v884_v15, %v1190_v8  ;;  %v867_v27 = vor.u32 %v865_v5, %v864_v17  ;;  %v868_v28 = vrot.slane %v864_v17, 4  ;;  %v889_v29 = vrot.slane %v887_v18, 7  ;;  %v1197_v18 = vld [vmem:[#allocation2 + $0x24] sm:$0xf] }
 0x158   : > { %1192 = vst [vmem:[#allocation2 + $0x18] sm:$0xf] %v1191_v26  ;;  %v870_v32 = vshrl.u32 %v7003_v21, 16  ;;  %v873_v33 = vshll.u32 %v7003_v21, 16  ;;  %v7008_v34 = vpack.c.bf16 %v628_v23, %v628_v23  ;;  %v626_v35 = vmax.f32 %v512_v24, 0.0  ;;  %v514_v38 = vpop.f32.mrf.mxu0 }
 0x159   : > { %v1184_v39 = vsel %vm8600_vm10, %v867_v27, %v1183_v19  ;;  %v892_v40 = vor.u32 %v890_v20, %v889_v29  ;;  %v894_v41 = vrot.slane %v889_v29, 4  ;;  %v523_v42 = vadd.f32 %v7322_v25, %v8581_v37  ;;  %v1208_v27 = vld [vmem:[#allocation2 + $0x38] sm:$0x1] }
 0x15a   : > { %1185 = vst [vmem:[#allocation2 + $0xc] sm:$0xf] %v1184_v39  ;;  %v872_v43 = vrot.slane %v870_v32, 7  ;;  %v913_v61 = vshrl.u32 %v7008_v34, 16  ;;  %v916_v44 = vshll.u32 %v7008_v34, 16  ;;  %v7006_v45 = vpack.c.bf16 %v626_v35, %v626_v35  ;;  %v7325_v46 = vpop.f32.mrf.mxu0 }
 0x15b   : > { %v893_v47 = vsel %vm8613_vm11, %v885_v16, %v892_v40  ;;  %v1195_v48 = vsel %vm8491_vm2, %v894_v41, %v1194_v31  ;;  %v629_v50 = vmax.f32 %v523_v42, 0.0  ;;  %v515_v52 = vadd.f32 %v8581_v37, %v514_v38  ;;  %v1201_v41 = vld [vmem:[#allocation2 + $0x2c] sm:$0x1] }
 0x15c   : > { %1193 = vst [vmem:[#allocation2 + $0x1c] sm:$0xf] %v893_v47  ;;  %1196 = vst [vmem:[#allocation2 + $0x20] sm:$0x1] %v1195_v48  ;;  %v875_v53 = vor.u32 %v873_v33, %v872_v43  ;;  %v877_v54 = vrot.slane %v872_v43, 4  ;;  %v915_v56 = vrot.slane %v913_v61, 7  ;;  %v527_v59 = vpop.f32.mrf.mxu0  ;;  %v536_v3 = vadd.f32 %v7325_v46, %v8581_v37 }
 0x15d   : > { %v896_v57 = vshrl.u32 %v7006_v45, 16  ;;  %v899_v62 = vshll.u32 %v7006_v45, 16  ;;  %v7009_v63 = vpack.c.bf16 %v629_v50, %v629_v50  ;;  %v627_v0 = vmax.f32 %v515_v52, 0.0 }
 0x15e   : > { %v876_v4 = vsel %vm8613_vm11, %v868_v28, %v875_v53  ;;  %v1188_v5 = vsel %vm8491_vm2, %v877_v54, %v1187_v49  ;;  %v918_v6 = vor.u32 %v916_v44, %v915_v56  ;;  %v919_v8 = vrot.slane %v915_v56, 4  ;;  %v7326_v9 = vpop.f32.mrf.mxu0  ;;  %v1246_v54 = vld [vmem:[#allocation2 + $0x78] sm:$0xf] }
 0x15f   : > { %1186 = vst [vmem:[#allocation2 + $0x10] sm:$0xf] %v876_v4  ;;  %1189 = vst [vmem:[#allocation2 + $0x14] sm:$0x1] %v1188_v5  ;;  %v898_v10 = vrot.slane %v896_v57, 7  ;;  %v921_v11 = vshrl.u32 %v7009_v63, 16  ;;  %v7007_v16 = vpack.c.bf16 %v627_v0, %v627_v0  ;;  %v528_v20 = vadd.f32 %v8581_v37, %v527_v59 }
 0x160   : > { %v924_v15 = vshll.u32 %v7009_v63, 16  ;;  %v1205_v17 = vsel %vm8600_vm10, %v918_v6, %v1204_v60  ;;  %v632_v19 = vmax.f32 %v536_v3, 0.0  ;;  %v539_v21 = vadd.f32 %v7326_v9, %v8581_v37  ;;  %v530_v23 = vpop.f32.mrf.mxu0  ;;  %v1218_v59 = vld [vmem:[#allocation2 + $0x48] sm:$0xf]  ;;  %v1211_v6 = vld [vmem:[#allocation2 + $0x3c] sm:$0xf] }
 0x161   : > { %1206 = vst [vmem:[#allocation2 + $0x30] sm:$0xf] %v1205_v17  ;;  %v901_v24 = vor.u32 %v899_v62, %v898_v10  ;;  %v902_v25 = vrot.slane %v898_v10, 4  ;;  %v923_v26 = vrot.slane %v921_v11, 7  ;;  %v904_v28 = vshrl.u32 %v7007_v16, 16 }
 0x162   : > { %v907_v29 = vshll.u32 %v7007_v16, 16  ;;  %v7012_v31 = vpack.c.bf16 %v632_v19, %v632_v19  ;;  %v630_v32 = vmax.f32 %v528_v20, 0.0  ;;  %v633_v33 = vmax.f32 %v539_v21, 0.0  ;;  %v7329_v40 = vpop.f32.mrf.mxu0  ;;  %v1222_v17 = vld [vmem:[#allocation2 + $0x50] sm:$0x1] }
 0x163   : > { %v1198_v34 = vsel %vm8600_vm10, %v901_v24, %v1197_v18  ;;  %v926_v35 = vor.u32 %v924_v15, %v923_v26  ;;  %v928_v38 = vrot.slane %v923_v26, 4  ;;  %v906_v39 = vrot.slane %v904_v28, 7  ;;  %v1239_v26 = vld [vmem:[#allocation2 + $0x6c] sm:$0xf] }
 0x164   : > { %1199 = vst [vmem:[#allocation2 + $0x24] sm:$0xf] %v1198_v34  ;;  %v947_v42 = vshrl.u32 %v7012_v31, 16  ;;  %v950_v43 = vshll.u32 %v7012_v31, 16  ;;  %v7010_v61 = vpack.c.bf16 %v630_v32, %v630_v32  ;;  %v7013_v44 = vpack.c.bf16 %v633_v33, %v633_v33  ;;  %v543_v63 = vpop.f32.mrf.mxu0 }
 0x165   : > { %v927_v45 = vsel %vm8613_vm11, %v919_v8, %v926_v35  ;;  %v1209_v46 = vsel %vm8491_vm2, %v928_v38, %v1208_v27  ;;  %v909_v47 = vor.u32 %v907_v29, %v906_v39  ;;  %v911_v48 = vrot.slane %v906_v39, 4 }
 0x166   : > { %1207 = vst [vmem:[#allocation2 + $0x34] sm:$0xf] %v927_v45  ;;  %1210 = vst [vmem:[#allocation2 + $0x38] sm:$0x1] %v1209_v46  ;;  %v949_v49 = vrot.slane %v947_v42, 7  ;;  %v930_v50 = vshrl.u32 %v7010_v61, 16  ;;  %v1020_v62 = vor.u32 %v1018_v1, %v8605_v12  ;;  %v531_v10 = vadd.f32 %v8581_v37, %v530_v23  ;;  %v562_v23 = vpop.f32.mrf.mxu1 }
 0x167   : > { %v933_v52 = vshll.u32 %v7010_v61, 16  ;;  %v955_v53 = vshrl.u32 %v7013_v44, 16  ;;  %v910_v56 = vsel %vm8613_vm11, %v902_v25, %v909_v47  ;;  %v1202_v57 = vsel %vm8491_vm2, %v911_v48, %v1201_v41  ;;  %v1215_v47 = vld [vmem:[#allocation2 + $0x44] sm:$0x1] }
 0x168   : > { %v958_v60 = vshll.u32 %v7013_v44, 16  ;;  %1200 = vst [vmem:[#allocation2 + $0x28] sm:$0xf] %v910_v56  ;;  %1203 = vst [vmem:[#allocation2 + $0x2c] sm:$0x1] %v1202_v57  ;;  %v952_v0 = vor.u32 %v950_v43, %v949_v49  ;;  %v953_v3 = vrot.slane %v949_v49, 4  ;;  %v1247_v9 = vsel %vm8600_vm10, %v1020_v62, %v1246_v54  ;;  %v7337_v45 = vpop.f32.mrf.mxu1 }
 0x169   : > { %v8647_v4 = vrot.slane %v930_v50, 7  ;;  %v957_v5 = vrot.slane %v955_v53, 7  ;;  %v1021_v8 = vrot.slane %v8605_v12, 4  ;;  %v8655_v51 = vrot.slane %v998_v14, 7  ;;  %1248 = vst [vmem:[#allocation2 + $0x78] sm:$0xf] %v1247_v9  ;;  %v7330_v14 = vpop.f32.mrf.mxu0 }
 0x16a   : > { %v1219_v1 = vsel %vm8600_vm10, %v952_v0, %v1218_v59  ;;  %v631_v19 = vmax.f32 %v531_v10, 0.0  ;;  %v1001_v20 = vshll.u32 %v8596_v2, 16  ;;  %v552_v27 = vadd.f32 %v7329_v40, %v8581_v37  ;;  %v1250_v56 = vld [vmem:[#allocation2 + $0x80] sm:$0x1] }
 0x16b   : > { %v935_v11 = vor.u32 %v933_v52, %v8647_v4  ;;  %v936_v15 = vrot.slane %v8647_v4, 4  ;;  %v960_v16 = vor.u32 %v958_v60, %v957_v5  ;;  %1220 = vst [vmem:[#allocation2 + $0x48] sm:$0xf] %v1219_v1  ;;  %v962_v18 = vrot.slane %v957_v5, 4  ;;  %v1232_v1 = vld [vmem:[#allocation2 + $0x60] sm:$0xf] }
 0x16c   : > { %v1004_v21 = vrot.slane %v8655_v51, 4  ;;  %v641_v28 = vmax.f32 %v8591_v55, 0.0  ;;  %v7011_v29 = vpack.c.bf16 %v631_v19, %v631_v19  ;;  %v1003_v31 = vor.u32 %v1001_v20, %v8655_v51 }
 0x16d   : > { %v1212_v24 = vsel %vm8600_vm10, %v935_v11, %v1211_v6  ;;  %v961_v25 = vsel %vm8613_vm11, %v953_v3, %v960_v16  ;;  %v1223_v2 = vsel %vm8491_vm2, %v962_v18, %v1222_v17  ;;  %v544_v32 = vadd.f32 %v8581_v37, %v543_v63  ;;  %v575_v6 = vpop.f32.mrf.mxu1  ;;  %v1225_v16 = vld [vmem:[#allocation2 + $0x54] sm:$0xf]  ;;  %v546_v18 = vpop.f32.mrf.mxu0 }
 0x16e   : > { %1213 = vst [vmem:[#allocation2 + $0x3c] sm:$0xf] %v1212_v24  ;;  %1221 = vst [vmem:[#allocation2 + $0x4c] sm:$0xf] %v961_v25  ;;  %v636_v33 = vmax.f32 %v552_v27, 0.0  ;;  %v7021_v34 = vpack.c.bf16 %v641_v28, %v641_v28  ;;  %v563_v35 = vadd.f32 %v8581_v37, %v562_v23  ;;  %v555_v38 = vadd.f32 %v7330_v14, %v8581_v37 }
 0x16f   : > { %1224 = vst [vmem:[#allocation2 + $0x50] sm:$0x1] %v1223_v2  ;;  %v938_v39 = vshrl.u32 %v7011_v29, 16  ;;  %v941_v40 = vshll.u32 %v7011_v29, 16  ;;  %v1240_v55 = vsel %vm8600_vm10, %v1003_v31, %v1239_v26  ;;  %v634_v41 = vmax.f32 %v544_v32, 0.0  ;;  %v8700_v31 = vpop.f32.mrf.mxu1 }
 0x170   : > { %1241 = vst [vmem:[#allocation2 + $0x6c] sm:$0xf] %v1240_v55  ;;  %v7016_v42 = vpack.c.bf16 %v636_v33, %v636_v33  ;;  %v1023_v43 = vshrl.u32 %v7021_v34, 16  ;;  %v1026_v61 = vshll.u32 %v7021_v34, 16  ;;  %v639_v44 = vmax.f32 %v563_v35, 0.0 }
 0x171   : > { %v940_v46 = vrot.slane %v938_v39, 7  ;;  %v7014_v48 = vpack.c.bf16 %v634_v41, %v634_v41  ;;  %v637_v49 = vmax.f32 %v555_v38, 0.0  ;;  %v584_v50 = vadd.f32 %v7337_v45, %v8581_v37  ;;  %v1243_v26 = vld [vmem:[#allocation2 + $0x74] sm:$0x1]  ;;  %v1297_v29 = vld [vmem:[#allocation2 + $0xc] sm:$0xf] }
 0x172   : > { %v981_v52 = vshrl.u32 %v7016_v42, 16  ;;  %v984_v53 = vshll.u32 %v7016_v42, 16  ;;  %v1025_v54 = vrot.slane %v1023_v43, 7  ;;  %v7019_v57 = vpack.c.bf16 %v639_v44, %v639_v44  ;;  %v1236_v44 = vld [vmem:[#allocation2 + $0x68] sm:$0x1] }
 0x173   : > { %v943_v59 = vor.u32 %v941_v40, %v940_v46  ;;  %v945_v60 = vrot.slane %v940_v46, 4  ;;  %v964_v62 = vshrl.u32 %v7014_v48, 16  ;;  %v967_v63 = vshll.u32 %v7014_v48, 16 }
 0x174   : > { %v8678_v0 = vrot.slane %v981_v52, 7  ;;  %v1028_v3 = vor.u32 %v1026_v61, %v1025_v54  ;;  %v1030_v4 = vrot.slane %v1025_v54, 4  ;;  %v1006_v5 = vshrl.u32 %v7019_v57, 16  ;;  %v1299_v54 = vld [vmem:[#allocation2 + $0x18] sm:$0xf] }
 0x175   : > { %v944_v9 = vsel %vm8613_vm11, %v936_v15, %v943_v59  ;;  %v1216_v10 = vsel %vm8491_vm2, %v945_v60, %v1215_v47  ;;  %v8684_v11 = vrot.slane %v964_v62, 7  ;;  %v1009_v17 = vshll.u32 %v7019_v57, 16  ;;  %v8714_v60 = vld [vmem:[#allocation2 + $0x10] sm:$0xf] }
 0x176   : > { %1214 = vst [vmem:[#allocation2 + $0x40] sm:$0xf] %v944_v9  ;;  %1217 = vst [vmem:[#allocation2 + $0x44] sm:$0x1] %v1216_v10  ;;  %v986_v19 = vor.u32 %v984_v53, %v8678_v0  ;;  %v987_v20 = vrot.slane %v8678_v0, 4  ;;  %v1029_v15 = vsel %vm8613_vm11, %v1021_v8, %v1028_v3  ;;  %v1251_v23 = vsel %vm8491_vm2, %v1030_v4, %v1250_v56 }
 0x177   : > { %1249 = vst [vmem:[#allocation2 + $0x7c] sm:$0xf] %v1029_v15  ;;  %1252 = vst [vmem:[#allocation2 + $0x80] sm:$0x1] %v1251_v23  ;;  %v969_v14 = vor.u32 %v967_v63, %v8684_v11  ;;  %v970_v24 = vrot.slane %v8684_v11, 4  ;;  %v1008_v25 = vrot.slane %v1006_v5, 7  ;;  %v7017_v27 = vpack.c.bf16 %v637_v49, %v637_v49  ;;  %v578_v49 = vpop.f32.mrf.mxu1 }
 0x178   : > { %v1233_v28 = vsel %vm8600_vm10, %v986_v19, %v1232_v1  ;;  %v644_v2 = vmax.f32 %v584_v50, 0.0  ;;  %v547_v12 = vadd.f32 %v8581_v37, %v546_v18  ;;  %v576_v8 = vadd.f32 %v8581_v37, %v575_v6  ;;  %v1260_v0 = vld [vmem:[#allocation2 + $0x90] sm:$0xf]  ;;  %v1229_v3 = vld [vmem:[#allocation2 + $0x5c] sm:$0x1] }
 0x179   : > { %1234 = vst [vmem:[#allocation2 + $0x60] sm:$0xf] %v1233_v28  ;;  %v1226_v32 = vsel %vm8600_vm10, %v969_v14, %v1225_v16  ;;  %v1011_v33 = vor.u32 %v1009_v17, %v1008_v25  ;;  %v1013_v34 = vrot.slane %v1008_v25, 4  ;;  %v989_v35 = vshrl.u32 %v7017_v27, 16  ;;  %v1253_v5 = vld [vmem:[#allocation2 + $0x84] sm:$0xf]  ;;  %v7341_v18 = vpop.f32.mrf.mxu1 }
 0x17a   : > { %1227 = vst [vmem:[#allocation2 + $0x54] sm:$0xf] %v1226_v32  ;;  %v992_v38 = vshll.u32 %v7017_v27, 16  ;;  %v7024_v39 = vpack.c.bf16 %v644_v2, %v644_v2  ;;  %v635_v40 = vmax.f32 %v547_v12, 0.0  ;;  %v642_v55 = vmax.f32 %v576_v8, 0.0  ;;  %v7967_v25 = vld [vmem:[#allocation8 + $0xf0] sm:$0xff]  }
 0x17b   : > { %v1012_v41 = vsel %vm8613_vm11, %v1004_v21, %v1011_v33  ;;  %v1244_v42 = vsel %vm8491_vm2, %v1013_v34, %v1243_v26  ;;  %v991_v43 = vrot.slane %v989_v35, 7  ;;  %v1387_v61 = vshrl.u32 %v1297_v29, 16  ;;  %v8724_v17 = vld [vmem:[#allocation2 + $0x1c] sm:$0xf]  ;;  %v1301_v14 = vld [vmem:[#allocation2 + $0x24] sm:$0xf] }
 0x17c   : > { %1242 = vst [vmem:[#allocation2 + $0x70] sm:$0xf] %v1012_v41  ;;  %1245 = vst [vmem:[#allocation2 + $0x74] sm:$0x1] %v1244_v42  ;;  %v1049_v45 = vshrl.u32 %v7024_v39, 16  ;;  %v1052_v46 = vshll.u32 %v7024_v39, 16  ;;  %v7015_v47 = vpack.c.bf16 %v635_v40, %v635_v40  ;;  %v7022_v48 = vpack.c.bf16 %v642_v55, %v642_v55  ;;  %v591_v40 = vpop.f32.mrf.mxu1 }
 0x17d   : > { %v994_v50 = vor.u32 %v992_v38, %v991_v43  ;;  %v996_v52 = vrot.slane %v991_v43, 4  ;;  %v8710_v53 = vrot.slane %v1387_v61, 4  ;;  %v1390_v51 = vshll.u32 %v1297_v29, 16  ;;  %v8737_v33 = vld [vmem:[#allocation2 + $0x28] sm:$0xf]  ;;  %v7970_v42 = vld [vmem:[#allocation8 + $0xe8] sm:$0xff]  }
 0x17e   : > { %v8712_v21 = vrot.slane %v1049_v45, 7  ;;  %v972_v56 = vshrl.u32 %v7015_v47, 16  ;;  %v975_v57 = vshll.u32 %v7015_v47, 16  ;;  %v1032_v59 = vshrl.u32 %v7022_v48, 16 }
 0x17f   : > { %v995_v62 = vsel %vm8613_vm11, %v987_v20, %v994_v50  ;;  %v1237_v63 = vsel %vm8491_vm2, %v996_v52, %v1236_v44  ;;  %v1035_v4 = vshll.u32 %v7022_v48, 16  ;;  %v1392_v6 = vrot.slane %v1390_v51, 5 }
 0x180   : > { %1235 = vst [vmem:[#allocation2 + $0x64] sm:$0xf] %v995_v62  ;;  %1238 = vst [vmem:[#allocation2 + $0x68] sm:$0x1] %v1237_v63  ;;  %v1054_v9 = vor.u32 %v1052_v46, %v8712_v21  ;;  %v1055_v10 = vrot.slane %v8712_v21, 4  ;;  %v974_v1 = vrot.slane %v972_v56, 7  ;;  %v6747_v20 = vcombine.low %v1297_v29, %v8714_v60 }
 0x181   : > { %v8722_v16 = vrot.slane %v1032_v59, 7  ;;  %v1400_v19 = vshrl.u32 %v8714_v60, 16  ;;  %v1411_v15 = vshrl.u32 %v1299_v54, 16  ;;  %v1414_v23 = vshll.u32 %v1299_v54, 16  ;;  %v7972_v62 = vld [vmem:[#allocation8 + $0xe0] sm:$0xff]  }
 0x182   : > { %v1261_v26 = vsel %vm8600_vm10, %v1054_v9, %v1260_v0  ;;  %v977_v27 = vor.u32 %v975_v57, %v974_v1  ;;  %v979_v28 = vrot.slane %v974_v1, 4  ;;  %7412 = vmatmul.mubr.bf16.vlgmr.msra.gmra.mxu0 %v6747_v20  ;;  %v1424_v29 = vshrl.u32 %v8724_v17, 16  ;;  %v7342_v9 = vpop.f32.mrf.mxu1  ;;  %v1257_v20 = vld [vmem:[#allocation2 + $0x8c] sm:$0x1] }
 0x183   : > { %v1037_v2 = vor.u32 %v1035_v4, %v8722_v16  ;;  %1262 = vst [vmem:[#allocation2 + $0x90] sm:$0xf] %v1261_v26  ;;  %v1038_v12 = vrot.slane %v8722_v16, 4  ;;  %v8732_v8 = vrot.slane %v1411_v15, 4  ;;  %v8734_v32 = vrot.slane %v1414_v23, 5  ;;  %7492 = vmatpush3.bf16.msra.mxu0 %v8575_v36 }
 0x184   : > { %v978_v34 = vsel %vm8613_vm11, %v970_v24, %v977_v27  ;;  %v1230_v35 = vsel %vm8491_vm2, %v979_v28, %v1229_v3  ;;  %v6748_v39 = vcombine.low %v1299_v54, %v8724_v17  ;;  %v587_v11 = vadd.f32 %v8700_v31, %v8581_v37  ;;  %7493 = vmatprep.subr.bf16.mxu0 %v7967_v25  ;;  %v1344_v31 = vld [vmem:[#allocation2 + $0x14] sm:$0x1]  ;;  %v1274_v28 = vld [vmem:[#allocation2 + $0xa8] sm:$0xf] }
 0x185   : > { %v1254_v38 = vsel %vm8600_vm10, %v1037_v2, %v1253_v5  ;;  %1228 = vst [vmem:[#allocation2 + $0x58] sm:$0xf] %v978_v34  ;;  %1231 = vst [vmem:[#allocation2 + $0x5c] sm:$0x1] %v1230_v35  ;;  %v579_v55 = vadd.f32 %v8581_v37, %v578_v49  ;;  %v600_v24 = vadd.f32 %v7341_v18, %v8581_v37  ;;  %v1435_v43 = vshrl.u32 %v1301_v14, 16  ;;  %v7975_v34 = vld [vmem:[#allocation8 + $0xd8] sm:$0xff]  }
 0x186   : > { %1255 = vst [vmem:[#allocation2 + $0x84] sm:$0xf] %v1254_v38  ;;  %v592_v41 = vadd.f32 %v8581_v37, %v591_v40  ;;  %7415 = vmatprep.mubr.bf16.mxu0 %v6748_v39  ;;  %v1438_v61 = vshll.u32 %v1301_v14, 16  ;;  %v1448_v44 = vshrl.u32 %v8737_v33, 16  ;;  %v6749_v36 = vcombine.low %v1301_v14, %v8737_v33  ;;  %v8766_v5 = vld [vmem:[#allocation2 + $0x30] sm:$0xf] }
 0x187   : > { %v645_v45 = vmax.f32 %v587_v11, 0.0  ;;  %v643_v46 = vmax.f32 %v579_v55, 0.0  ;;  %v648_v47 = vmax.f32 %v600_v24, 0.0  ;;  %v8756_v50 = vrot.slane %v1435_v43, 4  ;;  %7494 = vmatpush3.bf16.msra.mxu0 %v7967_v25  ;;  %v1264_v18 = vld [vmem:[#allocation2 + $0x98] sm:$0x1]  ;;  %v594_v11 = vpop.f32.mrf.mxu1 }
 0x188   : > { %v646_v48 = vmax.f32 %v592_v41, 0.0  ;;  %v8758_v49 = vrot.slane %v1438_v61, 5  ;;  %v1393_v52 = vor.u32 %v1392_v6, %v8710_v53  ;;  %v1396_v51 = vshll.u32 %v8714_v60, 16  ;;  %7495 = vmatprep.subr.bf16.mxu0 %v7970_v42  ;;  %v1267_v43 = vld [vmem:[#allocation2 + $0x9c] sm:$0xf] }
 0x189   : > { %v7025_v54 = vpack.c.bf16 %v645_v45, %v645_v45  ;;  %v7023_v56 = vpack.c.bf16 %v643_v46, %v643_v46  ;;  %v7028_v57 = vpack.c.bf16 %v648_v47, %v648_v47  ;;  %v1402_v3 = vrot.slane %v1400_v19, 4  ;;  %v8782_v47 = vld [vmem:[#allocation2 + $0x34] sm:$0xf] }
 0x18a   : > { %v7026_v59 = vpack.c.bf16 %v646_v48, %v646_v48  ;;  %v8762_v63 = vrot.slane %v1393_v52, 4  ;;  %v8764_v0 = vrot.slane %v1396_v51, 5  ;;  %v1406_v4 = vshll.u32 %v1344_v31, 16  ;;  %7416 = vmatmul.mubr.bf16.gmra.mxu0 %v6749_v36 }
 0x18b   : > { %v1057_v1 = vshrl.u32 %v7025_v54, 16  ;;  %v1060_v53 = vshll.u32 %v7025_v54, 16  ;;  %v1040_v6 = vshrl.u32 %v7023_v56, 16  ;;  %v1043_v60 = vshll.u32 %v7023_v56, 16  ;;  %7496 = vmatpush3.bf16.msra.mxu0 %v7970_v42  ;;  %v7977_v54 = vld [vmem:[#allocation8 + $0xd0] sm:$0xff]  }
 0x18c   : > { %v1083_v15 = vshrl.u32 %v7028_v57, 16  ;;  %v1086_v23 = vshll.u32 %v7028_v57, 16  ;;  %v1066_v14 = vshrl.u32 %v7026_v59, 16  ;;  %v1069_v25 = vshll.u32 %v7026_v59, 16  ;;  %7497 = vmatprep.subr.bf16.mxu0 %v7972_v62  ;;  %v8802_v57 = vld [vmem:[#allocation2 + $0x20] sm:$0x1] }
 0x18d   : > { %v1059_v26 = vrot.slane %v1057_v1, 7  ;;  %v1042_v27 = vrot.slane %v1040_v6, 7  ;;  %v1399_v19 = vsel %vm8546_vm7, %v8762_v63, %v8764_v0  ;;  %v1403_v2 = vor.u32 %v1402_v3, %v8764_v0  ;;  %v8816_v6 = vld [vmem:[#allocation2 + $0x3c] sm:$0xf] }
 0x18e   : > { %v8773_v35 = vrot.slane %v1083_v15, 7  ;;  %v8775_v38 = vrot.slane %v1066_v14, 7  ;;  %v1408_v39 = vrot.slane %v1406_v4, 5  ;;  %v1459_v40 = vshrl.u32 %v8766_v5, 16  ;;  %v7980_v15 = vld [vmem:[#allocation8 + $0xc8] sm:$0xff]  }
 0x18f   : > { %v1062_v55 = vor.u32 %v1060_v53, %v1059_v26  ;;  %v1064_v24 = vrot.slane %v1059_v26, 4  ;;  %v1045_v41 = vor.u32 %v1043_v60, %v1042_v27  ;;  %v1047_v42 = vrot.slane %v1042_v27, 4  ;;  %7498 = vmatpush3.bf16.msra.mxu0 %v7972_v62 }
 0x190   : > { %v1088_v61 = vor.u32 %v1086_v23, %v8773_v35  ;;  %v1089_v36 = vrot.slane %v8773_v35, 4  ;;  %v1071_v45 = vor.u32 %v1069_v25, %v8775_v38  ;;  %v1072_v46 = vrot.slane %v8775_v38, 4  ;;  %7499 = vmatprep.subr.bf16.mxu0 %v7975_v34 }
 0x191   : > { %v1063_v48 = vsel %vm8613_vm11, %v1055_v10, %v1062_v55  ;;  %v1265_v31 = vsel %vm8491_vm2, %v1064_v24, %v1264_v18  ;;  %v1046_v52 = vsel %vm8613_vm11, %v1038_v12, %v1045_v41  ;;  %v1258_v51 = vsel %vm8491_vm2, %v1047_v42, %v1257_v20  ;;  %v7345_v12 = vpop.f32.mrf.mxu1  ;;  %v7958_v20 = vld [vmem:[#allocation8 + $0xb0] sm:$0xff]  }
 0x192   : > { %1263 = vst [vmem:[#allocation2 + $0x94] sm:$0xf] %v1063_v48  ;;  %1266 = vst [vmem:[#allocation2 + $0x98] sm:$0x1] %v1265_v31  ;;  %v1275_v21 = vsel %vm8600_vm10, %v1088_v61, %v1274_v28  ;;  %v1268_v10 = vsel %vm8600_vm10, %v1071_v45, %v1267_v43  ;;  %v1404_v56 = vrot.slane %v1403_v2, 4  ;;  %v8800_v16 = vrot.slane %v1459_v40, 4 }
 0x193   : > { %1256 = vst [vmem:[#allocation2 + $0x88] sm:$0xf] %v1046_v52  ;;  %1259 = vst [vmem:[#allocation2 + $0x8c] sm:$0x1] %v1258_v51  ;;  %v1462_v59 = vshll.u32 %v8766_v5, 16  ;;  %v1472_v62 = vshrl.u32 %v8782_v47, 16  ;;  %v6750_v63 = vcombine.low %v8766_v5, %v8782_v47  ;;  %v603_v0 = vadd.f32 %v7342_v9, %v8581_v37  ;;  %7500 = vmatpush3.bf16.msra.mxu0 %v7975_v34 }
 0x194   : > { %1276 = vst [vmem:[#allocation2 + $0xa8] sm:$0xf] %v1275_v21  ;;  %1269 = vst [vmem:[#allocation2 + $0x9c] sm:$0xf] %v1268_v10  ;;  %v1409_v3 = vsel %vm8546_vm7, %v1404_v56, %v1408_v39  ;;  %v1417_v4 = vor.u32 %v8734_v32, %v8732_v8  ;;  %v1420_v1 = vshll.u32 %v8724_v17, 16  ;;  %v1426_v53 = vrot.slane %v1424_v29, 4  ;;  %7501 = vmatprep.subr.bf16.mxu0 %v7977_v54  ;;  %v607_v29 = vpop.f32.mrf.mxu1 }
 0x195   : > { %v6723_v60 = vcombine.low %v1399_v19, %v1409_v3  ;;  %v8818_v18 = vrot.slane %v1462_v59, 5  ;;  %7419 = vmatprep.mubr.bf16.mxu0 %v6750_v63  ;;  %v649_v5 = vmax.f32 %v603_v0, 0.0  ;;  %v1430_v9 = vshll.u32 %v8802_v57, 16  ;;  %v8828_v39 = vld [vmem:[#allocation2 + $0x40] sm:$0xf]  ;;  %v7982_v61 = vld [vmem:[#allocation8 + $0xc0] sm:$0xff]  }
 0x196   : > { %v1418_v23 = vrot.slane %v1417_v4, 4  ;;  %v1422_v8 = vrot.slane %v1420_v1, 5  ;;  %v595_v32 = vadd.f32 %v8581_v37, %v594_v11  ;;  %v616_v17 = vadd.f32 %v7345_v12, %v8581_v37  ;;  %v1278_v48 = vld [vmem:[#allocation2 + $0xb0] sm:$0x1]  ;;  %v7964_v12 = vld [vmem:[#allocation8 + $0xa0] sm:$0xff]  }
 0x197   : > { %7364 = vmatmul.mubr.bf16.vlgmr.msra.gmra.mxu1 %v6723_v60  ;;  %v7029_v14 = vpack.c.bf16 %v649_v5, %v649_v5  ;;  %v1432_v25 = vrot.slane %v1430_v9, 5  ;;  %v608_v26 = vadd.f32 %v8581_v37, %v607_v29  ;;  %v1483_v27 = vshrl.u32 %v8816_v6, 16  ;;  %7502 = vmatpush3.bf16.msra.mxu0 %v7977_v54  ;;  %v7961_v37 = vld [vmem:[#allocation8 + $0xa8] sm:$0xff]   ;;  %v8838_v59 = vld [vmem:[#allocation8 + $0x178] sm:$0xff]  }
 0x198   : > { %7444 = vmatpush3.bf16.msra.mxu1 %v8558_v22  ;;  %v1423_v28 = vsel %vm8546_vm7, %v1418_v23, %v1422_v8  ;;  %v1427_v19 = vor.u32 %v1426_v53, %v1422_v8  ;;  %v647_v2 = vmax.f32 %v595_v32, 0.0  ;;  %v652_v34 = vmax.f32 %v616_v17, 0.0  ;;  %7503 = vmatprep.subr.bf16.mxu0 %v7980_v15  ;;  %v1271_v4 = vld [vmem:[#allocation2 + $0xa4] sm:$0x1]  ;;  %v1288_v53 = vld [vmem:[#allocation2 + $0xc0] sm:$0xf] }
 0x199   : > { %v1091_v40 = vshrl.u32 %v7029_v14, 16  ;;  %v1094_v11 = vshll.u32 %v7029_v14, 16  ;;  %v650_v55 = vmax.f32 %v608_v26, 0.0  ;;  %v8830_v24 = vrot.slane %v1483_v27, 4  ;;  %7445 = vmatprep.subr.bf16.mxu1 %v7958_v20  ;;  %v8842_v23 = vld [vmem:[#allocation2 + $0x2c] sm:$0x1]  ;;  %v7346_v26 = vpop.f32.mrf.mxu1 }
 0x19a   : > { %v1428_v41 = vrot.slane %v1427_v19, 4  ;;  %v7027_v42 = vpack.c.bf16 %v647_v2, %v647_v2  ;;  %v7032_v22 = vpack.c.bf16 %v652_v34, %v652_v34  ;;  %v1486_v43 = vshll.u32 %v8816_v6, 16 }
 0x19b   : > { %v1093_v45 = vrot.slane %v1091_v40, 7  ;;  %v7030_v31 = vpack.c.bf16 %v650_v55, %v650_v55  ;;  %v1496_v52 = vshrl.u32 %v8828_v39, 16  ;;  %v6751_v51 = vcombine.low %v8816_v6, %v8828_v39  ;;  %7504 = vmatpush3.bf16.msra.mxu0 %v7980_v15 }
 0x19c   : > { %v1433_v54 = vsel %vm8546_vm7, %v1428_v41, %v1432_v25  ;;  %v1074_v21 = vshrl.u32 %v7027_v42, 16  ;;  %v1077_v10 = vshll.u32 %v7027_v42, 16  ;;  %v1117_v56 = vshrl.u32 %v7032_v22, 16  ;;  %7446 = vmatpush3.bf16.msra.mxu1 %v7958_v20  ;;  %7505 = vmatprep.subr.bf16.mxu0 %v7982_v61  ;;  %v1307_v25 = vld [vmem:[#allocation2 + $0x48] sm:$0xf] }
 0x19d   : > { %v1096_v63 = vor.u32 %v1094_v11, %v1093_v45  ;;  %v1098_v0 = vrot.slane %v1093_v45, 4  ;;  %v6724_v3 = vcombine.low %v1423_v28, %v1433_v54  ;;  %v1120_v1 = vshll.u32 %v7032_v22, 16  ;;  %7420 = vmatmul.mubr.bf16.gmra.mxu0 %v6751_v51  ;;  %7447 = vmatprep.subr.bf16.mxu1 %v7961_v37  ;;  %v1281_v11 = vld [vmem:[#allocation2 + $0xb4] sm:$0xf] }
 0x19e   : > { %v1076_v6 = vrot.slane %v1074_v21, 7  ;;  %v8840_v60 = vrot.slane %v1117_v56, 7  ;;  %v1100_v5 = vshrl.u32 %v7030_v31, 16  ;;  %v1103_v9 = vshll.u32 %v7030_v31, 16  ;;  %v1309_v54 = vld [vmem:[#allocation2 + $0x54] sm:$0xf] }
 0x19f   : > { %v1097_v20 = vsel %vm8613_vm11, %v1089_v36, %v1096_v63  ;;  %v1279_v15 = vsel %vm8491_vm2, %v1098_v0, %v1278_v48  ;;  %7367 = vmatprep.mubr.bf16.mxu1 %v6724_v3  ;;  %v8850_v8 = vrot.slane %v1486_v43, 5  ;;  %v1441_v32 = vor.u32 %v8758_v49, %v8756_v50  ;;  %v7969_v36 = vld [vmem:[#allocation8 + $0x98] sm:$0xff]   ;;  %7506 = vmatpush3.bf16.msra.mxu0 %v7982_v61  ;;  %v8861_v49 = vld [vmem:[#allocation2 + $0x4c] sm:$0xf]  ;;  %v8877_v43 = vld [vmem:[#allocation2 + $0x38] sm:$0x1]  ;;  %v610_v61 = vpop.f32.mrf.mxu1 }
 0x1a0   : > { %1277 = vst [vmem:[#allocation2 + $0xac] sm:$0xf] %v1097_v20  ;;  %1280 = vst [vmem:[#allocation2 + $0xb0] sm:$0x1] %v1279_v15  ;;  %v1079_v17 = vor.u32 %v1077_v10, %v1076_v6  ;;  %v1081_v29 = vrot.slane %v1076_v6, 4  ;;  %v1122_v14 = vor.u32 %v1120_v1, %v8840_v60  ;;  %v1123_v35 = vrot.slane %v8840_v60, 4  ;;  %7448 = vmatpush3.bf16.msra.mxu1 %v7961_v37 }
 0x1a1   : > { %v8856_v27 = vrot.slane %v1100_v5, 7  ;;  %v1442_v28 = vrot.slane %v1441_v32, 4  ;;  %v1444_v19 = vshll.u32 %v8737_v33, 16  ;;  %v1450_v50 = vrot.slane %v1448_v44, 4  ;;  %7449 = vmatprep.subr.bf16.mxu1 %v7964_v12  ;;  %7587 = vmatprep.subr.bf16.mxu0 %v8838_v59  ;;  %v7974_v21 = vld [vmem:[#allocation8 + $0x90] sm:$0xff]  }
 0x1a2   : > { %v1080_v2 = vsel %vm8613_vm11, %v1072_v46, %v1079_v17  ;;  %v1272_v34 = vsel %vm8491_vm2, %v1081_v29, %v1271_v4  ;;  %v1289_v40 = vsel %vm8600_vm10, %v1122_v14, %v1288_v53  ;;  %v1454_v33 = vshll.u32 %v8842_v23, 16  ;;  %v8063_v56 = vld [vmem:[%s10963_s2] ss:$0 sm:$0xff]  ;;  %v8902_v14 = vld [vmem:[#allocation2 + $0x44] sm:$0x1] }
 0x1a3   : > { %1270 = vst [vmem:[#allocation2 + $0xa0] sm:$0xf] %v1080_v2  ;;  %1273 = vst [vmem:[#allocation2 + $0xa4] sm:$0x1] %v1272_v34  ;;  %v1105_v44 = vor.u32 %v1103_v9, %v8856_v27  ;;  %v1106_v55 = vrot.slane %v8856_v27, 4  ;;  %v1446_v38 = vrot.slane %v1444_v19, 5  ;;  %v6752_v22 = vcombine.low %v1307_v25, %v8861_v49 }
 0x1a4   : > { %1290 = vst [vmem:[#allocation2 + $0xc0] sm:$0xf] %v1289_v40  ;;  %v1507_v37 = vshrl.u32 %v1307_v25, 16  ;;  %v1456_v41 = vrot.slane %v1454_v33, 5  ;;  %v1510_v46 = vshll.u32 %v1307_v25, 16  ;;  %v1520_v42 = vshrl.u32 %v8861_v49, 16  ;;  %7450 = vmatpush3.bf16.msra.mxu1 %v7964_v12 }
 0x1a5   : > { %v1282_v45 = vsel %vm8600_vm10, %v1105_v44, %v1281_v11  ;;  %v1447_v48 = vsel %vm8546_vm7, %v1442_v28, %v1446_v38  ;;  %v1451_v31 = vor.u32 %v1450_v50, %v1446_v38  ;;  %7451 = vmatprep.subr.bf16.mxu1 %v7969_v36  ;;  %7423 = vmatprep.mubr.bf16.mxu0 %v6752_v22  ;;  %v1468_v63 = vshll.u32 %v8782_v47, 16  ;;  %v8896_v9 = vld [vmem:[#allocation2 + $0x58] sm:$0xf]  ;;  %v7979_v25 = vld [vmem:[#allocation8 + $0x88] sm:$0xff]   ;;  %v1292_v11 = vld [vmem:[#allocation2 + $0xc8] sm:$0x1] }
 0x1a6   : > { %v8883_v51 = vrot.slane %v1507_v37, 4  ;;  %1283 = vst [vmem:[#allocation2 + $0xb4] sm:$0xf] %v1282_v45  ;;  %v8885_v10 = vrot.slane %v1510_v46, 5  ;;  %v619_v12 = vadd.f32 %v8063_v56, %v7346_v26  ;;  %v1465_v7 = vor.u32 %v8818_v18, %v8800_v16  ;;  %v8945_v27 = vld [vmem:[#allocation2 + $0x70] sm:$0xf] }
 0x1a7   : > { %v1452_v0 = vrot.slane %v1451_v31, 4  ;;  %v1474_v3 = vrot.slane %v1472_v62, 4  ;;  %v1478_v4 = vshll.u32 %v8877_v43, 16  ;;  %v611_v1 = vadd.f32 %v8063_v56, %v610_v61  ;;  %v1285_v56 = vld [vmem:[#allocation2 + $0xbc] sm:$0x1] }
 0x1a8   : > { %v653_v53 = vmax.f32 %v619_v12, 0.0  ;;  %v1466_v6 = vrot.slane %v1465_v7, 4  ;;  %v1470_v5 = vrot.slane %v1468_v63, 5  ;;  %v1531_v20 = vshrl.u32 %v1309_v54, 16  ;;  %7452 = vmatpush3.bf16.msra.mxu1 %v7969_v36  ;;  %v8918_v63 = vld [vmem:[#allocation2 + $0x64] sm:$0xf] }
 0x1a9   : > { %v1457_v15 = vsel %vm8546_vm7, %v1452_v0, %v1456_v41  ;;  %v1480_v16 = vrot.slane %v1478_v4, 5  ;;  %v651_v18 = vmax.f32 %v611_v1, 0.0  ;;  %v1534_v32 = vshll.u32 %v1309_v54, 16  ;;  %7453 = vmatprep.subr.bf16.mxu1 %v7974_v21  ;;  %v1311_v41 = vld [vmem:[#allocation2 + $0x60] sm:$0xf] }
 0x1aa   : > { %v6725_v17 = vcombine.low %v1447_v48, %v1457_v15  ;;  %v7033_v47 = vpack.c.bf16 %v653_v53, %v653_v53  ;;  %v1471_v62 = vsel %vm8546_vm7, %v1466_v6, %v1470_v5  ;;  %v1475_v29 = vor.u32 %v1474_v3, %v1470_v5  ;;  %v7983_v48 = vld [vmem:[#allocation8 + $0x80] sm:$0xff]   ;;  %v8922_v53 = vld [vmem:[#allocation8 + $0x138] sm:$0xff]  }
 0x1ab   : > { %v7031_v26 = vpack.c.bf16 %v651_v18, %v651_v18  ;;  %v8904_v28 = vrot.slane %v1531_v20, 4  ;;  %v8906_v36 = vrot.slane %v1534_v32, 5  ;;  %v1544_v19 = vshrl.u32 %v8896_v9, 16  ;;  %v1313_v18 = vld [vmem:[#allocation2 + $0x6c] sm:$0xf] }
 0x1ac   : > { %7368 = vmatmul.mubr.bf16.gmra.mxu1 %v6725_v17  ;;  %v1125_v50 = vshrl.u32 %v7033_v47, 16  ;;  %v1128_v2 = vshll.u32 %v7033_v47, 16  ;;  %v1476_v34 = vrot.slane %v1475_v29, 4  ;;  %v6753_v40 = vcombine.low %v1309_v54, %v8896_v9 }
 0x1ad   : > { %v1108_v33 = vshrl.u32 %v7031_v26, 16  ;;  %v1111_v44 = vshll.u32 %v7031_v26, 16  ;;  %v1489_v38 = vor.u32 %v8850_v8, %v8830_v24  ;;  %v1492_v37 = vshll.u32 %v8828_v39, 16  ;;  %7454 = vmatpush3.bf16.msra.mxu1 %v7974_v21 }
 0x1ae   : > { %v1127_v46 = vrot.slane %v1125_v50, 7  ;;  %v1481_v22 = vsel %vm8546_vm7, %v1476_v34, %v1480_v16  ;;  %7424 = vmatmul.mubr.bf16.gmra.mxu0 %v6753_v40  ;;  %v1498_v61 = vrot.slane %v1496_v52, 4  ;;  %v1502_v45 = vshll.u32 %v8902_v14, 16  ;;  %7455 = vmatprep.subr.bf16.mxu1 %v7979_v25  ;;  %v8932_v16 = vld [vmem:[#allocation2 + $0x50] sm:$0x1] }
 0x1af   : > { %v6726_v31 = vcombine.low %v1471_v62, %v1481_v22  ;;  %v1110_v54 = vrot.slane %v1108_v33, 7  ;;  %v1490_v24 = vrot.slane %v1489_v38, 4  ;;  %v1494_v8 = vrot.slane %v1492_v37, 5  ;;  %v1315_v50 = vld [vmem:[#allocation2 + $0x78] sm:$0xf] }
 0x1b0   : > { %v1130_v12 = vor.u32 %v1128_v2, %v1127_v46  ;;  %v1132_v7 = vrot.slane %v1127_v46, 4  ;;  %v1504_v21 = vrot.slane %v1502_v45, 5  ;;  %v1555_v0 = vshrl.u32 %v1311_v41, 16  ;;  %v8957_v38 = vld [vmem:[#allocation2 + $0x7c] sm:$0xf] }
 0x1b1   : > { %7371 = vmatprep.mubr.bf16.mxu1 %v6726_v31  ;;  %v1113_v3 = vor.u32 %v1111_v44, %v1110_v54  ;;  %v1115_v4 = vrot.slane %v1110_v54, 4  ;;  %v1495_v52 = vsel %vm8546_vm7, %v1490_v24, %v1494_v8  ;;  %v1499_v1 = vor.u32 %v1498_v61, %v1494_v8  ;;  %7456 = vmatpush3.bf16.msra.mxu1 %v7979_v25  ;;  %v8967_v54 = vld [vmem:[#allocation2 + $0x68] sm:$0x1] }
 0x1b2   : > { %v1131_v6 = vsel %vm8613_vm11, %v1123_v35, %v1130_v12  ;;  %v1293_v5 = vsel %vm8491_vm2, %v1132_v7, %v1292_v11  ;;  %v8930_v20 = vrot.slane %v1555_v0, 4  ;;  %v1558_v15 = vshll.u32 %v1311_v41, 16  ;;  %7457 = vmatprep.subr.bf16.mxu1 %v7983_v48 }
 0x1b3   : > { %1291 = vst [vmem:[#allocation2 + $0xc4] sm:$0xf] %v1131_v6  ;;  %1294 = vst [vmem:[#allocation2 + $0xc8] sm:$0x1] %v1293_v5  ;;  %v1114_v60 = vsel %vm8613_vm11, %v1106_v55, %v1113_v3  ;;  %v1286_v35 = vsel %vm8491_vm2, %v1115_v4, %v1285_v56  ;;  %v1500_v32 = vrot.slane %v1499_v1, 4  ;;  %v1568_v17 = vshrl.u32 %v8918_v63, 16 }
 0x1b4   : > { %1284 = vst [vmem:[#allocation2 + $0xb8] sm:$0xf] %v1114_v60  ;;  %1287 = vst [vmem:[#allocation2 + $0xbc] sm:$0x1] %v1286_v35  ;;  %v1560_v47 = vrot.slane %v1558_v15, 5  ;;  %v6754_v62 = vcombine.low %v1311_v41, %v8918_v63  ;;  %v1513_v29 = vor.u32 %v8885_v10, %v8883_v51  ;;  %v1516_v25 = vshll.u32 %v8861_v49, 16 }
 0x1b5   : > { %v1505_v30 = vsel %vm8546_vm7, %v1500_v32, %v1504_v21  ;;  %v1522_v58 = vrot.slane %v1520_v42, 4  ;;  %v1526_v55 = vshll.u32 %v8932_v16, 16  ;;  %v1579_v26 = vshrl.u32 %v1313_v18, 16  ;;  %7458 = vmatpush3.bf16.msra.mxu1 %v7983_v48  ;;  %v8952_v10 = vld [vmem:[#allocation2 + $0x5c] sm:$0x1] }
 0x1b6   : > { %v6727_v2 = vcombine.low %v1495_v52, %v1505_v30  ;;  %7427 = vmatprep.mubr.bf16.mxu0 %v6754_v62  ;;  %v1514_v34 = vrot.slane %v1513_v29, 4  ;;  %v1518_v40 = vrot.slane %v1516_v25, 5  ;;  %v1582_v51 = vshll.u32 %v1313_v18, 16  ;;  %7539 = vmatprep.subr.bf16.mxu1 %v8922_v53  ;;  %v8977_v1 = vld [vmem:[#allocation2 + $0x88] sm:$0xf] }
 0x1b7   : > { %v1528_v11 = vrot.slane %v1526_v55, 5  ;;  %v1581_v33 = vrot.slane %v1579_v26, 4  ;;  %v1592_v44 = vshrl.u32 %v8945_v27, 16  ;;  %v6755_v42 = vcombine.low %v1313_v18, %v8945_v27  ;;  %v8984_v30 = vld [vmem:[#allocation2 + $0x74] sm:$0x1] }
 0x1b8   : > { %7372 = vmatmul.mubr.bf16.gmra.mxu1 %v6727_v2  ;;  %v1519_v37 = vsel %vm8546_vm7, %v1514_v34, %v1518_v40  ;;  %v1523_v41 = vor.u32 %v1522_v58, %v1518_v40  ;;  %v1584_v46 = vrot.slane %v1582_v51, 5  ;;  %v1537_v22 = vor.u32 %v8906_v36, %v8904_v28  ;;  %v1317_v36 = vld [vmem:[#allocation2 + $0x84] sm:$0xf] }
 0x1b9   : > { %7428 = vmatmul.mubr.bf16.gmra.mxu0 %v6755_v42  ;;  %v1540_v61 = vshll.u32 %v8896_v9, 16  ;;  %v1546_v45 = vrot.slane %v1544_v19, 4  ;;  %v1550_v48 = vshll.u32 %v8952_v10, 16  ;;  %v1603_v31 = vshrl.u32 %v1315_v50, 16 }
 0x1ba   : > { %v1524_v56 = vrot.slane %v1523_v41, 4  ;;  %v1538_v24 = vrot.slane %v1537_v22, 4  ;;  %v1606_v8 = vshll.u32 %v1315_v50, 16  ;;  %v1616_v12 = vshrl.u32 %v8957_v38, 16 }
 0x1bb   : > { %v1542_v7 = vrot.slane %v1540_v61, 5  ;;  %v1552_v21 = vrot.slane %v1550_v48, 5  ;;  %v8970_v0 = vrot.slane %v1603_v31, 4  ;;  %v6756_v28 = vcombine.low %v1315_v50, %v8957_v38  ;;  %v1319_v50 = vld [vmem:[#allocation2 + $0x90] sm:$0xf] }
 0x1bc   : > { %v1529_v19 = vsel %vm8546_vm7, %v1524_v56, %v1528_v11  ;;  %v1608_v3 = vrot.slane %v1606_v8, 5  ;;  %v1561_v4 = vor.u32 %v1560_v47, %v8930_v20  ;;  %v1564_v52 = vshll.u32 %v8918_v63, 16  ;;  %v8991_v11 = vld [vmem:[#allocation2 + $0x94] sm:$0xf]  ;;  %v8994_v56 = vld [vmem:[#allocation2 + $0x80] sm:$0x1] }
 0x1bd   : > { %v6728_v6 = vcombine.low %v1519_v37, %v1529_v19  ;;  %v1543_v5 = vsel %vm8546_vm7, %v1538_v24, %v1542_v7  ;;  %v1547_v15 = vor.u32 %v1546_v45, %v1542_v7  ;;  %7431 = vmatprep.mubr.bf16.mxu0 %v6756_v28  ;;  %v1570_v18 = vrot.slane %v1568_v17, 4  ;;  %v1321_v7 = vld [vmem:[#allocation2 + $0x9c] sm:$0xf] }
 0x1be   : > { %v1562_v60 = vrot.slane %v1561_v4, 4  ;;  %v1566_v35 = vrot.slane %v1564_v52, 5  ;;  %v1574_v32 = vshll.u32 %v8967_v54, 16  ;;  %v1627_v62 = vshrl.u32 %v1317_v36, 16 }
 0x1bf   : > { %7375 = vmatprep.mubr.bf16.mxu1 %v6728_v6  ;;  %v1548_v29 = vrot.slane %v1547_v15, 4  ;;  %v1630_v25 = vshll.u32 %v1317_v36, 16  ;;  %v1640_v20 = vshrl.u32 %v8977_v1, 16  ;;  %v6757_v47 = vcombine.low %v1317_v36, %v8977_v1 }
 0x1c0   : > { %v1567_v58 = vsel %vm8546_vm7, %v1562_v60, %v1566_v35  ;;  %v1571_v55 = vor.u32 %v1570_v18, %v1566_v35  ;;  %v1576_v26 = vrot.slane %v1574_v32, 5  ;;  %v1629_v17 = vrot.slane %v1627_v62, 4  ;;  %v9007_v32 = vld [vmem:[#allocation2 + $0x8c] sm:$0x1] }
 0x1c1   : > { %v1553_v2 = vsel %vm8546_vm7, %v1548_v29, %v1552_v21  ;;  %v1632_v34 = vrot.slane %v1630_v25, 5  ;;  %7432 = vmatmul.mubr.bf16.gmra.mxu0 %v6757_v47  ;;  %v1585_v40 = vor.u32 %v1584_v46, %v1581_v33  ;;  %v1588_v51 = vshll.u32 %v8945_v27, 16  ;;  %v9000_v21 = vld [vmem:[#allocation2 + $0xa0] sm:$0xf] }
 0x1c2   : > { %v6729_v42 = vcombine.low %v1543_v5, %v1553_v2  ;;  %v1572_v37 = vrot.slane %v1571_v55, 4  ;;  %v1594_v41 = vrot.slane %v1592_v44, 4  ;;  %v1598_v22 = vshll.u32 %v8984_v30, 16 }
 0x1c3   : > { %v1586_v61 = vrot.slane %v1585_v40, 4  ;;  %v1590_v45 = vrot.slane %v1588_v51, 5  ;;  %v1651_v48 = vshrl.u32 %v1319_v50, 16  ;;  %v1654_v31 = vshll.u32 %v1319_v50, 16 }
 0x1c4   : > { %7376 = vmatmul.mubr.bf16.gmra.mxu1 %v6729_v42  ;;  %v1577_v24 = vsel %vm8546_vm7, %v1572_v37, %v1576_v26  ;;  %v1600_v33 = vrot.slane %v1598_v22, 5  ;;  %v1664_v46 = vshrl.u32 %v8991_v11, 16  ;;  %v6758_v8 = vcombine.low %v1319_v50, %v8991_v11  ;;  %v9013_v26 = vld [vmem:[#allocation2 + $0xac] sm:$0xf] }
 0x1c5   : > { %v6730_v44 = vcombine.low %v1567_v58, %v1577_v24  ;;  %v1591_v28 = vsel %vm8546_vm7, %v1586_v61, %v1590_v45  ;;  %v1595_v36 = vor.u32 %v1594_v41, %v1590_v45  ;;  %v1653_v19 = vrot.slane %v1651_v48, 4  ;;  %v1323_v58 = vld [vmem:[#allocation2 + $0xa8] sm:$0xf]  ;;  %v9019_v61 = vld [vmem:[#allocation2 + $0x98] sm:$0x1] }
 0x1c6   : > { %v1656_v4 = vrot.slane %v1654_v31, 5  ;;  %7435 = vmatprep.mubr.bf16.mxu0 %v6758_v8  ;;  %v1609_v52 = vor.u32 %v1608_v3, %v8970_v0  ;;  %v1612_v6 = vshll.u32 %v8957_v38, 16  ;;  %v1618_v5 = vrot.slane %v1616_v12, 4  ;;  %v1325_v45 = vld [vmem:[#allocation2 + $0xb4] sm:$0xf] }
 0x1c7   : > { %7379 = vmatprep.mubr.bf16.mxu1 %v6730_v44  ;;  %v1596_v15 = vrot.slane %v1595_v36, 4  ;;  %v1622_v18 = vshll.u32 %v8994_v56, 16  ;;  %v1675_v60 = vshrl.u32 %v1321_v7, 16  ;;  %v1678_v35 = vshll.u32 %v1321_v7, 16  ;;  %v9022_v8 = vld [vmem:[#allocation2 + $0xb8] sm:$0xf] }
 0x1c8   : > { %v1610_v62 = vrot.slane %v1609_v52, 4  ;;  %v1614_v29 = vrot.slane %v1612_v6, 5  ;;  %v1688_v25 = vshrl.u32 %v9000_v21, 16  ;;  %v6759_v47 = vcombine.low %v1321_v7, %v9000_v21 }
 0x1c9   : > { %v1601_v0 = vsel %vm8546_vm7, %v1596_v15, %v1600_v33  ;;  %v1624_v3 = vrot.slane %v1622_v18, 5  ;;  %v1677_v12 = vrot.slane %v1675_v60, 4  ;;  %v1680_v55 = vrot.slane %v1678_v35, 5 }
 0x1ca   : > { %v6731_v50 = vcombine.low %v1591_v28, %v1601_v0  ;;  %v1615_v2 = vsel %vm8546_vm7, %v1610_v62, %v1614_v29  ;;  %v1619_v40 = vor.u32 %v1618_v5, %v1614_v29  ;;  %7436 = vmatmul.mubr.bf16.gmra.mxu0 %v6759_v47  ;;  %v1633_v51 = vor.u32 %v1632_v34, %v1629_v17 }
 0x1cb   : > { %v1636_v42 = vshll.u32 %v8977_v1, 16  ;;  %v1642_v37 = vrot.slane %v1640_v20, 4  ;;  %v1646_v41 = vshll.u32 %v9007_v32, 16  ;;  %v1699_v22 = vshrl.u32 %v1323_v58, 16 }
 0x1cc   : > { %7380 = vmatmul.mubr.bf16.gmra.mxu1 %v6731_v50  ;;  %v1620_v48 = vrot.slane %v1619_v40, 4  ;;  %v1634_v31 = vrot.slane %v1633_v51, 4  ;;  %v1702_v24 = vshll.u32 %v1323_v58, 16  ;;  %v1712_v33 = vshrl.u32 %v9013_v26, 16 }
 0x1cd   : > { %v1638_v7 = vrot.slane %v1636_v42, 5  ;;  %v1648_v44 = vrot.slane %v1646_v41, 5  ;;  %v1701_v17 = vrot.slane %v1699_v22, 4  ;;  %v6760_v34 = vcombine.low %v1323_v58, %v9013_v26  ;;  %v9040_v22 = vld [vmem:[#allocation2 + $0xb0] sm:$0x1] }
 0x1ce   : > { %v1625_v20 = vsel %vm8546_vm7, %v1620_v48, %v1624_v3  ;;  %v1704_v28 = vrot.slane %v1702_v24, 5  ;;  %v1657_v36 = vor.u32 %v1656_v4, %v1653_v19  ;;  %v1660_v52 = vshll.u32 %v8991_v11, 16  ;;  %v9033_v4 = vld [vmem:[#allocation2 + $0xa4] sm:$0x1]  ;;  %v7981_v3 = vld [vmem:[#allocation2 + $0xc] sm:$0xff]  }
 0x1cf   : > { %v6732_v6 = vcombine.low %v1615_v2, %v1625_v20  ;;  %v1639_v5 = vsel %vm8546_vm7, %v1634_v31, %v1638_v7  ;;  %v1643_v15 = vor.u32 %v1642_v37, %v1638_v7  ;;  %7439 = vmatprep.mubr.bf16.mxu0 %v6760_v34  ;;  %v1666_v18 = vrot.slane %v1664_v46, 4 }
 0x1d0   : > { %v1658_v60 = vrot.slane %v1657_v36, 4  ;;  %v1662_v35 = vrot.slane %v1660_v52, 5  ;;  %v1670_v62 = vshll.u32 %v9019_v61, 16  ;;  %v1723_v29 = vshrl.u32 %v1325_v45, 16  ;;  %v2341_v52 = vld [vmem:[#allocation2] sm:$0xe] }
 0x1d1   : > { %7383 = vmatprep.mubr.bf16.mxu1 %v6732_v6  ;;  %v1644_v47 = vrot.slane %v1643_v15, 4  ;;  %v1726_v58 = vshll.u32 %v1325_v45, 16  ;;  %v1736_v0 = vshrl.u32 %v9022_v8, 16  ;;  %v6761_v19 = vcombine.low %v1325_v45, %v9022_v8 }
 0x1d2   : > { %v1663_v46 = vsel %vm8546_vm7, %v1658_v60, %v1662_v35  ;;  %v1667_v50 = vor.u32 %v1666_v18, %v1662_v35  ;;  %v1672_v2 = vrot.slane %v1670_v62, 5  ;;  %v1725_v40 = vrot.slane %v1723_v29, 4  ;;  %v7984_v35 = vld [vmem:[#allocation2 + $0x18] sm:$0xff]  }
 0x1d3   : > { %v1649_v51 = vsel %vm8546_vm7, %v1644_v47, %v1648_v44  ;;  %v1728_v42 = vrot.slane %v1726_v58, 5  ;;  %7440 = vmatmul.mubr.bf16.gmra.mxu0 %v6761_v19  ;;  %v1681_v37 = vor.u32 %v1680_v55, %v1677_v12  ;;  %v1684_v41 = vshll.u32 %v9000_v21, 16  ;;  %v7999_v47 = vld [vmem:[#allocation8 + $0x170] sm:$0xff]  }
 0x1d4   : > { %v6733_v45 = vcombine.low %v1639_v5, %v1649_v51  ;;  %v1668_v48 = vrot.slane %v1667_v50, 4  ;;  %v1690_v31 = vrot.slane %v1688_v25, 4  ;;  %v1694_v24 = vshll.u32 %v9033_v4, 16  ;;  %7507 = vmatprep.mubr.bf16.mxu0 %v7981_v3  ;;  %v9047_v5 = vld [vmem:[#allocation2 + $0xbc] sm:$0x1] }
 0x1d5   : > { %v1682_v7 = vrot.slane %v1681_v37, 4  ;;  %v1686_v34 = vrot.slane %v1684_v41, 5  ;;  %v1705_v20 = vor.u32 %v1704_v28, %v1701_v17  ;;  %v1708_v36 = vshll.u32 %v9013_v26, 16  ;;  %v2343_v50 = vld [vmem:[#allocation2 + $0x18] sm:$0xe]  ;;  %v7985_v41 = vld [vmem:[#allocation2 + $0x24] sm:$0xff]  }
 0x1d6   : > { %7384 = vmatmul.mubr.bf16.gmra.mxu1 %v6733_v45  ;;  %v1673_v12 = vsel %vm8546_vm7, %v1668_v48, %v1672_v2  ;;  %v1696_v55 = vrot.slane %v1694_v24, 5  ;;  %v1714_v44 = vrot.slane %v1712_v33, 4  ;;  %v1718_v6 = vshll.u32 %v9040_v22, 16  ;;  %v2342_v45 = vld [vmem:[#allocation2 + $0xc] sm:$0xe] }
 0x1d7   : > { %v6734_v25 = vcombine.low %v1663_v46, %v1673_v12  ;;  %v1687_v15 = vsel %vm8546_vm7, %v1682_v7, %v1686_v34  ;;  %v1691_v18 = vor.u32 %v1690_v31, %v1686_v34  ;;  %v1706_v60 = vrot.slane %v1705_v20, 4  ;;  %v8064_v48 = vld [vmem:[#allocation2 + $0x4] sm:$0xf] }
 0x1d8   : > { %v1710_v17 = vrot.slane %v1708_v36, 5  ;;  %v1720_v28 = vrot.slane %v1718_v6, 5  ;;  %v1729_v62 = vor.u32 %v1728_v42, %v1725_v40  ;;  %v1732_v29 = vshll.u32 %v9022_v8, 16  ;;  %v8066_v6 = vld [vmem:[#allocation2 + $0x10] sm:$0xf] }
 0x1d9   : > { %7387 = vmatprep.mubr.bf16.mxu1 %v6734_v25  ;;  %v1692_v58 = vrot.slane %v1691_v18, 4  ;;  %v1738_v33 = vrot.slane %v1736_v0, 4  ;;  %v1742_v19 = vshll.u32 %v9047_v5, 16  ;;  %v6770_v3 = vrot.slane %v2341_v52, 9  ;;  %v8065_v0 = vld [vmem:[#allocation2 + $0x8] sm:$0x1] }
 0x1da   : > { %v1711_v46 = vsel %vm8546_vm7, %v1706_v60, %v1710_v17  ;;  %v1715_v2 = vor.u32 %v1714_v44, %v1710_v17  ;;  %v1730_v51 = vrot.slane %v1729_v62, 4  ;;  %v1734_v37 = vrot.slane %v1732_v29, 5  ;;  %v8067_v17 = vld [vmem:[#allocation2 + $0x14] sm:$0x1]  ;;  %v2344_v29 = vld [vmem:[#allocation2 + $0x24] sm:$0xe] }
 0x1db   : > { %v1697_v40 = vsel %vm8546_vm7, %v1692_v58, %v1696_v55  ;;  %7508 = vmatmul.mubr.bf16.vlgmr.msra.gmra.mxu0 %v7984_v35  ;;  %v1744_v42 = vrot.slane %v1742_v19, 5  ;;  %v2394_v31 = vrot.slane %v8064_v48, 5  ;;  %v2397_v24 = vrot.slane %v8065_v0, 5  ;;  %v7986_v19 = vld [vmem:[#allocation2 + $0x30] sm:$0xff]  }
 0x1dc   : > { %v6735_v7 = vcombine.low %v1687_v15, %v1697_v40  ;;  %v1716_v34 = vrot.slane %v1715_v2, 4  ;;  %v1735_v20 = vsel %vm8546_vm7, %v1730_v51, %v1734_v37  ;;  %v1739_v36 = vor.u32 %v1738_v33, %v1734_v37  ;;  %7511 = vmatprep.mubr.bf16.mxu0 %v7985_v41  ;;  %7588 = vmatpush3.bf16.msra.mxu0 %v8838_v59  ;;  %v8002_v15 = vld [vmem:[#allocation8 + $0x168] sm:$0xff]   ;;  %v2345_v59 = vld [vmem:[#allocation2 + $0x30] sm:$0xe]  ;;  %v2346_v51 = vld [vmem:[#allocation2 + $0x3c] sm:$0xe] }
 0x1dd   : > { %v9068_v12 = vsel %vm9061_vm14, %v6770_v3, %v2394_v31  ;;  %v2396_v55 = vrot.slane %v2394_v31, 4  ;;  %v6771_v44 = vrot.slane %v2342_v45, 9  ;;  %v2401_v25 = vrot.slane %v8066_v6, 5  ;;  %7589 = vmatprep.subr.bf16.mxu0 %v7999_v47  ;;  %v7988_v41 = vld [vmem:[#allocation2 + $0x3c] sm:$0xff]  }
 0x1de   : > { %7388 = vmatmul.mubr.bf16.gmra.mxu1 %v6735_v7  ;;  %v1721_v18 = vsel %vm8546_vm7, %v1716_v34, %v1720_v28  ;;  %v1740_v60 = vrot.slane %v1739_v36, 4  ;;  %v2404_v35 = vrot.slane %v8067_v17, 5  ;;  %v6772_v62 = vrot.slane %v2343_v50, 9  ;;  %v8068_v50 = vld [vmem:[#allocation2 + $0x1c] sm:$0xf] }
 0x1df   : > { %v6736_v58 = vcombine.low %v1711_v46, %v1721_v18  ;;  %v2398_v33 = vsel %vm9061_vm14, %v2396_v55, %v2397_v24  ;;  %v9076_v3 = vsel %vm9061_vm14, %v6771_v44, %v2401_v25  ;;  %v2403_v2 = vrot.slane %v2401_v25, 4  ;;  %v8004_v40 = vld [vmem:[#allocation8 + $0x160] sm:$0xff]   ;;  %v8069_v24 = vld [vmem:[#allocation2 + $0x28] sm:$0xf]  ;;  %v8070_v44 = vld [vmem:[#allocation2 + $0x34] sm:$0xf] }
 0x1e0   : > { %v1745_v28 = vsel %vm8546_vm7, %v1740_v60, %v1744_v42  ;;  %v6786_v37 = vcombine.low %v9068_v12, %v2398_v33  ;;  %v2408_v45 = vrot.slane %v8068_v50, 5  ;;  %v2411_v46 = vrot.slane %v8802_v57, 5  ;;  %7590 = vmatpush3.bf16.msra.mxu0 %v7999_v47  ;;  %v2347_v36 = vld [vmem:[#allocation2 + $0x48] sm:$0xe]  ;;  %v2348_v17 = vld [vmem:[#allocation2 + $0x54] sm:$0xe] }
 0x1e1   : > { %7391 = vmatprep.mubr.bf16.mxu1 %v6736_v58  ;;  %v6737_v48 = vcombine.low %v1735_v20, %v1745_v28  ;;  %v9084_v31 = vsel %vm9061_vm14, %v2403_v2, %v2404_v35  ;;  %v6773_v0 = vrot.slane %v2344_v29, 9  ;;  %v2415_v7 = vrot.slane %v8069_v24, 5  ;;  %7591 = vmatprep.subr.bf16.mxu0 %v8002_v15  ;;  %v8007_v58 = vld [vmem:[#allocation8 + $0x158] sm:$0xff]   ;;  %v2349_v50 = vld [vmem:[#allocation2 + $0x60] sm:$0xe] }
 0x1e2   : > { %v6787_v42 = vcombine.low %v9076_v3, %v9084_v31  ;;  %v9090_v34 = vsel %vm9061_vm14, %v6772_v62, %v2408_v45  ;;  %v2410_v57 = vrot.slane %v2408_v45, 4  ;;  %v2418_v47 = vrot.slane %v8842_v23, 5 }
 0x1e3   : > { %7512 = vmatmul.mubr.bf16.gmra.mxu0 %v7986_v19  ;;  %v9095_v20 = vsel %vm9061_vm14, %v6773_v0, %v2415_v7  ;;  %v2417_v12 = vrot.slane %v2415_v7, 4  ;;  %v6774_v55 = vrot.slane %v2345_v59, 9  ;;  %v2422_v6 = vrot.slane %v8070_v44, 5  ;;  %v2350_v19 = vld [vmem:[#allocation2 + $0x6c] sm:$0xe] }
 0x1e4   : > { %7515 = vmatprep.mubr.bf16.mxu0 %v7988_v41  ;;  %v9099_v25 = vsel %vm9061_vm14, %v2410_v57, %v2411_v46  ;;  %v2425_v18 = vrot.slane %v8877_v43, 5  ;;  %v6775_v60 = vrot.slane %v2346_v51, 9  ;;  %v2429_v23 = vrot.slane %v8828_v39, 5  ;;  %7592 = vmatpush3.bf16.msra.mxu0 %v8002_v15  ;;  %v8009_v7 = vld [vmem:[#allocation8 + $0x150] sm:$0xff]   ;;  %v2351_v44 = vld [vmem:[#allocation2 + $0x78] sm:$0xe] }
 0x1e5   : > { %v6788_v35 = vcombine.low %v9090_v34, %v9099_v25  ;;  %v9107_v62 = vsel %vm9061_vm14, %v2417_v12, %v2418_v47  ;;  %v9111_v29 = vsel %vm9061_vm14, %v6774_v55, %v2422_v6  ;;  %v2424_v59 = vrot.slane %v2422_v6, 4  ;;  %7593 = vmatprep.subr.bf16.mxu0 %v8004_v40  ;;  %v7991_v34 = vld [vmem:[#allocation2 + $0x54] sm:$0xff]   ;;  %v7990_v6 = vld [vmem:[#allocation8 + $0x130] sm:$0xff]  }
 0x1e6   : > { %7392 = vmatmul.mubr.bf16.gmra.mxu1 %v6737_v48  ;;  %v6789_v39 = vcombine.low %v9095_v20, %v9107_v62  ;;  %v9117_v43 = vsel %vm9061_vm14, %v6775_v60, %v2429_v23  ;;  %v2431_v15 = vrot.slane %v2429_v23, 4  ;;  %v2432_v33 = vrot.slane %v8902_v14, 5  ;;  %v7989_v48 = vld [vmem:[#allocation2 + $0x48] sm:$0xff]   ;;  %v2352_v23 = vld [vmem:[#allocation2 + $0x84] sm:$0xe] }
 0x1e7   : > { %7459 = vmatprep.mubr.bf16.mxu1 %v6786_v37  ;;  %v9122_v2 = vsel %vm9061_vm14, %v2424_v59, %v2425_v18  ;;  %v6776_v51 = vrot.slane %v2347_v36, 9  ;;  %v2436_v28 = vrot.slane %v8861_v49, 5  ;;  %v2439_v41 = vrot.slane %v8932_v16, 5 }
 0x1e8   : > { %v6790_v45 = vcombine.low %v9111_v29, %v9122_v2  ;;  %v9130_v46 = vsel %vm9061_vm14, %v2431_v15, %v2432_v33  ;;  %v6777_v14 = vrot.slane %v2348_v17, 9  ;;  %v2443_v37 = vrot.slane %v8896_v9, 5  ;;  %7594 = vmatpush3.bf16.msra.mxu0 %v8004_v40  ;;  %v2353_v15 = vld [vmem:[#allocation2 + $0x90] sm:$0xe]  ;;  %v8012_v33 = vld [vmem:[#allocation8 + $0x148] sm:$0xff]  }
 0x1e9   : > { %v6791_v0 = vcombine.low %v9117_v43, %v9130_v46  ;;  %v9137_v49 = vsel %vm9061_vm14, %v6776_v51, %v2436_v28  ;;  %v2438_v16 = vrot.slane %v2436_v28, 4  ;;  %v2446_v24 = vrot.slane %v8952_v10, 5  ;;  %7595 = vmatprep.subr.bf16.mxu0 %v8007_v58 }
 0x1ea   : > { %v9142_v57 = vsel %vm9061_vm14, %v6777_v14, %v2443_v37  ;;  %v2445_v9 = vrot.slane %v2443_v37, 4  ;;  %v6778_v40 = vrot.slane %v2349_v50, 9  ;;  %v2450_v47 = vrot.slane %v8918_v63, 5  ;;  %v7993_v50 = vld [vmem:[#allocation8 + $0x128] sm:$0xff]   ;;  %v9192_v14 = vld [vmem:[#allocation2 + $0x10] sm:$0xf] }
 0x1eb   : > { %7516 = vmatmul.mubr.bf16.gmra.mxu0 %v7989_v48  ;;  %v9147_v36 = vsel %vm9061_vm14, %v2438_v16, %v2439_v41  ;;  %v2453_v12 = vrot.slane %v8967_v54, 5  ;;  %v6779_v55 = vrot.slane %v2350_v19, 9  ;;  %v2457_v10 = vrot.slane %v8945_v27, 5  ;;  %v3966_v37 = vld [vmem:[#allocation2 + $0xc] sm:$0xe]  ;;  %v7992_v48 = vld [vmem:[#allocation2 + $0x60] sm:$0xff]  }
 0x1ec   : > { %7519 = vmatprep.mubr.bf16.mxu0 %v7991_v34  ;;  %v6792_v25 = vcombine.low %v9137_v49, %v9147_v36  ;;  %v9155_v18 = vsel %vm9061_vm14, %v2445_v9, %v2446_v24  ;;  %v9159_v63 = vsel %vm9061_vm14, %v6778_v40, %v2450_v47  ;;  %v2452_v60 = vrot.slane %v2450_v47, 4  ;;  %7596 = vmatpush3.bf16.msra.mxu0 %v8007_v58  ;;  %v9199_v9 = vld [vmem:[#allocation2 + $0x14] sm:$0x1]  ;;  %v7994_v40 = vld [vmem:[#allocation2 + $0x6c] sm:$0xff]  }
 0x1ed   : > { %v6793_v27 = vcombine.low %v9142_v57, %v9155_v18  ;;  %v9165_v54 = vsel %vm9061_vm14, %v6779_v55, %v2457_v10  ;;  %v2459_v17 = vrot.slane %v2457_v10, 4  ;;  %v2460_v59 = vrot.slane %v8984_v30, 5  ;;  %7597 = vmatprep.subr.bf16.mxu0 %v8009_v7  ;;  %v8013_v55 = vld [vmem:[#allocation8 + $0x140] sm:$0xff]   ;;  %v8000_v49 = vld [vmem:[#allocation2 + $0x90] sm:$0xff]  }
 0x1ee   : > { %7460 = vmatmul.mubr.bf16.vlgmr.msra.gmra.mxu1 %v6787_v42  ;;  %v9173_v58 = vsel %vm9061_vm14, %v2452_v60, %v2453_v12  ;;  %v6780_v19 = vrot.slane %v2351_v44, 9  ;;  %v2464_v51 = vrot.slane %v8957_v38, 5  ;;  %v2467_v28 = vrot.slane %v8994_v56, 5  ;;  %v2354_v42 = vld [vmem:[#allocation2 + $0x9c] sm:$0xe]  ;;  %v9359_v18 = vld [vmem:[#allocation8 + $0x1b8] sm:$0xff]  }
 0x1ef   : > { %7540 = vmatpush3.bf16.msra.mxu1 %v8922_v53  ;;  %7463 = vmatprep.mubr.bf16.mxu1 %v6788_v35  ;;  %v6794_v30 = vcombine.low %v9159_v63, %v9173_v58  ;;  %v9182_v41 = vsel %vm9061_vm14, %v2459_v17, %v2460_v59  ;;  %v6781_v3 = vrot.slane %v2352_v23, 9  ;;  %v2471_v31 = vrot.slane %v8977_v1, 5  ;;  %v2355_v23 = vld [vmem:[#allocation2 + $0xa8] sm:$0xe] }
 0x1f0   : > { %7541 = vmatprep.subr.bf16.mxu1 %v7990_v6  ;;  %v6795_v38 = vcombine.low %v9165_v54, %v9182_v41  ;;  %v9189_v53 = vsel %vm9061_vm14, %v6780_v19, %v2464_v51  ;;  %v2466_v56 = vrot.slane %v2464_v51, 4  ;;  %v2474_v35 = vrot.slane %v9007_v32, 5  ;;  %7598 = vmatpush3.bf16.msra.mxu0 %v8009_v7  ;;  %v9226_v19 = vld [vmem:[#allocation2 + $0x20] sm:$0x1]  ;;  %v8005_v63 = vld [vmem:[#allocation2 + $0xa8] sm:$0xff]  }
 0x1f1   : > { %v9196_v1 = vsel %vm9061_vm14, %v6781_v3, %v2471_v31  ;;  %v2473_v16 = vrot.slane %v2471_v31, 4  ;;  %v6782_v24 = vrot.slane %v2353_v15, 9  ;;  %v2478_v34 = vrot.slane %v8991_v11, 5  ;;  %7599 = vmatprep.subr.bf16.mxu0 %v8012_v33  ;;  %v3972_v41 = vld [vmem:[#allocation2 + $0x54] sm:$0xe] }
 0x1f2   : > { %v9203_v32 = vsel %vm9061_vm14, %v2466_v56, %v2467_v28  ;;  %v2481_v7 = vrot.slane %v9019_v61, 5  ;;  %v6783_v47 = vrot.slane %v2354_v42, 9  ;;  %v2485_v12 = vrot.slane %v9000_v21, 5  ;;  %v9217_v61 = vld [vmem:[#allocation2 + $0x1c] sm:$0xf] }
 0x1f3   : > { %7542 = vmatpush3.bf16.msra.mxu1 %v7990_v6  ;;  %7520 = vmatmul.mubr.bf16.gmra.mxu0 %v7992_v48  ;;  %v6796_v10 = vcombine.low %v9189_v53, %v9203_v32  ;;  %v9211_v11 = vsel %vm9061_vm14, %v2473_v16, %v2474_v35  ;;  %v9215_v44 = vsel %vm9061_vm14, %v6782_v24, %v2478_v34  ;;  %v2480_v60 = vrot.slane %v2478_v34, 4  ;;  %v7996_v21 = vld [vmem:[#allocation8 + $0x120] sm:$0xff]   ;;  %v9244_v48 = vld [vmem:[#allocation8 + $0x1f8] sm:$0xff]   ;;  %v8010_v53 = vld [vmem:[#allocation2 + $0xc0] sm:$0xff]  }
 0x1f4   : > { %7543 = vmatprep.subr.bf16.mxu1 %v7993_v50  ;;  %7523 = vmatprep.mubr.bf16.mxu0 %v7994_v40  ;;  %v6797_v6 = vcombine.low %v9196_v1, %v9211_v11  ;;  %v9223_v17 = vsel %vm9061_vm14, %v6783_v47, %v2485_v12  ;;  %v2487_v59 = vrot.slane %v2485_v12, 4  ;;  %v2488_v15 = vrot.slane %v9033_v4, 5  ;;  %v3967_v42 = vld [vmem:[#allocation2 + $0x18] sm:$0xe]  ;;  %v8001_v24 = vld [vmem:[#allocation8 + $0x118] sm:$0xff]  }
 0x1f5   : > { %v9230_v51 = vsel %vm9061_vm14, %v2480_v60, %v2481_v7  ;;  %7600 = vmatpush3.bf16.msra.mxu0 %v8012_v33  ;;  %v6858_v28 = vrot.slane %v3966_v37, 9  ;;  %v4032_v3 = vrot.slane %v9192_v14, 5  ;;  %v4035_v31 = vrot.slane %v9199_v9, 5  ;;  %v2356_v37 = vld [vmem:[#allocation2 + $0xb4] sm:$0xe]  ;;  %v7995_v40 = vld [vmem:[#allocation2 + $0x78] sm:$0xff]  }
 0x1f6   : > { %7464 = vmatmul.mubr.bf16.gmra.mxu1 %v6789_v39  ;;  %v6798_v4 = vcombine.low %v9215_v44, %v9230_v51  ;;  %v9241_v56 = vsel %vm9061_vm14, %v2487_v59, %v2488_v15  ;;  %v6784_v35 = vrot.slane %v2355_v23, 9  ;;  %v2492_v33 = vrot.slane %v9013_v26, 5  ;;  %7601 = vmatprep.subr.bf16.mxu0 %v8013_v55  ;;  %v9256_v26 = vld [vmem:[#allocation2 + $0x28] sm:$0xf]  ;;  %v3968_v60 = vld [vmem:[#allocation2 + $0x24] sm:$0xe] }
 0x1f7   : > { %7467 = vmatprep.mubr.bf16.mxu1 %v6790_v45  ;;  %7544 = vmatpush3.bf16.msra.mxu1 %v7993_v50  ;;  %v9253_v62 = vsel %vm9061_vm14, %v6858_v28, %v4032_v3  ;;  %v4034_v39 = vrot.slane %v4032_v3, 4  ;;  %v2495_v16 = vrot.slane %v9040_v22, 5  ;;  %v6859_v2 = vrot.slane %v3967_v42, 9  ;;  %v9263_v50 = vld [vmem:[#allocation2 + $0x2c] sm:$0x1]  ;;  %v7998_v23 = vld [vmem:[#allocation2 + $0x84] sm:$0xff]  }
 0x1f8   : > { %7545 = vmatprep.subr.bf16.mxu1 %v7996_v21  ;;  %v9260_v34 = vsel %vm9061_vm14, %v6784_v35, %v2492_v33  ;;  %v2494_v29 = vrot.slane %v2492_v33, 4  ;;  %v4039_v45 = vrot.slane %v9217_v61, 5  ;;  %v4042_v22 = vrot.slane %v9226_v19, 5  ;;  %v8006_v33 = vld [vmem:[#allocation8 + $0x110] sm:$0xff]  }
 0x1f9   : > { %v9267_v7 = vsel %vm9061_vm14, %v4034_v39, %v4035_v31  ;;  %7602 = vmatpush3.bf16.msra.mxu0 %v8013_v55  ;;  %v6785_v47 = vrot.slane %v2356_v37, 9  ;;  %v2499_v12 = vrot.slane %v9022_v8, 5  ;;  %v3212_v55 = vld [vmem:[#allocation2 + $0xc] sm:$0xf]  ;;  %v2502_v35 = vrot.slane %v9047_v5, 5 }
 0x1fa   : > { %v6874_v59 = vcombine.low %v9253_v62, %v9267_v7  ;;  %v9275_v15 = vsel %vm9061_vm14, %v2494_v29, %v2495_v16  ;;  %v9279_v28 = vsel %vm9061_vm14, %v6859_v2, %v4039_v45  ;;  %v4041_v3 = vrot.slane %v4039_v45, 4  ;;  %7683 = vmatprep.subr.bf16.mxu0 %v9244_v48  ;;  %v9442_v11 = vld [vmem:[#allocation2 + $0x68] sm:$0x1] }
 0x1fb   : > { %7524 = vmatmul.mubr.bf16.gmra.mxu0 %v7995_v40  ;;  %7546 = vmatpush3.bf16.msra.mxu1 %v7996_v21  ;;  %v9286_v31 = vsel %vm9061_vm14, %v6785_v47, %v2499_v12  ;;  %v2501_v42 = vrot.slane %v2499_v12, 4  ;;  %v6860_v39 = vrot.slane %v3968_v60, 9  ;;  %v4046_v21 = vrot.slane %v9256_v26, 5  ;;  %v9301_v40 = vld [vmem:[#allocation2 + $0x34] sm:$0xf] }
 0x1fc   : > { %7527 = vmatprep.mubr.bf16.mxu0 %v7998_v23  ;;  %7547 = vmatprep.subr.bf16.mxu1 %v8001_v24  ;;  %v9291_v37 = vsel %vm9061_vm14, %v4041_v3, %v4042_v22  ;;  %v4049_v16 = vrot.slane %v9263_v50, 5  ;;  %v3261_v5 = vshrl.u32 %v3212_v55, 16  ;;  %v3264_v45 = vshll.u32 %v3212_v55, 16  ;;  %v3969_v47 = vld [vmem:[#allocation2 + $0x30] sm:$0xe] }
 0x1fd   : > { %v9299_v2 = vsel %vm9061_vm14, %v2501_v42, %v2502_v35  ;;  %v9310_v12 = vsel %vm9061_vm14, %v6860_v39, %v4046_v21  ;;  %v4048_v60 = vrot.slane %v4046_v21, 4  ;;  %v3270_v23 = vshll.u32 %v9192_v14, 16  ;;  %v9313_v3 = vld [vmem:[#allocation2 + $0x38] sm:$0x1]  ;;  %v8011_v35 = vld [vmem:[#allocation8 + $0x108] sm:$0xff]  }
 0x1fe   : > { %7468 = vmatmul.mubr.bf16.gmra.mxu1 %v6791_v0  ;;  %v3263_v55 = vrot.slane %v3261_v5, 4  ;;  %v3266_v43 = vrot.slane %v3264_v45, 5  ;;  %v3274_v46 = vshrl.u32 %v9192_v14, 16  ;;  %v3280_v0 = vshll.u32 %v9199_v9, 16  ;;  %v3215_v42 = vld [vmem:[#allocation2 + $0x18] sm:$0xf] }
 0x1ff   : > { %7471 = vmatprep.mubr.bf16.mxu1 %v6792_v25  ;;  %7548 = vmatpush3.bf16.msra.mxu1 %v8001_v24  ;;  %v9322_v39 = vsel %vm9061_vm14, %v4048_v60, %v4049_v16  ;;  %v3272_v21 = vrot.slane %v3270_v23, 5  ;;  %v6861_v22 = vrot.slane %v3969_v47, 9  ;;  %v4053_v8 = vrot.slane %v9301_v40, 5  ;;  %v8003_v5 = vld [vmem:[#allocation2 + $0x9c] sm:$0xff]  }
 0x200   : > { %7549 = vmatprep.subr.bf16.mxu1 %v8006_v33  ;;  %v3267_v25 = vor.u32 %v3266_v43, %v3263_v55  ;;  %v3276_v24 = vrot.slane %v3274_v46, 4  ;;  %v3282_v14 = vrot.slane %v3280_v0, 5  ;;  %v4056_v16 = vrot.slane %v9313_v3, 5  ;;  %v3970_v23 = vld [vmem:[#allocation2 + $0x3c] sm:$0xe] }
 0x201   : > { %v9329_v9 = vsel %vm9061_vm14, %v6861_v22, %v4053_v8  ;;  %v4055_v45 = vrot.slane %v4053_v8, 4  ;;  %v3285_v60 = vshrl.u32 %v3215_v42, 16  ;;  %v3288_v29 = vshll.u32 %v3215_v42, 16  ;;  %v9333_v55 = vld [vmem:[#allocation2 + $0x40] sm:$0xf]  ;;  %v8014_v43 = vld [vmem:[#allocation8 + $0x100] sm:$0xff]  }
 0x202   : > { %v3268_v47 = vrot.slane %v3267_v25, 4  ;;  %v3277_v20 = vor.u32 %v3276_v24, %v3272_v21  ;;  %v3294_v36 = vshll.u32 %v9217_v61, 16  ;;  %v3298_v46 = vshrl.u32 %v9217_v61, 16 }
 0x203   : > { %7528 = vmatmul.mubr.bf16.gmra.mxu0 %v8000_v49  ;;  %7550 = vmatpush3.bf16.msra.mxu1 %v8006_v33  ;;  %v9337_v22 = vsel %vm9061_vm14, %v4055_v45, %v4056_v16  ;;  %v3287_v8 = vrot.slane %v3285_v60, 4  ;;  %v3304_v0 = vshll.u32 %v9226_v19, 16  ;;  %v9341_v33 = vld [vmem:[#allocation2 + $0x44] sm:$0x1]  ;;  %v3290_v24 = vrot.slane %v3288_v29, 5 }
 0x204   : > { %7531 = vmatprep.mubr.bf16.mxu0 %v8003_v5  ;;  %7551 = vmatprep.subr.bf16.mxu1 %v8011_v35  ;;  %v3273_v42 = vsel %vm8546_vm7, %v3268_v47, %v3272_v21  ;;  %v3278_v49 = vrot.slane %v3277_v20, 4  ;;  %v6877_v25 = vcombine.low %v9329_v9, %v9337_v22  ;;  %v3218_v5 = vld [vmem:[#allocation2 + $0x24] sm:$0xf]  ;;  %v3296_v45 = vrot.slane %v3294_v36, 5  ;;  %v9361_v47 = vld [vmem:[#allocation2 + $0x4c] sm:$0xf] }
 0x205   : > { %v3300_v16 = vrot.slane %v3298_v46, 4  ;;  %v3306_v61 = vrot.slane %v3304_v0, 5  ;;  %v6862_v60 = vrot.slane %v3970_v23, 9  ;;  %v3291_v20 = vor.u32 %v3290_v24, %v3287_v8  ;;  %v3971_v8 = vld [vmem:[#allocation2 + $0x48] sm:$0xe]  ;;  %v8008_v46 = vld [vmem:[#allocation2 + $0xb4] sm:$0xff]  }
 0x206   : > { %7472 = vmatmul.mubr.bf16.gmra.mxu1 %v6793_v27  ;;  %v3283_v19 = vsel %vm8546_vm7, %v3278_v49, %v3282_v14  ;;  %v4060_v29 = vrot.slane %v9333_v55, 5  ;;  %v4063_v21 = vrot.slane %v9341_v33, 5  ;;  %v3309_v36 = vshrl.u32 %v3218_v5, 16 }
 0x207   : > { %7475 = vmatprep.mubr.bf16.mxu1 %v6794_v30  ;;  %7552 = vmatpush3.bf16.msra.mxu1 %v8011_v35  ;;  %v9357_v57 = vcombine.low %v3273_v42, %v3283_v19  ;;  %v3301_v27 = vor.u32 %v3300_v16, %v3296_v45  ;;  %v3312_v23 = vshll.u32 %v3218_v5, 16  ;;  %v3292_v58 = vrot.slane %v3291_v20, 4  ;;  %v9376_v20 = vld [vmem:[#allocation2 + $0x50] sm:$0x1] }
 0x208   : > { %7553 = vmatprep.subr.bf16.mxu1 %v8014_v43  ;;  %v9365_v30 = vsel %vm9061_vm14, %v6862_v60, %v4060_v29  ;;  %v4062_v35 = vrot.slane %v4060_v29, 4  ;;  %v3318_v14 = vshll.u32 %v9256_v26, 16  ;;  %v3311_v42 = vrot.slane %v3309_v36, 4  ;;  %v3221_v29 = vld [vmem:[#allocation2 + $0x30] sm:$0xf] }
 0x209   : > { %v3302_v0 = vrot.slane %v3301_v27, 4  ;;  %v3314_v49 = vrot.slane %v3312_v23, 5  ;;  %v3322_v24 = vshrl.u32 %v9256_v26, 16  ;;  %v3297_v5 = vsel %vm8546_vm7, %v3292_v58, %v3296_v45 }
 0x20a   : > { %v9373_v16 = vsel %vm9061_vm14, %v4062_v35, %v4063_v21  ;;  %v3320_v60 = vrot.slane %v3318_v14, 5  ;;  %v3328_v19 = vshll.u32 %v9263_v50, 16  ;;  %v6863_v23 = vrot.slane %v3971_v8, 9  ;;  %v9390_v14 = vld [vmem:[#allocation2 + $0x58] sm:$0xf] }
 0x20b   : > { %7532 = vmatmul.mubr.bf16.gmra.mxu0 %v8005_v63  ;;  %7554 = vmatpush3.bf16.msra.mxu1 %v8014_v43  ;;  %v3307_v26 = vsel %vm8546_vm7, %v3302_v0, %v3306_v61  ;;  %v6878_v43 = vcombine.low %v9365_v30, %v9373_v16  ;;  %v3315_v45 = vor.u32 %v3314_v49, %v3311_v42  ;;  %v3324_v27 = vrot.slane %v3322_v24, 4  ;;  %v8025_v30 = vld [vmem:[#allocation8 + $0x1d8] sm:$0xff]  }
 0x20c   : > { %7535 = vmatprep.mubr.bf16.mxu0 %v8008_v46  ;;  %7635 = vmatprep.subr.bf16.mxu1 %v9359_v18  ;;  %v9383_v36 = vcombine.low %v3297_v5, %v3307_v26  ;;  %v3330_v21 = vrot.slane %v3328_v19, 5  ;;  %v4067_v50 = vrot.slane %v9361_v47, 5  ;;  %v4070_v35 = vrot.slane %v9376_v20, 5  ;;  %v9403_v5 = vld [vmem:[#allocation2 + $0x5c] sm:$0x1] }
 0x20d   : > { %v3316_v63 = vrot.slane %v3315_v45, 4  ;;  %v3325_v58 = vor.u32 %v3324_v27, %v3320_v60  ;;  %v3333_v61 = vshrl.u32 %v3221_v29, 16  ;;  %v3336_v0 = vshll.u32 %v3221_v29, 16  ;;  %v3224_v26 = vld [vmem:[#allocation2 + $0x3c] sm:$0xf] }
 0x20e   : > { %7476 = vmatmul.mubr.bf16.gmra.mxu1 %v6795_v38  ;;  %v9397_v8 = vsel %vm9061_vm14, %v6863_v23, %v4067_v50  ;;  %v4069_v46 = vrot.slane %v4067_v50, 4  ;;  %v3342_v54 = vshll.u32 %v9301_v40, 16  ;;  %v3346_v24 = vshrl.u32 %v9301_v40, 16 }
 0x20f   : > { %7479 = vmatprep.mubr.bf16.mxu1 %v6796_v10  ;;  %v3321_v38 = vsel %vm8546_vm7, %v3316_v63, %v3320_v60  ;;  %v3326_v42 = vrot.slane %v3325_v58, 4  ;;  %v3335_v49 = vrot.slane %v3333_v61, 4  ;;  %v3338_v10 = vrot.slane %v3336_v0, 5 }
 0x210   : > { %v9407_v32 = vsel %vm9061_vm14, %v4069_v46, %v4070_v35  ;;  %v3344_v19 = vrot.slane %v3342_v54, 5  ;;  %v3352_v29 = vshll.u32 %v9313_v3, 16  ;;  %v3348_v27 = vrot.slane %v3346_v24, 4 }
 0x211   : > { %v3331_v45 = vsel %vm8546_vm7, %v3326_v42, %v3330_v21  ;;  %v6879_v60 = vcombine.low %v9397_v8, %v9407_v32  ;;  %v6864_v40 = vrot.slane %v3972_v41, 9  ;;  %v3339_v50 = vor.u32 %v3338_v10, %v3335_v49  ;;  %v3973_v49 = vld [vmem:[#allocation2 + $0x60] sm:$0xe] }
 0x212   : > { %v9414_v23 = vcombine.low %v3321_v38, %v3331_v45  ;;  %v3354_v63 = vrot.slane %v3352_v29, 5  ;;  %v4074_v58 = vrot.slane %v9390_v14, 5  ;;  %v3349_v3 = vor.u32 %v3348_v27, %v3344_v19  ;;  %v9426_v38 = vld [vmem:[#allocation2 + $0x64] sm:$0xf]  ;;  %v8020_v27 = vld [vmem:[#allocation8 + $0x1f0] sm:$0xff]  }
 0x213   : > { %7536 = vmatmul.mubr.bf16.gmra.mxu0 %v8010_v53  ;;  %v4077_v35 = vrot.slane %v9403_v5, 5  ;;  %v3357_v21 = vshrl.u32 %v3224_v26, 16  ;;  %v3360_v61 = vshll.u32 %v3224_v26, 16  ;;  %v3340_v46 = vrot.slane %v3339_v50, 4 }
 0x214   : > { %7603 = vmatprep.mubr.bf16.mxu0 %v6874_v59  ;;  %v9423_v0 = vsel %vm9061_vm14, %v6864_v40, %v4074_v58  ;;  %v4076_v54 = vrot.slane %v4074_v58, 4  ;;  %v3366_v41 = vshll.u32 %v9333_v55, 16  ;;  %v3350_v62 = vrot.slane %v3349_v3, 4 }
 0x215   : > { %v3359_v7 = vrot.slane %v3357_v21, 4  ;;  %v3362_v59 = vrot.slane %v3360_v61, 5  ;;  %v3370_v42 = vshrl.u32 %v9333_v55, 16  ;;  %v3345_v24 = vsel %vm8546_vm7, %v3340_v46, %v3344_v19  ;;  %v3974_v46 = vld [vmem:[#allocation2 + $0x6c] sm:$0xe] }
 0x216   : > { %7480 = vmatmul.mubr.bf16.gmra.mxu1 %v6797_v6  ;;  %v9439_v53 = vsel %vm9061_vm14, %v4076_v54, %v4077_v35  ;;  %v3368_v10 = vrot.slane %v3366_v41, 5  ;;  %v3376_v1 = vshll.u32 %v9341_v33, 16  ;;  %v3227_v6 = vld [vmem:[#allocation2 + $0x48] sm:$0xf]  ;;  %v3355_v55 = vsel %vm8546_vm7, %v3350_v62, %v3354_v63 }
 0x217   : > { %7483 = vmatprep.mubr.bf16.mxu1 %v6798_v4  ;;  %v6880_v44 = vcombine.low %v9423_v0, %v9439_v53  ;;  %v3363_v51 = vor.u32 %v3362_v59, %v3359_v7  ;;  %v3372_v4 = vrot.slane %v3370_v42, 4  ;;  %v9448_v29 = vcombine.low %v3345_v24, %v3355_v55  ;;  %v8022_v24 = vld [vmem:[#allocation8 + $0x1e8] sm:$0xff]  }
 0x218   : > { %v3378_v19 = vrot.slane %v3376_v1, 5  ;;  %v6865_v26 = vrot.slane %v3973_v49, 9  ;;  %v4081_v45 = vrot.slane %v9426_v38, 5  ;;  %v4084_v50 = vrot.slane %v9442_v11, 5 }
 0x219   : > { %v3364_v40 = vrot.slane %v3363_v51, 4  ;;  %v3373_v33 = vor.u32 %v3372_v4, %v3368_v10  ;;  %v3381_v58 = vshrl.u32 %v3227_v6, 16  ;;  %v11008_v63 = vcombine.low %v9279_v28, %v9291_v37  ;;  %v9466_v37 = vld [vmem:[#allocation2 + $0x74] sm:$0x1] }
 0x21a   : > { %v9457_v3 = vsel %vm9061_vm14, %v6865_v26, %v4081_v45  ;;  %v4083_v35 = vrot.slane %v4081_v45, 4  ;;  %v3384_v21 = vshll.u32 %v3227_v6, 16  ;;  %v3390_v61 = vshll.u32 %v9361_v47, 16  ;;  %v9481_v6 = vld [vmem:[#allocation2 + $0x70] sm:$0xf] }
 0x21b   : > { %7604 = vmatmul.mubr.bf16.vlgmr.msra.gmra.mxu0 %v11008_v63  ;;  %v11009_v54 = vcombine.low %v9310_v12, %v9322_v39  ;;  %v3369_v41 = vsel %vm8546_vm7, %v3364_v40, %v3368_v10  ;;  %v3374_v62 = vrot.slane %v3373_v33, 4  ;;  %v3383_v7 = vrot.slane %v3381_v58, 4  ;;  %v3230_v39 = vld [vmem:[#allocation2 + $0x54] sm:$0xf] }
 0x21c   : > { %v3394_v28 = vshrl.u32 %v9361_v47, 16  ;;  %7684 = vmatpush3.bf16.msra.mxu0 %v9244_v48  ;;  %v9471_v59 = vsel %vm9061_vm14, %v4083_v35, %v4084_v50  ;;  %v3386_v42 = vrot.slane %v3384_v21, 5  ;;  %v3392_v49 = vrot.slane %v3390_v61, 5 }
 0x21d   : > { %7607 = vmatprep.mubr.bf16.mxu0 %v11009_v54  ;;  %v3400_v12 = vshll.u32 %v9376_v20, 16  ;;  %7685 = vmatprep.subr.bf16.mxu0 %v8020_v27  ;;  %v11010_v10 = vcombine.low %v9223_v17, %v9241_v56  ;;  %v3379_v47 = vsel %vm8546_vm7, %v3374_v62, %v3378_v19  ;;  %v6881_v48 = vcombine.low %v9457_v3, %v9471_v59 }
 0x21e   : > { %v3396_v1 = vrot.slane %v3394_v28, 4  ;;  %v6866_v55 = vrot.slane %v3974_v46, 9  ;;  %v11011_v20 = vcombine.low %v9260_v34, %v9275_v15  ;;  %v9486_v51 = vcombine.low %v3369_v41, %v3379_v47  ;;  %v8023_v15 = vld [vmem:[#allocation8 + $0x1e0] sm:$0xff]   ;;  %v3233_v28 = vld [vmem:[#allocation2 + $0x60] sm:$0xf] }
 0x21f   : > { %7484 = vmatmul.mubr.bf16.gmra.mxu1 %v11010_v10  ;;  %v3387_v4 = vor.u32 %v3386_v42, %v3383_v7  ;;  %v3402_v26 = vrot.slane %v3400_v12, 5  ;;  %v4088_v17 = vrot.slane %v9481_v6, 5  ;;  %v4091_v19 = vrot.slane %v9466_v37, 5  ;;  %v3975_v46 = vld [vmem:[#allocation2 + $0x78] sm:$0xe] }
 0x220   : > { %7487 = vmatprep.mubr.bf16.mxu1 %v11011_v20  ;;  %v3397_v56 = vor.u32 %v3396_v1, %v3392_v49  ;;  %v3405_v45 = vshrl.u32 %v3230_v39, 16  ;;  %v3408_v40 = vshll.u32 %v3230_v39, 16  ;;  %7686 = vmatpush3.bf16.msra.mxu0 %v8020_v27  ;;  %v3414_v34 = vshll.u32 %v9390_v14, 16  ;;  %v9506_v7 = vld [vmem:[#allocation2 + $0x80] sm:$0x1] }
 0x221   : > { %v3388_v33 = vrot.slane %v3387_v4, 4  ;;  %v9492_v50 = vsel %vm9061_vm14, %v6866_v55, %v4088_v17  ;;  %v4090_v58 = vrot.slane %v4088_v17, 4  ;;  %7687 = vmatprep.subr.bf16.mxu0 %v8022_v24  ;;  %v3418_v61 = vshrl.u32 %v9390_v14, 16  ;;  %v9515_v42 = vld [vmem:[#allocation2 + $0x7c] sm:$0xf] }
 0x222   : > { %v3398_v63 = vrot.slane %v3397_v56, 4  ;;  %v3407_v35 = vrot.slane %v3405_v45, 4  ;;  %v3410_v21 = vrot.slane %v3408_v40, 5  ;;  %v3416_v41 = vrot.slane %v3414_v34, 5  ;;  %v8026_v34 = vld [vmem:[#allocation8 + $0x1d0] sm:$0xff]  }
 0x223   : > { %7608 = vmatmul.mubr.bf16.gmra.mxu0 %v6877_v25  ;;  %v3393_v27 = vsel %vm8546_vm7, %v3388_v33, %v3392_v49  ;;  %v9503_v54 = vsel %vm9061_vm14, %v4090_v58, %v4091_v19  ;;  %v3424_v62 = vshll.u32 %v9403_v5, 16  ;;  %v3420_v14 = vrot.slane %v3418_v61, 4  ;;  %v9533_v19 = vld [vmem:[#allocation2 + $0x8c] sm:$0x1] }
 0x224   : > { %7611 = vmatprep.mubr.bf16.mxu0 %v6878_v43  ;;  %v3403_v9 = vsel %vm8546_vm7, %v3398_v63, %v3402_v26  ;;  %v6882_v22 = vcombine.low %v9492_v50, %v9503_v54  ;;  %v3411_v25 = vor.u32 %v3410_v21, %v3407_v35  ;;  %7688 = vmatpush3.bf16.msra.mxu0 %v8022_v24  ;;  %v6867_v12 = vrot.slane %v3975_v46, 9  ;;  %v3976_v26 = vld [vmem:[#allocation2 + $0x84] sm:$0xe]  ;;  %v3236_v58 = vld [vmem:[#allocation2 + $0x6c] sm:$0xf] }
 0x225   : > { %v9517_v49 = vcombine.low %v3393_v27, %v3403_v9  ;;  %v3426_v5 = vrot.slane %v3424_v62, 5  ;;  %v4095_v39 = vrot.slane %v9515_v42, 5  ;;  %7689 = vmatprep.subr.bf16.mxu0 %v8023_v15  ;;  %v11012_v16 = vcombine.low %v9286_v31, %v9299_v2  ;;  %v9544_v21 = vld [vmem:[#allocation2 + $0x88] sm:$0xf] }
 0x226   : > { %v3412_v43 = vrot.slane %v3411_v25, 4  ;;  %v3421_v10 = vor.u32 %v3420_v14, %v3416_v41  ;;  %v4098_v47 = vrot.slane %v9506_v7, 5  ;;  %v3429_v1 = vshrl.u32 %v3233_v28, 16 }
 0x227   : > { %7488 = vmatmul.mubr.bf16.gmra.mxu1 %v11012_v16  ;;  %v9527_v24 = vsel %vm9061_vm14, %v6867_v12, %v4095_v39  ;;  %v4097_v55 = vrot.slane %v4095_v39, 4  ;;  %v3432_v20 = vshll.u32 %v3233_v28, 16  ;;  %v3438_v4 = vshll.u32 %v9426_v38, 16  ;;  %v3977_v39 = vld [vmem:[#allocation2 + $0x90] sm:$0xe] }
 0x228   : > { %7555 = vmatprep.mubr.bf16.mxu1 %v9357_v57  ;;  %v3417_v31 = vsel %vm8546_vm7, %v3412_v43, %v3416_v41  ;;  %v3422_v2 = vrot.slane %v3421_v10, 4  ;;  %v3431_v17 = vrot.slane %v3429_v1, 4  ;;  %v3442_v56 = vshrl.u32 %v9426_v38, 16  ;;  %7690 = vmatpush3.bf16.msra.mxu0 %v8023_v15  ;;  %v8016_v41 = vld [vmem:[#allocation8 + $0x1b0] sm:$0xff]   ;;  %v9572_v10 = vld [vmem:[#allocation2 + $0x98] sm:$0x1] }
 0x229   : > { %v9537_v57 = vsel %vm9061_vm14, %v4097_v55, %v4098_v47  ;;  %v3434_v45 = vrot.slane %v3432_v20, 5  ;;  %v3440_v40 = vrot.slane %v3438_v4, 5  ;;  %v3448_v33 = vshll.u32 %v9442_v11, 16  ;;  %7691 = vmatprep.subr.bf16.mxu0 %v8025_v30  ;;  %v3239_v47 = vld [vmem:[#allocation2 + $0x78] sm:$0xf] }
 0x22a   : > { %v3427_v63 = vsel %vm8546_vm7, %v3422_v2, %v3426_v5  ;;  %v6883_v38 = vcombine.low %v9527_v24, %v9537_v57  ;;  %v3444_v35 = vrot.slane %v3442_v56, 4  ;;  %v6868_v15 = vrot.slane %v3976_v26, 9  ;;  %v8028_v5 = vld [vmem:[#allocation8 + $0x1c8] sm:$0xff]   ;;  %v9578_v20 = vld [vmem:[#allocation2 + $0x94] sm:$0xf] }
 0x22b   : > { %7612 = vmatmul.mubr.bf16.gmra.mxu0 %v6879_v60  ;;  %v9549_v61 = vcombine.low %v3417_v31, %v3427_v63  ;;  %v3435_v11 = vor.u32 %v3434_v45, %v3431_v17  ;;  %v3450_v46 = vrot.slane %v3448_v33, 5  ;;  %v4102_v27 = vrot.slane %v9544_v21, 5 }
 0x22c   : > { %7615 = vmatprep.mubr.bf16.mxu0 %v6880_v44  ;;  %v3445_v62 = vor.u32 %v3444_v35, %v3440_v40  ;;  %v4105_v28 = vrot.slane %v9533_v19, 5  ;;  %v3453_v9 = vshrl.u32 %v3236_v58, 16  ;;  %v3456_v25 = vshll.u32 %v3236_v58, 16  ;;  %7692 = vmatpush3.bf16.msra.mxu0 %v8025_v30  ;;  %v3978_v35 = vld [vmem:[#allocation2 + $0x9c] sm:$0xe] }
 0x22d   : > { %v3436_v14 = vrot.slane %v3435_v11, 4  ;;  %v9558_v8 = vsel %vm9061_vm14, %v6868_v15, %v4102_v27  ;;  %v4104_v32 = vrot.slane %v4102_v27, 4  ;;  %v3462_v60 = vshll.u32 %v9481_v6, 16  ;;  %7693 = vmatprep.subr.bf16.mxu0 %v8026_v34  ;;  %v8018_v15 = vld [vmem:[#allocation8 + $0x1a0] sm:$0xff]  }
 0x22e   : > { %v3446_v0 = vrot.slane %v3445_v62, 4  ;;  %v3455_v53 = vrot.slane %v3453_v9, 4  ;;  %v3458_v44 = vrot.slane %v3456_v25, 5  ;;  %v3466_v12 = vshrl.u32 %v9481_v6, 16  ;;  %v8017_v6 = vld [vmem:[#allocation8 + $0x1a8] sm:$0xff]  }
 0x22f   : > { %7556 = vmatmul.mubr.bf16.vlgmr.msra.gmra.mxu1 %v9383_v36  ;;  %v3441_v30 = vsel %vm8546_vm7, %v3436_v14, %v3440_v40  ;;  %v9569_v16 = vsel %vm9061_vm14, %v4104_v32, %v4105_v28  ;;  %v3464_v43 = vrot.slane %v3462_v60, 5  ;;  %v3472_v36 = vshll.u32 %v9466_v37, 16  ;;  %v8029_v40 = vld [vmem:[#allocation8 + $0x1c0] sm:$0xff]   ;;  %v9603_v9 = vld [vmem:[#allocation2 + $0xa4] sm:$0x1]  ;;  %v8021_v60 = vld [vmem:[#allocation8 + $0x198] sm:$0xff]  }
 0x230   : > { %7636 = vmatpush3.bf16.msra.mxu1 %v9359_v18  ;;  %7559 = vmatprep.mubr.bf16.mxu1 %v9414_v23  ;;  %v3451_v18 = vsel %vm8546_vm7, %v3446_v0, %v3450_v46  ;;  %v6884_v23 = vcombine.low %v9558_v8, %v9569_v16  ;;  %v3459_v1 = vor.u32 %v3458_v44, %v3455_v53  ;;  %v3468_v55 = vrot.slane %v3466_v12, 4  ;;  %v3242_v46 = vld [vmem:[#allocation2 + $0x84] sm:$0xf] }
 0x231   : > { %7637 = vmatprep.subr.bf16.mxu1 %v8016_v41  ;;  %7694 = vmatpush3.bf16.msra.mxu0 %v8026_v34  ;;  %v9580_v4 = vcombine.low %v3441_v30, %v3451_v18  ;;  %v3474_v26 = vrot.slane %v3472_v36, 5  ;;  %v6869_v37 = vrot.slane %v3977_v39, 9  ;;  %v4109_v31 = vrot.slane %v9578_v20, 5  ;;  %v3979_v18 = vld [vmem:[#allocation2 + $0xa8] sm:$0xe] }
 0x232   : > { %7695 = vmatprep.subr.bf16.mxu0 %v8028_v5  ;;  %v3460_v2 = vrot.slane %v3459_v1, 4  ;;  %v3469_v17 = vor.u32 %v3468_v55, %v3464_v43  ;;  %v4112_v56 = vrot.slane %v9572_v10, 5  ;;  %v3477_v45 = vshrl.u32 %v3239_v47, 16 }
 0x233   : > { %7616 = vmatmul.mubr.bf16.gmra.mxu0 %v6881_v48  ;;  %v9589_v33 = vsel %vm9061_vm14, %v6869_v37, %v4109_v31  ;;  %v4111_v58 = vrot.slane %v4109_v31, 4  ;;  %v3480_v34 = vshll.u32 %v3239_v47, 16  ;;  %v3486_v63 = vshll.u32 %v9515_v42, 16  ;;  %v9631_v31 = vld [vmem:[#allocation2 + $0xb0] sm:$0x1] }
 0x234   : > { %7638 = vmatpush3.bf16.msra.mxu1 %v8016_v41  ;;  %7619 = vmatprep.mubr.bf16.mxu0 %v6882_v22  ;;  %v3465_v11 = vsel %vm8546_vm7, %v3460_v2, %v3464_v43  ;;  %v3470_v3 = vrot.slane %v3469_v17, 4  ;;  %v3479_v59 = vrot.slane %v3477_v45, 4  ;;  %v3490_v48 = vshrl.u32 %v9515_v42, 16  ;;  %v9610_v42 = vld [vmem:[#allocation2 + $0xa0] sm:$0xf] }
 0x235   : > { %7639 = vmatprep.subr.bf16.mxu1 %v8017_v6  ;;  %v9600_v27 = vsel %vm9061_vm14, %v4111_v58, %v4112_v56  ;;  %v3482_v41 = vrot.slane %v3480_v34, 5  ;;  %v3488_v62 = vrot.slane %v3486_v63, 5  ;;  %v3496_v28 = vshll.u32 %v9506_v7, 16  ;;  %7696 = vmatpush3.bf16.msra.mxu0 %v8028_v5  ;;  %v3245_v2 = vld [vmem:[#allocation2 + $0x90] sm:$0xf]  ;;  %v8024_v56 = vld [vmem:[#allocation8 + $0x190] sm:$0xff]  }
 0x236   : > { %v3475_v50 = vsel %vm8546_vm7, %v3470_v3, %v3474_v26  ;;  %v6885_v54 = vcombine.low %v9589_v33, %v9600_v27  ;;  %v3492_v22 = vrot.slane %v3490_v48, 4  ;;  %v6870_v25 = vrot.slane %v3978_v35, 9  ;;  %7697 = vmatprep.subr.bf16.mxu0 %v8029_v40  ;;  %v9639_v17 = vld [vmem:[#allocation2 + $0xac] sm:$0xf]  ;;  %v3980_v3 = vld [vmem:[#allocation2 + $0xb4] sm:$0xe] }
 0x237   : > { %7560 = vmatmul.mubr.bf16.gmra.mxu1 %v9448_v29  ;;  %v9613_v7 = vcombine.low %v3465_v11, %v3475_v50  ;;  %v3483_v14 = vor.u32 %v3482_v41, %v3479_v59  ;;  %v3498_v32 = vrot.slane %v3496_v28, 5  ;;  %v4116_v29 = vrot.slane %v9610_v42, 5  ;;  %v3248_v41 = vld [vmem:[#allocation2 + $0x9c] sm:$0xf] }
 0x238   : > { %7563 = vmatprep.mubr.bf16.mxu1 %v9486_v51  ;;  %7640 = vmatpush3.bf16.msra.mxu1 %v8017_v6  ;;  %v3493_v5 = vor.u32 %v3492_v22, %v3488_v62  ;;  %v4119_v0 = vrot.slane %v9603_v9, 5  ;;  %v3501_v53 = vshrl.u32 %v3242_v46, 16  ;;  %v3504_v44 = vshll.u32 %v3242_v46, 16 }
 0x239   : > { %7641 = vmatprep.subr.bf16.mxu1 %v8018_v15  ;;  %v3484_v12 = vrot.slane %v3483_v14, 4  ;;  %v9619_v39 = vsel %vm9061_vm14, %v6870_v25, %v4116_v29  ;;  %v4118_v51 = vrot.slane %v4116_v29, 4  ;;  %v3510_v30 = vshll.u32 %v9544_v21, 16  ;;  %7698 = vmatpush3.bf16.msra.mxu0 %v8029_v40  ;;  %v9658_v25 = vld [vmem:[#allocation2 + $0xbc] sm:$0x1] }
 0x23a   : > { %v3494_v43 = vrot.slane %v3493_v5, 4  ;;  %v3503_v36 = vrot.slane %v3501_v53, 4  ;;  %v3506_v47 = vrot.slane %v3504_v44, 5  ;;  %v3514_v6 = vshrl.u32 %v9544_v21, 16 }
 0x23b   : > { %7620 = vmatmul.mubr.bf16.gmra.mxu0 %v6883_v38  ;;  %v3489_v1 = vsel %vm8546_vm7, %v3484_v12, %v3488_v62  ;;  %v4120_v55 = vsel %vm9061_vm14, %v4118_v51, %v4119_v0  ;;  %v3512_v26 = vrot.slane %v3510_v30, 5  ;;  %v3520_v37 = vshll.u32 %v9533_v19, 16 }
 0x23c   : > { %7642 = vmatpush3.bf16.msra.mxu1 %v8018_v15  ;;  %7623 = vmatprep.mubr.bf16.mxu0 %v6884_v23  ;;  %v3499_v24 = vsel %vm8546_vm7, %v3494_v43, %v3498_v32  ;;  %v6886_v57 = vcombine.low %v9619_v39, %v4120_v55  ;;  %v3507_v38 = vor.u32 %v3506_v47, %v3503_v36  ;;  %v3516_v21 = vrot.slane %v3514_v6, 4  ;;  %v8030_v43 = vld [vmem:[#allocation8 + $0x180] sm:$0xff]  }
 0x23d   : > { %7643 = vmatprep.subr.bf16.mxu1 %v8021_v60  ;;  %v9641_v45 = vcombine.low %v3489_v1, %v3499_v24  ;;  %v3522_v19 = vrot.slane %v3520_v37, 5  ;;  %v6871_v40 = vrot.slane %v3979_v18, 9  ;;  %v4123_v58 = vrot.slane %v9639_v17, 5 }
 0x23e   : > { %v3508_v8 = vrot.slane %v3507_v38, 4  ;;  %v3517_v16 = vor.u32 %v3516_v21, %v3512_v26  ;;  %v4126_v23 = vrot.slane %v9631_v31, 5  ;;  %v3525_v34 = vshrl.u32 %v3245_v2, 16  ;;  %v9687_v38 = vld [vmem:[#allocation2 + $0xc8] sm:$0x1] }
 0x23f   : > { %7564 = vmatmul.mubr.bf16.gmra.mxu1 %v9517_v49  ;;  %v9649_v63 = vsel %vm9061_vm14, %v6871_v40, %v4123_v58  ;;  %v4125_v35 = vrot.slane %v4123_v58, 4  ;;  %v3528_v15 = vshll.u32 %v3245_v2, 16  ;;  %v3534_v11 = vshll.u32 %v9578_v20, 16  ;;  %v9693_v40 = vld [vmem:[#allocation2 + $0xc4] sm:$0xf]  ;;  %v9695_v58 = vld [vmem:[#allocation8 + $0x238] sm:$0xff]  }
 0x240   : > { %7567 = vmatprep.mubr.bf16.mxu1 %v9549_v61  ;;  %7644 = vmatpush3.bf16.msra.mxu1 %v8021_v60  ;;  %v3513_v49 = vsel %vm8546_vm7, %v3508_v8, %v3512_v26  ;;  %v3518_v59 = vrot.slane %v3517_v16, 4  ;;  %v3527_v48 = vrot.slane %v3525_v34, 4  ;;  %v3538_v46 = vshrl.u32 %v9578_v20, 16  ;;  %v8027_v61 = vld [vmem:[#allocation8 + $0x188] sm:$0xff]   ;;  %v9663_v60 = vld [vmem:[#allocation2 + $0xb8] sm:$0xf] }
 0x241   : > { %7645 = vmatprep.subr.bf16.mxu1 %v8024_v56  ;;  %v4127_v62 = vsel %vm9061_vm14, %v4125_v35, %v4126_v23  ;;  %v3530_v28 = vrot.slane %v3528_v15, 5  ;;  %v3536_v50 = vrot.slane %v3534_v11, 5  ;;  %v3544_v22 = vshll.u32 %v9572_v10, 16  ;;  %v3981_v26 = vld [vmem:[#allocation2 + $0xc0] sm:$0xe] }
 0x242   : > { %v3523_v14 = vsel %vm8546_vm7, %v3518_v59, %v3522_v19  ;;  %v6887_v32 = vcombine.low %v9649_v63, %v4127_v62  ;;  %v3540_v29 = vrot.slane %v3538_v46, 4  ;;  %v6872_v20 = vrot.slane %v3980_v3, 9  ;;  %v9671_v44 = vpop.f32.mrf.mxu0  ;;  %v4851_v46 = vld [vmem:[#allocation2 + $0x18] sm:$0xf] }
 0x243   : > { %7624 = vmatmul.mubr.bf16.gmra.mxu0 %v6885_v54  ;;  %v9668_v5 = vcombine.low %v3513_v49, %v3523_v14  ;;  %v3531_v0 = vor.u32 %v3530_v28, %v3527_v48  ;;  %v3546_v53 = vrot.slane %v3544_v22, 5  ;;  %v4130_v10 = vrot.slane %v9663_v60, 5 }
 0x244   : > { %7646 = vmatpush3.bf16.msra.mxu1 %v8024_v56  ;;  %7627 = vmatprep.mubr.bf16.mxu0 %v6886_v57  ;;  %v3541_v12 = vor.u32 %v3540_v29, %v3536_v50  ;;  %v4133_v39 = vrot.slane %v9658_v25, 5  ;;  %v3549_v51 = vshrl.u32 %v3248_v41, 16  ;;  %v3552_v30 = vshll.u32 %v3248_v41, 16  ;;  %v9677_v47 = vpop.f32.mrf.mxu0  ;;  %v9713_v29 = vld [vmem:[#allocation2 + $0x1c] sm:$0xf] }
 0x245   : > { %7647 = vmatprep.subr.bf16.mxu1 %v8027_v61  ;;  %v3532_v36 = vrot.slane %v3531_v0, 4  ;;  %v4131_v33 = vsel %vm9061_vm14, %v6872_v20, %v4130_v10  ;;  %v4132_v27 = vrot.slane %v4130_v10, 4  ;;  %v3558_v54 = vshll.u32 %v9610_v42, 16  ;;  %v9718_v10 = vld [vmem:[#allocation2 + $0x20] sm:$0x1] }
 0x246   : > { %v3542_v6 = vrot.slane %v3541_v12, 4  ;;  %v3551_v18 = vrot.slane %v3549_v51, 4  ;;  %v3554_v1 = vrot.slane %v3552_v30, 5  ;;  %v3562_v55 = vshrl.u32 %v9610_v42, 16  ;;  %v9689_v21 = vpop.f32.mrf.mxu0  ;;  %v3254_v12 = vld [vmem:[#allocation2 + $0xb4] sm:$0xf] }
 0x247   : > { %7568 = vmatmul.mubr.bf16.gmra.mxu1 %v9580_v4  ;;  %v3537_v37 = vsel %vm8546_vm7, %v3532_v36, %v3536_v50  ;;  %v4134_v2 = vsel %vm9061_vm14, %v4132_v27, %v4133_v39  ;;  %v3560_v24 = vrot.slane %v3558_v54, 5  ;;  %v3568_v57 = vshll.u32 %v9603_v9, 16  ;;  %v3251_v4 = vld [vmem:[#allocation2 + $0xa8] sm:$0xf] }
 0x248   : > { %7571 = vmatprep.mubr.bf16.mxu1 %v9613_v7  ;;  %7648 = vmatpush3.bf16.msra.mxu1 %v8027_v61  ;;  %v3547_v42 = vsel %vm8546_vm7, %v3542_v6, %v3546_v53  ;;  %v6888_v56 = vcombine.low %v4131_v33, %v4134_v2  ;;  %v3555_v7 = vor.u32 %v3554_v1, %v3551_v18  ;;  %v3564_v19 = vrot.slane %v3562_v55, 4  ;;  %v9701_v11 = vpop.f32.mrf.mxu0 }
 0x249   : > { %7649 = vmatprep.subr.bf16.mxu1 %v8030_v43  ;;  %v9697_v8 = vcombine.low %v3537_v37, %v3547_v42  ;;  %v3570_v9 = vrot.slane %v3568_v57, 5  ;;  %v6873_v16 = vrot.slane %v3981_v26, 9  ;;  %v4137_v23 = vrot.slane %v9693_v40, 5 }
 0x24a   : > { %v3556_v34 = vrot.slane %v3555_v7, 4  ;;  %v3565_v63 = vor.u32 %v3564_v19, %v3560_v24  ;;  %v4140_v35 = vrot.slane %v9687_v38, 5  ;;  %v3573_v15 = vshrl.u32 %v3251_v4, 16  ;;  %v9720_v39 = vpop.f32.mrf.mxu0 }
 0x24b   : > { %7628 = vmatmul.mubr.bf16.gmra.mxu0 %v6887_v32  ;;  %v4138_v3 = vsel %vm9061_vm14, %v6873_v16, %v4137_v23  ;;  %v4139_v49 = vrot.slane %v4137_v23, 4  ;;  %v3576_v59 = vshll.u32 %v3251_v4, 16  ;;  %v3582_v48 = vshll.u32 %v9639_v17, 16 }
 0x24c   : > { %7650 = vmatpush3.bf16.msra.mxu1 %v8030_v43  ;;  %7631 = vmatprep.mubr.bf16.mxu0 %v6888_v56  ;;  %v3561_v41 = vsel %vm8546_vm7, %v3556_v34, %v3560_v24  ;;  %v3566_v61 = vrot.slane %v3565_v63, 4  ;;  %v3575_v62 = vrot.slane %v3573_v15, 4  ;;  %v3586_v28 = vshrl.u32 %v9639_v17, 16  ;;  %v4854_v56 = vld [vmem:[#allocation2 + $0x24] sm:$0xf] }
 0x24d   : > { %7731 = vmatprep.subr.bf16.mxu1 %v9695_v58  ;;  %v4141_v50 = vsel %vm9061_vm14, %v4139_v49, %v4140_v35  ;;  %v3578_v22 = vrot.slane %v3576_v59, 5  ;;  %v3584_v14 = vrot.slane %v3582_v48, 5  ;;  %v3592_v32 = vshll.u32 %v9631_v31, 16  ;;  %v9735_v15 = vld [vmem:[#allocation2 + $0x28] sm:$0xf] }
 0x24e   : > { %v3571_v20 = vsel %vm8546_vm7, %v3566_v61, %v3570_v9  ;;  %v6889_v0 = vcombine.low %v4138_v3, %v4141_v50  ;;  %v3588_v53 = vrot.slane %v3586_v28, 4  ;;  %v4900_v17 = vshrl.u32 %v4851_v46, 16  ;;  %v9738_v48 = vld [vmem:[#allocation2 + $0x2c] sm:$0x1] }
 0x24f   : > { %7572 = vmatmul.mubr.bf16.gmra.mxu1 %v9641_v45  ;;  %v6846_v51 = vcombine.low %v3561_v41, %v3571_v20  ;;  %v3579_v30 = vor.u32 %v3578_v22, %v3575_v62  ;;  %v3594_v31 = vrot.slane %v3592_v32, 5  ;;  %v4903_v43 = vshll.u32 %v4851_v46, 16 }
 0x250   : > { %7575 = vmatprep.mubr.bf16.mxu1 %v9668_v5  ;;  %v3589_v36 = vor.u32 %v3588_v53, %v3584_v14  ;;  %v4902_v33 = vrot.slane %v4900_v17, 4  ;;  %v4909_v45 = vshll.u32 %v9713_v29, 16  ;;  %v4913_v27 = vshrl.u32 %v9713_v29, 16  ;;  %v9726_v5 = vpop.f32.mrf.mxu0 }
 0x251   : > { %v3580_v54 = vrot.slane %v3579_v30, 4  ;;  %v4905_v6 = vrot.slane %v4903_v43, 5  ;;  %v4919_v18 = vshll.u32 %v9718_v10, 16  ;;  %v3597_v1 = vshrl.u32 %v3254_v12, 16 }
 0x252   : > { %v3590_v55 = vrot.slane %v3589_v36, 4  ;;  %v4911_v26 = vrot.slane %v4909_v45, 5  ;;  %v4915_v37 = vrot.slane %v4913_v27, 4  ;;  %v3600_v2 = vshll.u32 %v3254_v12, 16  ;;  %v9740_v41 = vpop.f32.mrf.mxu0 }
 0x253   : > { %7632 = vmatmul.mubr.bf16.gmra.mxu0 %v6889_v0  ;;  %v3585_v24 = vsel %vm8546_vm7, %v3580_v54, %v3584_v14  ;;  %v4906_v57 = vor.u32 %v4905_v6, %v4902_v33  ;;  %v4921_v4 = vrot.slane %v4919_v18, 5  ;;  %v3599_v42 = vrot.slane %v3597_v1, 4  ;;  %v4857_v1 = vld [vmem:[#allocation2 + $0x30] sm:$0xf] }
 0x254   : > { %v3595_v7 = vsel %vm8546_vm7, %v3590_v55, %v3594_v31  ;;  %v4916_v19 = vor.u32 %v4915_v37, %v4911_v26  ;;  %v3602_v9 = vrot.slane %v3600_v2, 5  ;;  %v3606_v16 = vshll.u32 %v9663_v60, 16  ;;  %v9751_v31 = vpop.f32.mrf.mxu0 }
 0x255   : > { %v6847_v23 = vcombine.low %v3585_v24, %v3595_v7  ;;  %v4907_v34 = vrot.slane %v4906_v57, 4  ;;  %v3610_v63 = vshrl.u32 %v9663_v60, 16  ;;  %v3616_v35 = vshll.u32 %v9658_v25, 16  ;;  %v3257_v25 = vld [vmem:[#allocation2 + $0xc0] sm:$0xf] }
 0x256   : > { %v4917_v3 = vrot.slane %v4916_v19, 4  ;;  %v3603_v49 = vor.u32 %v3602_v9, %v3599_v42  ;;  %v3608_v59 = vrot.slane %v3606_v16, 5  ;;  %v4924_v46 = vshrl.u32 %v4854_v56, 16  ;;  %v9757_v57 = vld [vmem:[#allocation2 + $0x34] sm:$0xf] }
 0x257   : > { %7576 = vmatmul.mubr.bf16.gmra.mxu1 %v9697_v8  ;;  %v4912_v61 = vsel %vm8546_vm7, %v4907_v34, %v4911_v26  ;;  %v3612_v62 = vrot.slane %v3610_v63, 4  ;;  %v3618_v60 = vrot.slane %v3616_v35, 5  ;;  %v4927_v28 = vshll.u32 %v4854_v56, 16  ;;  %v7365_v55 = vpop.f32.mrf.mxu1  ;;  %v9764_v34 = vld [vmem:[#allocation2 + $0x38] sm:$0x1] }
 0x258   : > { %7579 = vmatprep.mubr.bf16.mxu1 %v6846_v51  ;;  %v4922_v50 = vsel %vm8546_vm7, %v4917_v3, %v4921_v4  ;;  %v3604_v8 = vrot.slane %v3603_v49, 4  ;;  %v4926_v22 = vrot.slane %v4924_v46, 4  ;;  %v4933_v14 = vshll.u32 %v9735_v15, 16 }
 0x259   : > { %v6922_v32 = vcombine.low %v4912_v61, %v4922_v50  ;;  %v3613_v20 = vor.u32 %v3612_v62, %v3608_v59  ;;  %v4929_v0 = vrot.slane %v4927_v28, 5  ;;  %v4937_v53 = vshrl.u32 %v9735_v15, 16  ;;  %v1909_v46 = vpop.f32.mrf.mxu1  ;;  %v9770_v28 = vld [vmem:[#allocation2 + $0x40] sm:$0xf] }
 0x25a   : > { %v3609_v17 = vsel %vm8546_vm7, %v3604_v8, %v3608_v59  ;;  %v4935_v12 = vrot.slane %v4933_v14, 5  ;;  %v4943_v51 = vshll.u32 %v9738_v48, 16  ;;  %v3621_v30 = vshrl.u32 %v3257_v25, 16  ;;  %v4860_v59 = vld [vmem:[#allocation2 + $0x3c] sm:$0xf] }
 0x25b   : > { %7699 = vmatprep.mubr.bf16.mxu0 %v6922_v32  ;;  %v3614_v43 = vrot.slane %v3613_v20, 4  ;;  %v4930_v36 = vor.u32 %v4929_v0, %v4926_v22  ;;  %v4939_v33 = vrot.slane %v4937_v53, 4  ;;  %v3624_v45 = vshll.u32 %v3257_v25, 16 }
 0x25c   : > { %v4945_v27 = vrot.slane %v4943_v51, 5  ;;  %v3623_v54 = vrot.slane %v3621_v30, 4  ;;  %v3630_v6 = vshll.u32 %v9693_v40, 16  ;;  %v3634_v18 = vshrl.u32 %v9693_v40, 16 }
 0x25d   : > { %v3619_v26 = vsel %vm8546_vm7, %v3614_v43, %v3618_v60  ;;  %v4931_v37 = vrot.slane %v4930_v36, 4  ;;  %v4940_v2 = vor.u32 %v4939_v33, %v4935_v12  ;;  %v3626_v24 = vrot.slane %v3624_v45, 5  ;;  %v9760_v19 = vpop.f32.mrf.mxu0  ;;  %v4863_v43 = vld [vmem:[#allocation2 + $0x48] sm:$0xf]  ;;  %v7366_v36 = vpop.f32.mrf.mxu1 }
 0x25e   : > { %v6848_v4 = vcombine.low %v3609_v17, %v3619_v26  ;;  %v3632_v42 = vrot.slane %v3630_v6, 5  ;;  %v3636_v56 = vrot.slane %v3634_v18, 4  ;;  %v3640_v7 = vshll.u32 %v9687_v38, 16 }
 0x25f   : > { %7580 = vmatmul.mubr.bf16.gmra.mxu1 %v6847_v23  ;;  %v4936_v40 = vsel %vm8546_vm7, %v4931_v37, %v4935_v12  ;;  %v4941_v9 = vrot.slane %v4940_v2, 4  ;;  %v3627_v16 = vor.u32 %v3626_v24, %v3623_v54  ;;  %v4948_v63 = vshrl.u32 %v4857_v1, 16  ;;  %v9772_v14 = vpop.f32.mrf.mxu0  ;;  %v9780_v54 = vld [vmem:[#allocation2 + $0x44] sm:$0x1]  ;;  %v9783_v2 = vld [vmem:[#allocation2 + $0x4c] sm:$0xf] }
 0x260   : > { %7583 = vmatprep.mubr.bf16.mxu1 %v6848_v4  ;;  %v3637_v35 = vor.u32 %v3636_v56, %v3632_v42  ;;  %v3642_v3 = vrot.slane %v3640_v7, 5  ;;  %v4951_v49 = vshll.u32 %v4857_v1, 16  ;;  %v4957_v23 = vshll.u32 %v9757_v57, 16 }
 0x261   : > { %v4946_v38 = vsel %vm8546_vm7, %v4941_v9, %v4945_v27  ;;  %v3628_v61 = vrot.slane %v3627_v16, 4  ;;  %v4950_v62 = vrot.slane %v4948_v63, 4  ;;  %v4961_v60 = vshrl.u32 %v9757_v57, 16  ;;  %v8031_v27 = vld [vmem:[#allocation2 + $0x18] sm:$0xff]   ;;  %v9785_v24 = vpop.f32.mrf.mxu0  ;;  %v9791_v63 = vld [vmem:[#allocation2 + $0x50] sm:$0x1] }
 0x262   : > { %v6923_v25 = vcombine.low %v4936_v40, %v4946_v38  ;;  %v3638_v50 = vrot.slane %v3637_v35, 4  ;;  %v4953_v8 = vrot.slane %v4951_v49, 5  ;;  %v4959_v22 = vrot.slane %v4957_v23, 5 }
 0x263   : > { %v3633_v32 = vsel %vm8546_vm7, %v3628_v61, %v3632_v42  ;;  %v4963_v20 = vrot.slane %v4961_v60, 4  ;;  %v4967_v0 = vshll.u32 %v9764_v34, 16  ;;  %v4972_v53 = vshrl.u32 %v4860_v59, 16  ;;  %v4866_v60 = vld [vmem:[#allocation2 + $0x54] sm:$0xf] }
 0x264   : > { %7700 = vmatmul.mubr.bf16.vlgmr.msra.gmra.mxu0 %v6923_v25  ;;  %v3643_v17 = vsel %vm8546_vm7, %v3638_v50, %v3642_v3  ;;  %v4954_v12 = vor.u32 %v4953_v8, %v4950_v62  ;;  %v4975_v51 = vshll.u32 %v4860_v59, 16  ;;  %v4981_v30 = vshll.u32 %v9770_v28, 16  ;;  %v9793_v3 = vpop.f32.mrf.mxu1  ;;  %v9800_v25 = vpop.f32.mrf.mxu0 }
 0x265   : > { %v6849_v33 = vcombine.low %v3633_v32, %v3643_v17  ;;  %v4964_v45 = vor.u32 %v4963_v20, %v4959_v22  ;;  %v4974_v6 = vrot.slane %v4972_v53, 4  ;;  %v4985_v37 = vshrl.u32 %v9770_v28, 16  ;;  %v9807_v20 = vld [vmem:[#allocation2 + $0x58] sm:$0xf]  ;;  %v8033_v17 = vld [vmem:[#allocation2 + $0x24] sm:$0xff]  }
 0x266   : > { %v4955_v18 = vrot.slane %v4954_v12, 4  ;;  %v4977_v1 = vrot.slane %v4975_v51, 5  ;;  %v4983_v26 = vrot.slane %v4981_v30, 5  ;;  %v4969_v42 = vrot.slane %v4967_v0, 5 }
 0x267   : > { %7584 = vmatmul.mubr.bf16.gmra.mxu1 %v6849_v33  ;;  %v4965_v4 = vrot.slane %v4964_v45, 4  ;;  %v9788_v56 = vadd.f32 %v9671_v44, %v7365_v55  ;;  %v4996_v7 = vshrl.u32 %v4863_v43, 16  ;;  %v4987_v9 = vrot.slane %v4985_v37, 4 }
 0x268   : > { %7651 = vmatprep.mubr.bf16.mxu1 %v8031_v27  ;;  %v4978_v40 = vor.u32 %v4977_v1, %v4974_v6  ;;  %v4991_v16 = vshll.u32 %v9780_v54, 16  ;;  %v4999_v35 = vshll.u32 %v4863_v43, 16  ;;  %v4960_v49 = vsel %vm8546_vm7, %v4955_v18, %v4959_v22  ;;  %v9814_v27 = vld [vmem:[#allocation2 + $0x5c] sm:$0x1]  ;;  %v8034_v1 = vld [vmem:[#allocation2 + $0x30] sm:$0xff]  }
 0x269   : > { %v4970_v23 = vsel %vm8546_vm7, %v4965_v4, %v4969_v42  ;;  %v4998_v59 = vrot.slane %v4996_v7, 4  ;;  %v5005_v44 = vshll.u32 %v9783_v2, 16  ;;  %v4988_v61 = vor.u32 %v4987_v9, %v4983_v26 }
 0x26a   : > { %v6924_v55 = vcombine.low %v4960_v49, %v4970_v23  ;;  %v4979_v38 = vrot.slane %v4978_v40, 4  ;;  %v5001_v62 = vrot.slane %v4999_v35, 5  ;;  %v5009_v8 = vshrl.u32 %v9783_v2, 16 }
 0x26b   : > { %v5007_v50 = vrot.slane %v5005_v44, 5  ;;  %v5015_v32 = vshll.u32 %v9791_v63, 16  ;;  %v9805_v22 = vadd.f32 %v9677_v47, %v1909_v46  ;;  %v4989_v0 = vrot.slane %v4988_v61, 4  ;;  %v8035_v46 = vld [vmem:[#allocation8 + $0x230] sm:$0xff]  }
 0x26c   : > { %7703 = vmatprep.mubr.bf16.mxu0 %v6924_v55  ;;  %v4993_v53 = vrot.slane %v4991_v16, 5  ;;  %v5002_v12 = vor.u32 %v5001_v62, %v4998_v59  ;;  %v9810_v51 = vadd.f32 %v9689_v21, %v7366_v36  ;;  %v7369_v30 = vpop.f32.mrf.mxu1  ;;  %v4984_v43 = vsel %vm8546_vm7, %v4979_v38, %v4983_v26  ;;  %v4869_v21 = vld [vmem:[#allocation2 + $0x60] sm:$0xf]  ;;  %v9822_v16 = vld [vmem:[#allocation2 + $0x64] sm:$0xf] }
 0x26d   : > { %v5011_v33 = vrot.slane %v5009_v8, 4  ;;  %v5017_v45 = vrot.slane %v5015_v32, 5  ;;  %v5020_v47 = vshrl.u32 %v4866_v60, 16  ;;  %v5023_v37 = vshll.u32 %v4866_v60, 16  ;;  %v8038_v8 = vld [vmem:[#allocation8 + $0x228] sm:$0xff]  }
 0x26e   : > { %v4994_v6 = vsel %vm8546_vm7, %v4989_v0, %v4993_v53  ;;  %v5003_v18 = vrot.slane %v5002_v12, 4  ;;  %v5029_v4 = vshll.u32 %v9807_v20, 16  ;;  %v1925_v36 = vpop.f32.mrf.mxu1  ;;  %v9819_v42 = vpop.f32.mrf.mxu0  ;;  %v5033_v9 = vshrl.u32 %v9807_v20, 16 }
 0x26f   : > { %v6925_v7 = vcombine.low %v4984_v43, %v4994_v6  ;;  %7652 = vmatmul.mubr.bf16.vlgmr.msra.gmra.mxu1 %v8033_v17  ;;  %v5012_v26 = vor.u32 %v5011_v33, %v5007_v50  ;;  %v5022_v40 = vrot.slane %v5020_v47, 4  ;;  %v5025_v49 = vrot.slane %v5023_v37, 5 }
 0x270   : > { %v5008_v35 = vsel %vm8546_vm7, %v5003_v18, %v5007_v50  ;;  %7732 = vmatpush3.bf16.msra.mxu1 %v9695_v58  ;;  %7655 = vmatprep.mubr.bf16.mxu1 %v8034_v1  ;;  %v5031_v23 = vrot.slane %v5029_v4, 5  ;;  %v5039_v59 = vshll.u32 %v9814_v27, 16  ;;  %v7370_v44 = vpop.f32.mrf.mxu1  ;;  %v9828_v55 = vpop.f32.mrf.mxu0  ;;  %v5035_v61 = vrot.slane %v5033_v9, 4  ;;  %v9833_v58 = vld [vmem:[#allocation2 + $0x68] sm:$0x1]  ;;  %v8036_v18 = vld [vmem:[#allocation2 + $0x3c] sm:$0xff]  }
 0x271   : > { %7704 = vmatmul.mubr.bf16.gmra.mxu0 %v6925_v7  ;;  %v5013_v38 = vrot.slane %v5012_v26, 4  ;;  %7733 = vmatprep.subr.bf16.mxu1 %v8035_v46  ;;  %v9831_v62 = vadd.f32 %v9720_v39, %v7369_v30  ;;  %v5044_v60 = vshrl.u32 %v4869_v21, 16  ;;  %v5026_v50 = vor.u32 %v5025_v49, %v5022_v40  ;;  %v4872_v4 = vld [vmem:[#allocation2 + $0x6c] sm:$0xf]  ;;  %v8041_v49 = vld [vmem:[#allocation8 + $0x220] sm:$0xff]  }
 0x272   : > { %v5041_v32 = vrot.slane %v5039_v59, 5  ;;  %v5047_v0 = vshll.u32 %v4869_v21, 16  ;;  %v5053_v53 = vshll.u32 %v9822_v16, 16  ;;  %v9836_v17 = vpop.f32.mrf.mxu0  ;;  %v5036_v43 = vor.u32 %v5035_v61, %v5031_v23  ;;  %v1928_v39 = vpop.f32.mrf.mxu1 }
 0x273   : > { %11013 = vst [vmem:[#allocation16_spill] sm:$0xff] %v9831_v62  ;;  %v5018_v12 = vsel %vm8546_vm7, %v5013_v38, %v5017_v45  ;;  %v5046_v33 = vrot.slane %v5044_v60, 4  ;;  %v5057_v47 = vshrl.u32 %v9822_v16, 16  ;;  %v5027_v6 = vrot.slane %v5026_v50, 4  ;;  %v9845_v45 = vld [vmem:[#allocation2 + $0x70] sm:$0xf] }
 0x274   : > { %v6926_v30 = vcombine.low %v5008_v35, %v5018_v12  ;;  %v5049_v1 = vrot.slane %v5047_v0, 5  ;;  %v5055_v37 = vrot.slane %v5053_v53, 5  ;;  %7734 = vmatpush3.bf16.msra.mxu1 %v8035_v46  ;;  %v5037_v21 = vrot.slane %v5036_v43, 4  ;;  %v9847_v9 = vpop.f32.mrf.mxu0  ;;  %v8037_v46 = vld [vmem:[#allocation2 + $0x48] sm:$0xff]   ;;  %v4875_v53 = vld [vmem:[#allocation2 + $0x78] sm:$0xf] }
 0x275   : > { %v5059_v7 = vrot.slane %v5057_v47, 4  ;;  %v5063_v26 = vshll.u32 %v9833_v58, 16  ;;  %v9843_v40 = vadd.f32 %v9726_v5, %v1925_v36  ;;  %7735 = vmatprep.subr.bf16.mxu1 %v8038_v8  ;;  %v5032_v35 = vsel %vm8546_vm7, %v5027_v6, %v5031_v23  ;;  %v9857_v5 = vld [vmem:[#allocation2 + $0x74] sm:$0x1]  ;;  %v8043_v62 = vld [vmem:[#allocation2 + $0x78] sm:$0xff]  }
 0x276   : > { %7707 = vmatprep.mubr.bf16.mxu0 %v6926_v30  ;;  %v5050_v59 = vor.u32 %v5049_v1, %v5046_v33  ;;  %v9852_v38 = vadd.f32 %v9740_v41, %v7370_v44  ;;  %v9855_v61 = vadd.f32 %v9751_v31, %v1928_v39  ;;  %v5042_v36 = vsel %vm8546_vm7, %v5037_v21, %v5041_v32  ;;  %v9862_v33 = vld [vmem:[#allocation2 + $0x7c] sm:$0xf]  ;;  %v8044_v6 = vld [vmem:[#allocation8 + $0x218] sm:$0xff]  }
 0x277   : > { %11014 = vst [vmem:[#allocation17_spill] sm:$0xff] %v9843_v40  ;;  %7656 = vmatmul.mubr.bf16.gmra.mxu1 %v8036_v18  ;;  %v5060_v60 = vor.u32 %v5059_v7, %v5055_v37  ;;  %v5065_v50 = vrot.slane %v5063_v26, 5  ;;  %v5068_v0 = vshrl.u32 %v4872_v4, 16  ;;  %v6927_v12 = vcombine.low %v5032_v35, %v5042_v36 }
 0x278   : > { %11015 = vst [vmem:[#allocation18_spill] sm:$0xff] %v9852_v38  ;;  %11016 = vst [vmem:[#allocation19_spill] sm:$0xff] %v9855_v61  ;;  %v5051_v23 = vrot.slane %v5050_v59, 4  ;;  %7659 = vmatprep.mubr.bf16.mxu1 %v8037_v46  ;;  %v5071_v43 = vshll.u32 %v4872_v4, 16  ;;  %v5077_v41 = vshll.u32 %v9845_v45, 16  ;;  %v7373_v44 = vpop.f32.mrf.mxu1  ;;  %7736 = vmatpush3.bf16.msra.mxu1 %v8038_v8  ;;  %v5081_v39 = vshrl.u32 %v9845_v45, 16 }
 0x279   : > { %v5061_v31 = vrot.slane %v5060_v60, 4  ;;  %v5070_v47 = vrot.slane %v5068_v0, 4  ;;  %v5087_v32 = vshll.u32 %v9857_v5, 16  ;;  %v9866_v30 = vpop.f32.mrf.mxu0  ;;  %7737 = vmatprep.subr.bf16.mxu1 %v8041_v49  ;;  %7708 = vmatmul.mubr.bf16.gmra.mxu0 %v6927_v12  ;;  %v9871_v21 = vadd.f32 %v9760_v19, %v7373_v44  ;;  %v9873_v8 = vld [vmem:[#allocation2 + $0x80] sm:$0x1]  ;;  %v8039_v12 = vld [vmem:[#allocation2 + $0x54] sm:$0xff]  }
 0x27a   : > { %v5056_v18 = vsel %vm8546_vm7, %v5051_v23, %v5055_v37  ;;  %v5073_v1 = vrot.slane %v5071_v43, 5  ;;  %v5079_v4 = vrot.slane %v5077_v41, 5  ;;  %v1941_v7 = vpop.f32.mrf.mxu1  ;;  %v5083_v35 = vrot.slane %v5081_v39, 4  ;;  %v8047_v39 = vld [vmem:[#allocation8 + $0x210] sm:$0xff]  }
 0x27b   : > { %11017 = vst [vmem:[#allocation20_spill] sm:$0xff] %v9871_v21  ;;  %v5066_v26 = vsel %vm8546_vm7, %v5061_v31, %v5065_v50  ;;  %v5089_v59 = vrot.slane %v5087_v32, 5  ;;  %v5092_v46 = vshrl.u32 %v4875_v53, 16  ;;  %v9877_v36 = vpop.f32.mrf.mxu0  ;;  %v5095_v37 = vshll.u32 %v4875_v53, 16  ;;  %v4878_v50 = vld [vmem:[#allocation2 + $0x84] sm:$0xf] }
 0x27c   : > { %v6928_v60 = vcombine.low %v5056_v18, %v5066_v26  ;;  %v5074_v0 = vor.u32 %v5073_v1, %v5070_v47  ;;  %v5101_v23 = vshll.u32 %v9862_v33, 16  ;;  %v7374_v43 = vpop.f32.mrf.mxu1  ;;  %7738 = vmatpush3.bf16.msra.mxu1 %v8041_v49  ;;  %v5084_v19 = vor.u32 %v5083_v35, %v5079_v4  ;;  %v8040_v53 = vld [vmem:[#allocation2 + $0x60] sm:$0xff]   ;;  %v9887_v26 = vld [vmem:[#allocation2 + $0x88] sm:$0xf] }
 0x27d   : > { %v5094_v41 = vrot.slane %v5092_v46, 4  ;;  %v5105_v44 = vshrl.u32 %v9862_v33, 16  ;;  %v5111_v21 = vshll.u32 %v9873_v8, 16  ;;  %v9882_v31 = vpop.f32.mrf.mxu0  ;;  %7739 = vmatprep.subr.bf16.mxu1 %v8044_v6  ;;  %v5097_v47 = vrot.slane %v5095_v37, 5 }
 0x27e   : > { %7711 = vmatprep.mubr.bf16.mxu0 %v6928_v60  ;;  %v5075_v32 = vrot.slane %v5074_v0, 4  ;;  %v5103_v18 = vrot.slane %v5101_v23, 5  ;;  %v9885_v1 = vadd.f32 %v9772_v14, %v1941_v7  ;;  %v1944_v49 = vpop.f32.mrf.mxu1  ;;  %v5085_v35 = vrot.slane %v5084_v19, 4  ;;  %v9899_v7 = vld [vmem:[#allocation2 + $0x8c] sm:$0x1] }
 0x27f   : > { %7660 = vmatmul.mubr.bf16.gmra.mxu1 %v8039_v12  ;;  %v5107_v46 = vrot.slane %v5105_v44, 4  ;;  %v5113_v61 = vrot.slane %v5111_v21, 5  ;;  %v9890_v38 = vadd.f32 %v9785_v24, %v7374_v43  ;;  %v9892_v40 = vpop.f32.mrf.mxu0  ;;  %v5098_v0 = vor.u32 %v5097_v47, %v5094_v41  ;;  %11022 = vst [vmem:[#allocation25_spill] sm:$0xff] %v9899_v7  ;;  %v4881_v43 = vld [vmem:[#allocation2 + $0x90] sm:$0xf] }
 0x280   : > { %11018 = vst [vmem:[#allocation21_spill] sm:$0xff] %v9885_v1  ;;  %11020 = vst [vmem:[#allocation23_spill] sm:$0xff] %v9892_v40  ;;  %v5080_v60 = vsel %vm8546_vm7, %v5075_v32, %v5079_v4  ;;  %7663 = vmatprep.mubr.bf16.mxu1 %v8040_v53  ;;  %v9897_v14 = vadd.f32 %v9800_v25, %v1944_v49  ;;  %v5116_v37 = vshrl.u32 %v4878_v50, 16  ;;  %7740 = vmatpush3.bf16.msra.mxu1 %v8044_v6  ;;  %v8050_v4 = vld [vmem:[#allocation8 + $0x208] sm:$0xff]  }
 0x281   : > { %11019 = vst [vmem:[#allocation22_spill] sm:$0xff] %v9890_v38  ;;  %v5090_v21 = vsel %vm8546_vm7, %v5085_v35, %v5089_v59  ;;  %v5108_v12 = vor.u32 %v5107_v46, %v5103_v18  ;;  %v5119_v24 = vshll.u32 %v4878_v50, 16  ;;  %v5125_v23 = vshll.u32 %v9887_v26, 16  ;;  %v9904_v19 = vpop.f32.mrf.mxu0  ;;  %7741 = vmatprep.subr.bf16.mxu1 %v8047_v39  ;;  %v9908_v59 = vld [vmem:[#allocation2 + $0x94] sm:$0xf] }
 0x282   : > { %11021 = vst [vmem:[#allocation24_spill] sm:$0xff] %v9897_v14  ;;  %v6929_v41 = vcombine.low %v5080_v60, %v5090_v21  ;;  %v5099_v44 = vrot.slane %v5098_v0, 4  ;;  %v5118_v25 = vrot.slane %v5116_v37, 4  ;;  %v5129_v32 = vshrl.u32 %v9887_v26, 16  ;;  %v9914_v60 = vld [vmem:[#allocation2 + $0x98] sm:$0x1] }
 0x283   : > { %v5109_v47 = vrot.slane %v5108_v12, 4  ;;  %v5121_v53 = vrot.slane %v5119_v24, 5  ;;  %v5127_v6 = vrot.slane %v5125_v23, 5  ;;  %v5135_v49 = vshll.u32 %v9899_v7, 16  ;;  %v9910_v50 = vpop.f32.mrf.mxu0  ;;  %11023 = vst [vmem:[#allocation26_spill] sm:$0xff] %v9914_v60  ;;  %v8042_v14 = vld [vmem:[#allocation2 + $0x6c] sm:$0xff]  }
 0x284   : > { %7712 = vmatmul.mubr.bf16.gmra.mxu0 %v6929_v41  ;;  %v5104_v35 = vsel %vm8546_vm7, %v5099_v44, %v5103_v18  ;;  %v5131_v46 = vrot.slane %v5129_v32, 4  ;;  %v7377_v40 = vpop.f32.mrf.mxu1  ;;  %v5140_v0 = vshrl.u32 %v4881_v43, 16  ;;  %v5143_v37 = vshll.u32 %v4881_v43, 16  ;;  %7742 = vmatpush3.bf16.msra.mxu1 %v8047_v39  ;;  %v4884_v41 = vld [vmem:[#allocation2 + $0x9c] sm:$0xf] }
 0x285   : > { %v5114_v21 = vsel %vm8546_vm7, %v5109_v47, %v5113_v61  ;;  %v5122_v12 = vor.u32 %v5121_v53, %v5118_v25  ;;  %v5137_v24 = vrot.slane %v5135_v49, 5  ;;  %v9919_v23 = vadd.f32 %v9819_v42, %v7377_v40  ;;  %v9921_v38 = vpop.f32.mrf.mxu0  ;;  %7743 = vmatprep.subr.bf16.mxu1 %v8050_v4  ;;  %v8053_v39 = vld [vmem:[#allocation8 + $0x200] sm:$0xff]  }
 0x286   : > { %v6930_v18 = vcombine.low %v5104_v35, %v5114_v21  ;;  %v5132_v44 = vor.u32 %v5131_v46, %v5127_v6  ;;  %v5142_v32 = vrot.slane %v5140_v0, 4  ;;  %v5145_v1 = vrot.slane %v5143_v37, 5  ;;  %v1957_v43 = vpop.f32.mrf.mxu1  ;;  %v9931_v46 = vld [vmem:[#allocation2 + $0xa0] sm:$0xf] }
 0x287   : > { %11024 = vst [vmem:[#allocation27_spill] sm:$0xff] %v9919_v23  ;;  %v5123_v7 = vrot.slane %v5122_v12, 4  ;;  %7664 = vmatmul.mubr.bf16.gmra.mxu1 %v8042_v14  ;;  %v5149_v61 = vshll.u32 %v9908_v59, 16  ;;  %v5153_v25 = vshrl.u32 %v9908_v59, 16  ;;  %v5159_v42 = vshll.u32 %v9914_v60, 16  ;;  %v9926_v40 = vpop.f32.mrf.mxu0  ;;  %11027 = vst [vmem:[#allocation30_spill] sm:$0xff] %v9931_v46 }
 0x288   : > { %11025 = vst [vmem:[#allocation28_spill] sm:$0xff] %v9926_v40  ;;  %7715 = vmatprep.mubr.bf16.mxu0 %v6930_v18  ;;  %v5133_v47 = vrot.slane %v5132_v44, 4  ;;  %v5146_v53 = vor.u32 %v5145_v1, %v5142_v32  ;;  %7667 = vmatprep.mubr.bf16.mxu1 %v8043_v62  ;;  %v9929_v49 = vadd.f32 %v9828_v55, %v1957_v43  ;;  %v7378_v35 = vpop.f32.mrf.mxu1  ;;  %v5164_v0 = vshrl.u32 %v4884_v41, 16  ;;  %v9935_v23 = vld [vmem:[#allocation2 + $0xa4] sm:$0x1] }
 0x289   : > { %v5128_v14 = vsel %vm8546_vm7, %v5123_v7, %v5127_v6  ;;  %v5151_v37 = vrot.slane %v5149_v61, 5  ;;  %v5155_v21 = vrot.slane %v5153_v25, 4  ;;  %v5161_v12 = vrot.slane %v5159_v42, 5  ;;  %11028 = vst [vmem:[#allocation31_spill] sm:$0xff] %v9935_v23  ;;  %7744 = vmatpush3.bf16.msra.mxu1 %v8050_v4  ;;  %v4887_v32 = vld [vmem:[#allocation2 + $0xa8] sm:$0xf] }
 0x28a   : > { %11026 = vst [vmem:[#allocation29_spill] sm:$0xff] %v9929_v49  ;;  %v5138_v1 = vsel %vm8546_vm7, %v5133_v47, %v5137_v24  ;;  %v5147_v62 = vrot.slane %v5146_v53, 4  ;;  %v9940_v55 = vadd.f32 %v9836_v17, %v7378_v35  ;;  %v1960_v18 = vpop.f32.mrf.mxu1  ;;  %v5166_v44 = vrot.slane %v5164_v0, 4  ;;  %v9942_v43 = vpop.f32.mrf.mxu0  ;;  %7745 = vmatprep.subr.bf16.mxu1 %v8053_v39  ;;  %v9952_v53 = vld [vmem:[#allocation2 + $0xac] sm:$0xf] }
 0x28b   : > { %v6931_v7 = vcombine.low %v5128_v14, %v5138_v1  ;;  %v5156_v6 = vor.u32 %v5155_v21, %v5151_v37  ;;  %v9945_v61 = vadd.f32 %v9847_v9, %v1960_v18  ;;  %v5167_v25 = vshll.u32 %v4884_v41, 16  ;;  %11031 = vst [vmem:[#allocation34_spill] sm:$0xff] %v9952_v53  ;;  %v8045_v41 = vld [vmem:[#allocation2 + $0x84] sm:$0xff]   ;;  %v9959_v40 = vld [vmem:[#allocation2 + $0xb0] sm:$0x1] }
 0x28c   : > { %11029 = vst [vmem:[#allocation32_spill] sm:$0xff] %v9940_v55  ;;  %v5152_v4 = vsel %vm8546_vm7, %v5147_v62, %v5151_v37  ;;  %v5173_v24 = vshll.u32 %v9931_v46, 16  ;;  %v5177_v17 = vshrl.u32 %v9931_v46, 16  ;;  %v5183_v42 = vshll.u32 %v9935_v23, 16  ;;  %v7381_v47 = vpop.f32.mrf.mxu1  ;;  %v9954_v35 = vpop.f32.mrf.mxu0  ;;  %v8046_v37 = vld [vmem:[#allocation2 + $0x90] sm:$0xff]   ;;  %11033 = vst [vmem:[#allocation36_spill] sm:$0xff] %v9959_v40 }
 0x28d   : > { %11030 = vst [vmem:[#allocation33_spill] sm:$0xff] %v9945_v61  ;;  %7716 = vmatmul.mubr.bf16.gmra.mxu0 %v6931_v7  ;;  %v5157_v0 = vrot.slane %v5156_v6, 4  ;;  %v5169_v14 = vrot.slane %v5167_v25, 5  ;;  %v9957_v9 = vadd.f32 %v9866_v30, %v7381_v47  ;;  %v5188_v21 = vshrl.u32 %v4887_v32, 16  ;;  %7746 = vmatpush3.bf16.msra.mxu1 %v8053_v39 }
 0x28e   : > { %v5175_v1 = vrot.slane %v5173_v24, 5  ;;  %v5179_v62 = vrot.slane %v5177_v17, 4  ;;  %v5185_v18 = vrot.slane %v5183_v42, 5  ;;  %v5191_v61 = vshll.u32 %v4887_v32, 16  ;;  %v1973_v55 = vpop.f32.mrf.mxu1  ;;  %v9961_v49 = vpop.f32.mrf.mxu0  ;;  %v4890_v42 = vld [vmem:[#allocation2 + $0xb4] sm:$0xf] }
 0x28f   : > { %11032 = vst [vmem:[#allocation35_spill] sm:$0xff] %v9957_v9  ;;  %v5162_v7 = vsel %vm8546_vm7, %v5157_v0, %v5161_v12  ;;  %v5170_v6 = vor.u32 %v5169_v14, %v5166_v44  ;;  %7668 = vmatmul.mubr.bf16.gmra.mxu1 %v8045_v41  ;;  %v5190_v30 = vrot.slane %v5188_v21, 4  ;;  %v5197_v25 = vshll.u32 %v9952_v53, 16  ;;  %v9978_v41 = vld [vmem:[#allocation2 + $0xb8] sm:$0xf] }
 0x290   : > { %v6932_v47 = vcombine.low %v5152_v4, %v5162_v7  ;;  %v5180_v9 = vor.u32 %v5179_v62, %v5175_v1  ;;  %v5193_v39 = vrot.slane %v5191_v61, 5  ;;  %v5201_v24 = vshrl.u32 %v9952_v53, 16  ;;  %7671 = vmatprep.mubr.bf16.mxu1 %v8046_v37  ;;  %v7382_v17 = vpop.f32.mrf.mxu1  ;;  %v9967_v32 = vpop.f32.mrf.mxu0  ;;  %v9982_v62 = vld [vmem:[#allocation2 + $0xbc] sm:$0x1] }
 0x291   : > { %11034 = vst [vmem:[#allocation37_spill] sm:$0xff] %v9967_v32  ;;  %v5171_v23 = vrot.slane %v5170_v6, 4  ;;  %v5199_v46 = vrot.slane %v5197_v25, 5  ;;  %v5207_v60 = vshll.u32 %v9959_v40, 16  ;;  %v9971_v12 = vadd.f32 %v9877_v36, %v1973_v55  ;;  %11038 = vst [vmem:[#allocation41_spill] sm:$0xff] %v9982_v62 }
 0x292   : > { %7719 = vmatprep.mubr.bf16.mxu0 %v6932_v47  ;;  %v5181_v44 = vrot.slane %v5180_v9, 4  ;;  %v5194_v0 = vor.u32 %v5193_v39, %v5190_v30  ;;  %v5203_v4 = vrot.slane %v5201_v24, 4  ;;  %v9974_v61 = vadd.f32 %v9882_v31, %v7382_v17  ;;  %v9976_v14 = vpop.f32.mrf.mxu1  ;;  %v4893_v30 = vld [vmem:[#allocation2 + $0xc0] sm:$0xf] }
 0x293   : > { %11035 = vst [vmem:[#allocation38_spill] sm:$0xff] %v9971_v12  ;;  %11037 = vst [vmem:[#allocation40_spill] sm:$0xff] %v9976_v14  ;;  %v5176_v21 = vsel %vm8546_vm7, %v5171_v23, %v5175_v1  ;;  %v5209_v37 = vrot.slane %v5207_v60, 5  ;;  %v5212_v7 = vshrl.u32 %v4890_v42, 16  ;;  %v9984_v36 = vpop.f32.mrf.mxu0  ;;  %v5215_v31 = vshll.u32 %v4890_v42, 16  ;;  %v8048_v23 = vld [vmem:[#allocation2 + $0x9c] sm:$0xff]  }
 0x294   : > { %11036 = vst [vmem:[#allocation39_spill] sm:$0xff] %v9974_v61  ;;  %v5186_v55 = vsel %vm8546_vm7, %v5181_v44, %v5185_v18  ;;  %v5195_v9 = vrot.slane %v5194_v0, 4  ;;  %v5204_v6 = vor.u32 %v5203_v4, %v5199_v46  ;;  %v5221_v39 = vshll.u32 %v9978_v41, 16  ;;  %v9995_v0 = vld [vmem:[#allocation2 + $0xc4] sm:$0xf]  ;;  %v8049_v42 = vld [vmem:[#allocation2 + $0xa8] sm:$0xff]  }
 0x295   : > { %v6933_v25 = vcombine.low %v5176_v21, %v5186_v55  ;;  %v5214_v47 = vrot.slane %v5212_v7, 4  ;;  %v5225_v24 = vshrl.u32 %v9978_v41, 16  ;;  %v9990_v60 = vpop.f32.mrf.mxu0  ;;  %v5217_v32 = vrot.slane %v5215_v31, 5  ;;  %v10000_v55 = vld [vmem:[#allocation2 + $0xc8] sm:$0x1] }
 0x296   : > { %v5200_v1 = vsel %vm8546_vm7, %v5195_v9, %v5199_v46  ;;  %v5205_v17 = vrot.slane %v5204_v6, 4  ;;  %v5231_v18 = vshll.u32 %v9982_v62, 16  ;;  %v7385_v44 = vpop.f32.mrf.mxu1  ;;  %v5223_v4 = vrot.slane %v5221_v39, 5 }
 0x297   : > { %7720 = vmatmul.mubr.bf16.gmra.mxu0 %v6933_v25  ;;  %v5227_v21 = vrot.slane %v5225_v24, 4  ;;  %v9998_v7 = vadd.f32 %v9904_v19, %v7385_v44  ;;  %7672 = vmatmul.mubr.bf16.gmra.mxu1 %v8048_v23  ;;  %v5236_v61 = vshrl.u32 %v4893_v30, 16  ;;  %v10002_v14 = vpop.f32.mrf.mxu0  ;;  %v5218_v9 = vor.u32 %v5217_v32, %v5214_v47 }
 0x298   : > { %v5210_v46 = vsel %vm8546_vm7, %v5205_v17, %v5209_v37  ;;  %v5233_v6 = vrot.slane %v5231_v18, 5  ;;  %v5239_v31 = vshll.u32 %v4893_v30, 16  ;;  %7675 = vmatprep.mubr.bf16.mxu1 %v8049_v42  ;;  %v1989_v12 = vpop.f32.mrf.mxu1  ;;  %v5245_v19 = vshll.u32 %v9995_v0, 16 }
 0x299   : > { %11039 = vst [vmem:[#allocation42_spill] sm:$0xff] %v9998_v7  ;;  %v6934_v25 = vcombine.low %v5200_v1, %v5210_v46  ;;  %v5228_v39 = vor.u32 %v5227_v21, %v5223_v4  ;;  %v5238_v24 = vrot.slane %v5236_v61, 4  ;;  %v10007_v44 = vpop.f32.mrf.mxu0  ;;  %v5219_v23 = vrot.slane %v5218_v9, 4  ;;  %v5605_v1 = vld [vmem:[#allocation2 + $0x18] sm:$0xe] }
 0x29a   : > { %11040 = vst [vmem:[#allocation43_spill] sm:$0xff] %v10007_v44  ;;  %v5241_v7 = vrot.slane %v5239_v31, 5  ;;  %v5249_v40 = vshrl.u32 %v9995_v0, 16  ;;  %v5255_v53 = vshll.u32 %v10000_v55, 16  ;;  %v7386_v62 = vpop.f32.mrf.mxu1  ;;  %v5247_v37 = vrot.slane %v5245_v19, 5 }
 0x29b   : > { %7723 = vmatprep.mubr.bf16.mxu0 %v6934_v25  ;;  %v5229_v32 = vrot.slane %v5228_v39, 4  ;;  %v10012_v30 = vadd.f32 %v9910_v50, %v1989_v12  ;;  %v10015_v47 = vadd.f32 %v9921_v38, %v7386_v62  ;;  %v10017_v61 = vpop.f32.mrf.mxu0  ;;  %v5224_v17 = vsel %vm8546_vm7, %v5219_v23, %v5223_v4  ;;  %v4896_v46 = vld [vmem:[#allocation2 + $0xcc] sm:$0xf]  ;;  %v8051_v50 = vld [vmem:[#allocation2 + $0xb4] sm:$0xff]   ;;  %v10028_v62 = vld [vmem:[#allocation2 + $0xd0] sm:$0xf] }
 0x29c   : > { %v5242_v18 = vor.u32 %v5241_v7, %v5238_v24  ;;  %v5251_v42 = vrot.slane %v5249_v40, 4  ;;  %v10021_v21 = vpop.f32.mrf.mxu1  ;;  %v5257_v31 = vrot.slane %v5255_v53, 5  ;;  %v5671_v38 = vrot.slane %v9713_v29, 5  ;;  %v8052_v7 = vld [vmem:[#allocation2 + $0xc0] sm:$0xff]  }
 0x29d   : > { %v5234_v9 = vsel %vm8546_vm7, %v5229_v32, %v5233_v6  ;;  %v10025_v12 = vpop.f32.mrf.mxu0  ;;  %v6946_v40 = vrot.slane %v5605_v1, 9  ;;  %v5674_v53 = vrot.slane %v9718_v10, 5  ;;  %v5260_v6 = vshrl.u32 %v4896_v46, 16  ;;  %v5606_v44 = vld [vmem:[#allocation2 + $0x24] sm:$0xe] }
 0x29e   : > { %v6935_v25 = vcombine.low %v5224_v17, %v5234_v9  ;;  %v5243_v39 = vrot.slane %v5242_v18, 4  ;;  %v5252_v19 = vor.u32 %v5251_v42, %v5247_v37  ;;  %v7389_v4 = vpop.f32.mrf.mxu1  ;;  %v5673_v23 = vrot.slane %v5671_v38, 4  ;;  %v10038_v42 = vld [vmem:[#allocation2 + $0xd4] sm:$0x1] }
 0x29f   : > { %v10031_v24 = vadd.f32 %v9942_v43, %v7389_v4  ;;  %7676 = vmatmul.mubr.bf16.gmra.mxu1 %v8051_v50  ;;  %v10034_v32 = vpop.f32.mrf.mxu0  ;;  %11042 = vst [vmem:[#allocation45_spill] sm:$0xff] %v10038_v42  ;;  %v5263_v1 = vshll.u32 %v4896_v46, 16  ;;  %v5269_v43 = vshll.u32 %v10028_v62, 16  ;;  %v5262_v50 = vrot.slane %v5260_v6, 4 }
 0x2a0   : > { %7724 = vmatmul.mubr.bf16.gmra.mxu0 %v6935_v25  ;;  %v5248_v29 = vsel %vm8546_vm7, %v5243_v39, %v5247_v37  ;;  %v5253_v17 = vrot.slane %v5252_v19, 4  ;;  %7679 = vmatprep.mubr.bf16.mxu1 %v8052_v7  ;;  %v2005_v18 = vpop.f32.mrf.mxu1  ;;  %v5675_v10 = vsel %vm9061_vm14, %v5673_v23, %v5674_v53  ;;  %v5273_v25 = vshrl.u32 %v10028_v62, 16  ;;  %v8054_v23 = vld [vmem:[#allocation2 + $0xcc] sm:$0xff]  }
 0x2a1   : > { %11041 = vst [vmem:[#allocation44_spill] sm:$0xff] %v10031_v24  ;;  %v10042_v9 = vadd.f32 %v9954_v35, %v2005_v18  ;;  %v10047_v4 = vpop.f32.mrf.mxu0  ;;  %v5672_v46 = vsel %vm9061_vm14, %v6946_v40, %v5671_v38  ;;  %v5265_v19 = vrot.slane %v5263_v1, 5  ;;  %v5271_v7 = vrot.slane %v5269_v43, 5 }
 0x2a2   : > { %11044 = vst [vmem:[#allocation47_spill] sm:$0xff] %v10047_v4  ;;  %v5258_v37 = vsel %vm8546_vm7, %v5253_v17, %v5257_v31  ;;  %v7390_v39 = vpop.f32.mrf.mxu1  ;;  %v5275_v53 = vrot.slane %v5273_v25, 4  ;;  %v5279_v6 = vshll.u32 %v10038_v42, 16  ;;  %v5607_v4 = vld [vmem:[#allocation2 + $0x30] sm:$0xe]  ;;  %v10061_v31 = vadd.f32 %v9701_v11, %v9793_v3 }
 0x2a3   : > { %11043 = vst [vmem:[#allocation46_spill] sm:$0xff] %v10042_v9  ;;  %v6936_v35 = vcombine.low %v5248_v29, %v5258_v37  ;;  %v10054_v18 = vadd.f32 %v9961_v49, %v7390_v39  ;;  %v10057_v9 = vpop.f32.mrf.mxu0  ;;  %v6962_v38 = vcombine.low %v5672_v46, %v5675_v10  ;;  %v5266_v40 = vor.u32 %v5265_v19, %v5262_v50  ;;  %v5608_v39 = vld [vmem:[#allocation2 + $0x3c] sm:$0xe] }
 0x2a4   : > { %v10063_v17 = vpop.f32.mrf.mxu1  ;;  %v5678_v29 = vrot.slane %v9735_v15, 5  ;;  %v5276_v49 = vor.u32 %v5275_v53, %v5271_v7  ;;  %v5281_v1 = vrot.slane %v5279_v6, 5  ;;  %v6947_v43 = vrot.slane %v5606_v44, 9 }
 0x2a5   : > { %11045 = vst [vmem:[#allocation48_spill] sm:$0xff] %v10054_v18  ;;  %7727 = vmatprep.mubr.bf16.mxu0 %v6936_v35  ;;  %v5681_v25 = vrot.slane %v9738_v48, 5  ;;  %v10067_v37 = vpop.f32.mrf.mxu0  ;;  %v5267_v24 = vrot.slane %v5266_v40, 4  ;;  %v6948_v11 = vrot.slane %v5607_v4, 9  ;;  %v5685_v3 = vrot.slane %v9757_v57, 5 }
 0x2a6   : > { %v7393_v18 = vpop.f32.mrf.mxu1  ;;  %v5680_v42 = vrot.slane %v5678_v29, 4  ;;  %v5277_v15 = vrot.slane %v5276_v49, 4  ;;  %v5679_v50 = vsel %vm9061_vm14, %v6947_v43, %v5678_v29  ;;  %v5688_v44 = vrot.slane %v9764_v34, 5  ;;  %v5609_v35 = vld [vmem:[#allocation2 + $0x48] sm:$0xe] }
 0x2a7   : > { %v10071_v10 = vadd.f32 %v9984_v36, %v7393_v18  ;;  %7680 = vmatmul.mubr.bf16.gmra.mxu1 %v8054_v23  ;;  %v10076_v48 = vpop.f32.mrf.mxu0  ;;  %v5272_v19 = vsel %vm8546_vm7, %v5267_v24, %v5271_v7  ;;  %v5687_v4 = vrot.slane %v5685_v3, 4  ;;  %v6949_v36 = vrot.slane %v5608_v39, 9  ;;  %v5610_v24 = vld [vmem:[#allocation2 + $0x54] sm:$0xe]  ;;  %v5611_v29 = vld [vmem:[#allocation2 + $0x60] sm:$0xe] }
 0x2a8   : > { %7747 = vmatprep.mubr.bf16.mxu1 %v6962_v38  ;;  %v2021_v46 = vpop.f32.mrf.mxu1  ;;  %v5682_v57 = vsel %vm9061_vm14, %v5680_v42, %v5681_v25  ;;  %v5282_v23 = vsel %vm8546_vm7, %v5277_v15, %v5281_v1  ;;  %v5686_v34 = vsel %vm9061_vm14, %v6948_v11, %v5685_v3  ;;  %v5692_v6 = vrot.slane %v9770_v28, 5 }
 0x2a9   : > { %v10083_v18 = vadd.f32 %v9990_v60, %v2021_v46  ;;  %v10089_v53 = vpop.f32.mrf.mxu0  ;;  %v6937_v7 = vcombine.low %v5272_v19, %v5282_v23  ;;  %v6963_v42 = vcombine.low %v5679_v50, %v5682_v57  ;;  %v5689_v40 = vsel %vm9061_vm14, %v5687_v4, %v5688_v44  ;;  %v5612_v19 = vld [vmem:[#allocation2 + $0x6c] sm:$0xe] }
 0x2aa   : > { %v7394_v38 = vpop.f32.mrf.mxu1  ;;  %v5695_v60 = vrot.slane %v9780_v54, 5  ;;  %v6964_v49 = vcombine.low %v5686_v34, %v5689_v40  ;;  %v5694_v43 = vrot.slane %v5692_v6, 4  ;;  %v6950_v25 = vrot.slane %v5609_v35, 9 }
 0x2ab   : > { %v10096_v13 = vadd.f32 %v10002_v14, %v7394_v38  ;;  %v10098_v1 = vpop.f32.mrf.mxu0  ;;  %7728 = vmatmul.mubr.bf16.gmra.mxu0 %v6937_v7  ;;  %v5693_v39 = vsel %vm9061_vm14, %v6949_v36, %v5692_v6  ;;  %v5699_v11 = vrot.slane %v9783_v2, 5  ;;  %v6951_v3 = vrot.slane %v5610_v24, 9 }
 0x2ac   : > { %v10100_v28 = vpop.f32.mrf.mxu1  ;;  %v5706_v54 = vrot.slane %v9807_v20, 5  ;;  %v5696_v14 = vsel %vm9061_vm14, %v5694_v43, %v5695_v60  ;;  %v5702_v50 = vrot.slane %v9791_v63, 5  ;;  %v5709_v44 = vrot.slane %v9814_v27, 5 }
 0x2ad   : > { %v10108_v15 = vpop.f32.mrf.mxu0  ;;  %v6952_v46 = vrot.slane %v5611_v29, 9  ;;  %v6965_v4 = vcombine.low %v5693_v39, %v5696_v14  ;;  %v5700_v36 = vsel %vm9061_vm14, %v6950_v25, %v5699_v11  ;;  %v5701_v2 = vrot.slane %v5699_v11, 4 }
 0x2ae   : > { %v7461_v57 = vpop.f32.mrf.mxu1  ;;  %v10116_v20 = vsel %vm9061_vm14, %v6951_v3, %v5706_v54  ;;  %v5708_v63 = vrot.slane %v5706_v54, 4  ;;  %v5713_v27 = vrot.slane %v9822_v16, 5  ;;  %v5716_v34 = vrot.slane %v9833_v58, 5 }
 0x2af   : > { %v10119_v35 = vadd.f32 %v7461_v57, %v9788_v56  ;;  %7748 = vmatmul.mubr.bf16.vlgmr.msra.gmra.mxu1 %v6963_v42  ;;  %v10121_v23 = vpop.f32.mrf.mxu0  ;;  %v5703_v24 = vsel %vm9061_vm14, %v5701_v2, %v5702_v50  ;;  %v6953_v7 = vrot.slane %v5612_v19, 9  ;;  %v5720_v38 = vrot.slane %v9845_v45, 5  ;;  %v5613_v56 = vld [vmem:[#allocation2 + $0x78] sm:$0xe] }
 0x2b0   : > { %7751 = vmatprep.mubr.bf16.mxu1 %v6964_v49  ;;  %v2667_v6 = vpop.f32.mrf.mxu1  ;;  %v5723_v40 = vrot.slane %v9857_v5, 5  ;;  %v6966_v60 = vcombine.low %v5700_v36, %v5703_v24  ;;  %v10136_v16 = vsel %vm9061_vm14, %v5708_v63, %v5709_v44  ;;  %v10140_v58 = vsel %vm9061_vm14, %v6952_v46, %v5713_v27  ;;  %v5614_v49 = vld [vmem:[#allocation2 + $0x84] sm:$0xe] }
 0x2b1   : > { %v10130_v42 = vadd.f32 %v2667_v6, %v9805_v22  ;;  %v10132_v29 = vpop.f32.mrf.mxu0  ;;  %v6967_v45 = vcombine.low %v10116_v20, %v10136_v16  ;;  %v5715_v5 = vrot.slane %v5713_v27, 4  ;;  %v10146_v22 = vsel %vm9061_vm14, %v6953_v7, %v5720_v38  ;;  %v5616_v27 = vld [vmem:[#allocation2 + $0x9c] sm:$0xe]  ;;  %v11046_v24 = vld [vmem:[#allocation25_spill] sm:$0xff] }
 0x2b2   : > { %v7462_v43 = vpop.f32.mrf.mxu1  ;;  %v5722_v25 = vrot.slane %v5720_v38, 4  ;;  %v6954_v3 = vrot.slane %v5613_v56, 9  ;;  %v5727_v54 = vrot.slane %v9862_v33, 5  ;;  %v5730_v14 = vrot.slane %v9873_v8, 5  ;;  %v11047_v38 = vld [vmem:[#allocation16_spill] sm:$0xff] }
 0x2b3   : > { %v10149_v39 = vadd.f32 %v7462_v43, %v9810_v51  ;;  %v10151_v11 = vpop.f32.mrf.mxu0  ;;  %v5717_v44 = vsel %vm9061_vm14, %v5715_v5, %v5716_v34  ;;  %v6955_v19 = vrot.slane %v5614_v49, 9  ;;  %v5734_v57 = vrot.slane %v9887_v26, 5  ;;  %v5615_v51 = vld [vmem:[#allocation2 + $0x90] sm:$0xe]  ;;  %v11048_v43 = vld [vmem:[#allocation26_spill] sm:$0xff] }
 0x2b4   : > { %v2670_v50 = vpop.f32.mrf.mxu1  ;;  %v10159_v46 = vsel %vm9061_vm14, %v5722_v25, %v5723_v40  ;;  %v6968_v33 = vcombine.low %v10140_v58, %v5717_v44  ;;  %v10172_v63 = vsel %vm9061_vm14, %v6954_v3, %v5727_v54  ;;  %v5729_v6 = vrot.slane %v5727_v54, 4  ;;  %v11049_v44 = vld [vmem:[#allocation30_spill] sm:$0xff] }
 0x2b5   : > { %v10163_v36 = vadd.f32 %v2670_v50, %v10061_v31  ;;  %v10165_v2 = vpop.f32.mrf.mxu0  ;;  %v6969_v8 = vcombine.low %v10146_v22, %v10159_v46  ;;  %v10176_v26 = vsel %vm9061_vm14, %v6955_v19, %v5734_v57  ;;  %v5736_v31 = vrot.slane %v5734_v57, 4  ;;  %v5617_v46 = vld [vmem:[#allocation2 + $0xa8] sm:$0xe] }
 0x2b6   : > { %v7465_v34 = vpop.f32.mrf.mxu1  ;;  %v5737_v7 = vrot.slane %v11046_v24, 5  ;;  %v6956_v58 = vrot.slane %v5615_v51, 9  ;;  %v5741_v49 = vrot.slane %v9908_v59, 5  ;;  %v5744_v5 = vrot.slane %v11048_v43, 5  ;;  %v11053_v43 = vld [vmem:[#allocation18_spill] sm:$0xff] }
 0x2b7   : > { %v2800_v40 = vadd.f32 %v7465_v34, %v11047_v38  ;;  %7752 = vmatmul.mubr.bf16.gmra.mxu1 %v6965_v4  ;;  %v10180_v56 = vpop.f32.mrf.mxu0  ;;  %v5731_v3 = vsel %vm9061_vm14, %v5729_v6, %v5730_v14  ;;  %v6957_v50 = vrot.slane %v5616_v27, 9  ;;  %v5748_v19 = vrot.slane %v11049_v44, 5  ;;  %v11050_v4 = vld [vmem:[#allocation17_spill] sm:$0xff]  ;;  %v5618_v14 = vld [vmem:[#allocation2 + $0xb4] sm:$0xe] }
 0x2b8   : > { %7755 = vmatprep.mubr.bf16.mxu1 %v6966_v60  ;;  %v2683_v25 = vpop.f32.mrf.mxu1  ;;  %v10188_v54 = vsel %vm9061_vm14, %v5736_v31, %v5737_v7  ;;  %v6970_v59 = vcombine.low %v10172_v63, %v5731_v3  ;;  %v10199_v51 = vsel %vm9061_vm14, %v6956_v58, %v5741_v49  ;;  %v5743_v31 = vrot.slane %v5741_v49, 4  ;;  %v11052_v7 = vld [vmem:[#allocation31_spill] sm:$0xff] }
 0x2b9   : > { %v2798_v57 = vadd.f32 %v2683_v25, %v11050_v4  ;;  %v10192_v34 = vpop.f32.mrf.mxu0  ;;  %v10203_v27 = vsel %vm9061_vm14, %v6957_v50, %v5748_v19  ;;  %v5750_v24 = vrot.slane %v5748_v19, 4  ;;  %v5751_v38 = vrot.slane %v11052_v7, 5  ;;  %v11054_v4 = vld [vmem:[#allocation19_spill] sm:$0xff] }
 0x2ba   : > { %11051 = vst [vmem:[#allocation25_spill] sm:$0xff] %v10192_v34  ;;  %v7466_v6 = vpop.f32.mrf.mxu1  ;;  %v10211_v44 = vsel %vm9061_vm14, %v5743_v31, %v5744_v5  ;;  %v6959_v49 = vrot.slane %v5618_v14, 9  ;;  %v5762_v50 = vrot.slane %v9978_v41, 5  ;;  %v11055_v14 = vld [vmem:[#allocation41_spill] sm:$0xff]  ;;  %v11056_v41 = vld [vmem:[#allocation20_spill] sm:$0xff]  ;;  %v10252_v16 = vadd.f32 %v10017_v61, %v10119_v35 }
 0x2bb   : > { %v2801_v25 = vadd.f32 %v7466_v6, %v11053_v43  ;;  %v10207_v63 = vpop.f32.mrf.mxu0  ;;  %v10215_v58 = vsel %vm9061_vm14, %v5750_v24, %v5751_v38  ;;  %v6972_v6 = vcombine.low %v10199_v51, %v10211_v44  ;;  %v5765_v38 = vrot.slane %v11055_v14, 5  ;;  %v11058_v14 = vld [vmem:[#allocation22_spill] sm:$0xff] }
 0x2bc   : > { %v2686_v3 = vpop.f32.mrf.mxu1  ;;  %v10229_v31 = vsel %vm9061_vm14, %v6959_v49, %v5762_v50  ;;  %v5764_v24 = vrot.slane %v5762_v50, 4  ;;  %v10271_v61 = vadd.f32 %v10067_v37, %v2798_v57 }
 0x2bd   : > { %v10219_v19 = vadd.f32 %v2686_v3, %v11054_v4  ;;  %v10221_v7 = vpop.f32.mrf.mxu0  ;;  %v11057_v4 = vld [vmem:[#allocation21_spill] sm:$0xff] }
 0x2be   : > { %v7469_v5 = vpop.f32.mrf.mxu1  ;;  %v10240_v44 = vsel %vm9061_vm14, %v5764_v24, %v5765_v38  ;;  %v10263_v38 = vadd.f32 %v10057_v9, %v2800_v40  ;;  %v11060_v9 = vld [vmem:[#allocation27_spill] sm:$0xff] }
 0x2bf   : > { %v2804_v60 = vadd.f32 %v7469_v5, %v11056_v41  ;;  %7756 = vmatmul.mubr.bf16.gmra.mxu1 %v6967_v45  ;;  %v10236_v3 = vpop.f32.mrf.mxu0  ;;  %v10256_v45 = vadd.f32 %v10025_v12, %v10130_v42  ;;  %v10274_v12 = vadd.f32 %v10076_v48, %v2801_v25 }
 0x2c0   : > { %7759 = vmatprep.mubr.bf16.mxu1 %v6968_v33  ;;  %v2699_v51 = vpop.f32.mrf.mxu1  ;;  %v10260_v33 = vadd.f32 %v10034_v32, %v10149_v39 }
 0x2c1   : > { %v2802_v49 = vadd.f32 %v2699_v51, %v11057_v4  ;;  %v10243_v43 = vpop.f32.mrf.mxu0  ;;  %v8055_v51 = vld [vmem:[#allocation9 + $0x38] sm:$0xff]   ;;  %v11059_v4 = vld [vmem:[#allocation24_spill] sm:$0xff]  ;;  %v10277_v32 = vadd.f32 %v10098_v1, %v2804_v60  ;;  %v11061_v1 = vld [vmem:[#allocation29_spill] sm:$0xff] }
 0x2c2   : > { %v7470_v5 = vpop.f32.mrf.mxu1  ;;  %7779 = vmatprep.subr.bf16.mxu0 %v8055_v51 }
 0x2c3   : > { %v2805_v41 = vadd.f32 %v7470_v5, %v11058_v14  ;;  %v10248_v20 = vpop.f32.mrf.mxu0  ;;  %v10280_v42 = vadd.f32 %v10108_v15, %v2802_v49  ;;  %7780 = vmatpush3.bf16.msra.mxu0 %v8055_v51  ;;  %v11062_v49 = vld [vmem:[#allocation32_spill] sm:$0xff] }
 0x2c4   : > { %v2702_v24 = vpop.f32.mrf.mxu1 }
 0x2c5   : > { %v10266_v5 = vadd.f32 %v2702_v24, %v11059_v4  ;;  %v10268_v14 = vpop.f32.mrf.mxu0  ;;  %v10289_v37 = vadd.f32 %v10121_v23, %v2805_v41  ;;  %v11064_v41 = vld [vmem:[#allocation33_spill] sm:$0xff] }
 0x2c6   : > { %v7473_v35 = vpop.f32.mrf.mxu1 }
 0x2c7   : > { %v2808_v39 = vadd.f32 %v7473_v35, %v11060_v9  ;;  %7760 = vmatmul.mubr.bf16.gmra.mxu1 %v6969_v8  ;;  %v10286_v40 = vpop.f32.mrf.mxu0  ;;  %v11063_v8 = vld [vmem:[#allocation34_spill] sm:$0xff] }
 0x2c8   : > { %7763 = vmatprep.mubr.bf16.mxu1 %v6970_v59  ;;  %v2715_v48 = vpop.f32.mrf.mxu1  ;;  %v5755_v4 = vrot.slane %v11063_v8, 5  ;;  %v8056_v9 = vld [vmem:[#allocation9 + $0x30] sm:$0xff]  }
 0x2c9   : > { %v2806_v57 = vadd.f32 %v2715_v48, %v11061_v1  ;;  %v10292_v60 = vpop.f32.mrf.mxu0  ;;  %v10295_v15 = vadd.f32 %v10151_v11, %v2808_v39  ;;  %v6958_v48 = vrot.slane %v5617_v46, 9  ;;  %v11065_v1 = vld [vmem:[#allocation35_spill] sm:$0xff]  ;;  %7781 = vmatprep.subr.bf16.mxu0 %v8056_v9 }
 0x2ca   : > { %v7474_v25 = vpop.f32.mrf.mxu1  ;;  %7782 = vmatpush3.bf16.msra.mxu0 %v8056_v9 }
 0x2cb   : > { %v2809_v24 = vadd.f32 %v7474_v25, %v11062_v49  ;;  %v10298_v22 = vpop.f32.mrf.mxu0  ;;  %v10302_v23 = vadd.f32 %v10165_v2, %v2806_v57  ;;  %v11066_v49 = vcombine.low %v10176_v26, %v10188_v54  ;;  %v5757_v2 = vrot.slane %v5755_v4, 4  ;;  %v11067_v57 = vld [vmem:[#allocation36_spill] sm:$0xff] }
 0x2cc   : > { %v2718_v59 = vpop.f32.mrf.mxu1  ;;  %v5758_v8 = vrot.slane %v11067_v57, 5  ;;  %v11072_v57 = vld [vmem:[#allocation39_spill] sm:$0xff] }
 0x2cd   : > { %v10305_v51 = vadd.f32 %v2718_v59, %v11064_v41  ;;  %v10307_v35 = vpop.f32.mrf.mxu0  ;;  %v10310_v11 = vadd.f32 %v10180_v56, %v2809_v24  ;;  %v11068_v56 = vld [vmem:[#allocation38_spill] sm:$0xff] }
 0x2ce   : > { %v7477_v39 = vpop.f32.mrf.mxu1 }
 0x2cf   : > { %v2812_v25 = vadd.f32 %v7477_v39, %v11065_v1  ;;  %7764 = vmatmul.mubr.bf16.gmra.mxu1 %v11066_v49  ;;  %v10317_v50 = vpop.f32.mrf.mxu0  ;;  %v11070_v39 = vld [vmem:[#allocation40_spill] sm:$0xff]  ;;  %v11071_v1 = vld [vmem:[#allocation23_spill] sm:$0xff]  ;;  %v5756_v49 = vsel %vm9061_vm14, %v6958_v48, %v5755_v4 }
 0x2d0   : > { %7767 = vmatprep.mubr.bf16.mxu1 %v6972_v6  ;;  %v2731_v59 = vpop.f32.mrf.mxu1  ;;  %v2282_v26 = vadd.f32 %v11071_v1, %v11070_v39  ;;  %v5759_v6 = vsel %vm9061_vm14, %v5757_v2, %v5758_v8  ;;  %v11074_v8 = vcombine.low %v10203_v27, %v10215_v58 }
 0x2d1   : > { %v2810_v24 = vadd.f32 %v2731_v59, %v11068_v56  ;;  %v10320_v41 = vpop.f32.mrf.mxu0  ;;  %v10323_v46 = vadd.f32 %v10207_v63, %v2812_v25  ;;  %v5619_v59 = vld [vmem:[#allocation2 + $0xc0] sm:$0xe]  ;;  %v5769_v56 = vrot.slane %v9995_v0, 5  ;;  %v6974_v48 = vcombine.low %v5756_v49, %v5759_v6 }
 0x2d2   : > { %v7478_v54 = vpop.f32.mrf.mxu1 }
 0x2d3   : > { %11069 = vst [vmem:[#allocation16_spill] sm:$0xff] %v10323_v46  ;;  %v2813_v34 = vadd.f32 %v7478_v54, %v11072_v57  ;;  %v10332_v9 = vpop.f32.mrf.mxu0  ;;  %v10336_v63 = vadd.f32 %v10221_v7, %v2810_v24  ;;  %v6960_v54 = vrot.slane %v5619_v59, 9  ;;  %v11073_v57 = vld [vmem:[#allocation42_spill] sm:$0xff]  ;;  %v5771_v0 = vrot.slane %v5769_v56, 4 }
 0x2d4   : > { %v2734_v25 = vpop.f32.mrf.mxu1  ;;  %v5772_v7 = vrot.slane %v10000_v55, 5  ;;  %v5620_v59 = vld [vmem:[#allocation2 + $0xcc] sm:$0xe]  ;;  %v11075_v55 = vld [vmem:[#allocation28_spill] sm:$0xff] }
 0x2d5   : > { %v2811_v46 = vadd.f32 %v2734_v25, %v2282_v26  ;;  %v10338_v39 = vpop.f32.mrf.mxu0  ;;  %v10341_v1 = vadd.f32 %v10236_v3, %v2813_v34  ;;  %v8057_v25 = vld [vmem:[#allocation9 + $0x28] sm:$0xff]   ;;  %v5776_v3 = vrot.slane %v10028_v62, 5  ;;  %v2298_v58 = vadd.f32 %v11075_v55, %v10021_v21  ;;  %v11077_v55 = vld [vmem:[#allocation44_spill] sm:$0xff] }
 0x2d6   : > { %v7481_v4 = vpop.f32.mrf.mxu1  ;;  %7783 = vmatprep.subr.bf16.mxu0 %v8057_v25 }
 0x2d7   : > { %v2816_v2 = vadd.f32 %v7481_v4, %v11073_v57  ;;  %7768 = vmatmul.mubr.bf16.gmra.mxu1 %v11074_v8  ;;  %v10348_v24 = vpop.f32.mrf.mxu0  ;;  %v10351_v26 = vadd.f32 %v10243_v43, %v2811_v46  ;;  %7784 = vmatpush3.bf16.msra.mxu0 %v8057_v25  ;;  %v5770_v46 = vsel %vm9061_vm14, %v6960_v54, %v5769_v56  ;;  %v6961_v57 = vrot.slane %v5620_v59, 9  ;;  %v11076_v8 = vld [vmem:[#allocation45_spill] sm:$0xff] }
 0x2d8   : > { %7771 = vmatprep.mubr.bf16.mxu1 %v6974_v48  ;;  %v2747_v34 = vpop.f32.mrf.mxu1  ;;  %v5779_v21 = vrot.slane %v11076_v8, 5  ;;  %v11081_v8 = vld [vmem:[#allocation48_spill] sm:$0xff] }
 0x2d9   : > { %v2814_v49 = vadd.f32 %v2747_v34, %v10012_v30  ;;  %v10355_v6 = vpop.f32.mrf.mxu0  ;;  %v10358_v27 = vadd.f32 %v10248_v20, %v2816_v2  ;;  %v5773_v30 = vsel %vm9061_vm14, %v5771_v0, %v5772_v7  ;;  %v5778_v2 = vrot.slane %v5776_v3, 4 }
 0x2da   : > { %v7482_v4 = vpop.f32.mrf.mxu1  ;;  %v6976_v54 = vcombine.low %v5770_v46, %v5773_v30  ;;  %v11078_v7 = vcombine.low %v10229_v31, %v10240_v44 }
 0x2db   : > { %v2817_v43 = vadd.f32 %v7482_v4, %v10015_v47  ;;  %v10367_v62 = vpop.f32.mrf.mxu0  ;;  %v10370_v48 = vadd.f32 %v10268_v14, %v2814_v49  ;;  %v8058_v4 = vld [vmem:[#allocation9 + $0x20] sm:$0xff]  }
 0x2dc   : > { %v2750_v20 = vpop.f32.mrf.mxu1  ;;  %7785 = vmatprep.subr.bf16.mxu0 %v8058_v4 }
 0x2dd   : > { %v2815_v34 = vadd.f32 %v2750_v20, %v2298_v58  ;;  %v10373_v25 = vpop.f32.mrf.mxu0  ;;  %v10376_v47 = vadd.f32 %v10286_v40, %v2817_v43  ;;  %v5777_v58 = vsel %vm9061_vm14, %v6961_v57, %v5776_v3  ;;  %v5780_v40 = vsel %vm9061_vm14, %v5778_v2, %v5779_v21  ;;  %v11079_v43 = vld [vmem:[#allocation46_spill] sm:$0xff]  ;;  %7786 = vmatpush3.bf16.msra.mxu0 %v8058_v4 }
 0x2df   : > { %v7485_v56 = vpop.f32.mrf.mxu1  ;;  %7772 = vmatmul.mubr.bf16.gmra.mxu1 %v11078_v7  ;;  %v10382_v14 = vpop.f32.mrf.mxu0  ;;  %v10385_v49 = vadd.f32 %v10292_v60, %v2815_v34  ;;  %v11080_v60 = vld [vmem:[#allocation37_spill] sm:$0xff] }
 0x2e0   : > { %v2820_v0 = vadd.f32 %v7485_v56, %v11077_v55  ;;  %7775 = vmatprep.mubr.bf16.mxu1 %v6976_v54  ;;  %v2314_v20 = vadd.f32 %v11080_v60, %v10063_v17  ;;  %v6977_v56 = vcombine.low %v5777_v58, %v5780_v40  ;;  %v8059_v55 = vld [vmem:[#allocation9 + $0x18] sm:$0xff]  }
 0x2e1   : > { %v2763_v59 = vpop.f32.mrf.mxu1  ;;  %v10392_v30 = vpop.f32.mrf.mxu0  ;;  %7787 = vmatprep.subr.bf16.mxu0 %v8059_v55 }
 0x2e2   : > { %v2818_v46 = vadd.f32 %v2763_v59, %v11079_v43  ;;  %v10395_v31 = vadd.f32 %v10298_v22, %v2820_v0  ;;  %v8060_v0 = vld [vmem:[#allocation9 + $0x10] sm:$0xff]   ;;  %7788 = vmatpush3.bf16.msra.mxu0 %v8059_v55 }
 0x2e3   : > { %v7486_v44 = vpop.f32.mrf.mxu1  ;;  %v7609_v3 = vpop.f32.mrf.mxu0  ;;  %7789 = vmatprep.subr.bf16.mxu0 %v8060_v0 }
 0x2e4   : > { %v2821_v34 = vadd.f32 %v7486_v44, %v11081_v8  ;;  %v10401_v52 = vadd.f32 %v10307_v35, %v2818_v46 }
 0x2e5   : > { %v2766_v57 = vpop.f32.mrf.mxu1  ;;  %v4321_v21 = vpop.f32.mrf.mxu0 }
 0x2e6   : > { %v2819_v2 = vadd.f32 %v2766_v57, %v2314_v20  ;;  %v10404_v54 = vadd.f32 %v10317_v50, %v2821_v34  ;;  %7790 = vmatpush3.bf16.msra.mxu0 %v8060_v0 }
 0x2e7   : > { %v7489_v22 = vpop.f32.mrf.mxu1  ;;  %7776 = vmatmul.mubr.bf16.gmra.mxu1 %v6977_v56  ;;  %v10407_v17 = vpop.f32.mrf.mxu0 }
 0x2e8   : > { %v2824_v7 = vadd.f32 %v7489_v22, %v10071_v10  ;;  %v10410_v59 = vadd.f32 %v10320_v41, %v2819_v2  ;;  %v11082_v10 = vld [vmem:[#allocation43_spill] sm:$0xff]  ;;  %v8061_v22 = vld [vmem:[#allocation9 + $0x8] sm:$0xff]  }
 0x2e9   : > { %v2779_v35 = vpop.f32.mrf.mxu1  ;;  %v10413_v40 = vpop.f32.mrf.mxu0  ;;  %v2330_v43 = vadd.f32 %v11082_v10, %v10100_v28  ;;  %7791 = vmatprep.subr.bf16.mxu0 %v8061_v22 }
 0x2ea   : > { %v2822_v58 = vadd.f32 %v2779_v35, %v10083_v18  ;;  %v10416_v50 = vadd.f32 %v10332_v9, %v2824_v7  ;;  %7792 = vmatpush3.bf16.msra.mxu0 %v8061_v22 }
 0x2eb   : > { %v7490_v4 = vpop.f32.mrf.mxu1  ;;  %v7613_v44 = vpop.f32.mrf.mxu0 }
 0x2ec   : > { %v2825_v46 = vadd.f32 %v7490_v4, %v10096_v13  ;;  %v10422_v41 = vadd.f32 %v10338_v39, %v2822_v58 }
 0x2ed   : > { %v2782_v60 = vpop.f32.mrf.mxu1  ;;  %v4337_v18 = vpop.f32.mrf.mxu0 }
 0x2ee   : > { %v2823_v20 = vadd.f32 %v2782_v60, %v2330_v43  ;;  %v10425_v8 = vadd.f32 %v10348_v24, %v2825_v46  ;;  %v8062_v60 = vld [vmem:[#allocation9] sm:$0xff]  }
 0x2ef   : > { %v7557_v9 = vpop.f32.mrf.mxu1  ;;  %v10428_v56 = vpop.f32.mrf.mxu0  ;;  %7793 = vmatprep.subr.bf16.mxu0 %v8062_v60 }
 0x2f0   : > { %v3936_v34 = vadd.f32 %v7557_v9, %v10252_v16  ;;  %v10431_v28 = vadd.f32 %v10355_v6, %v2823_v20  ;;  %v11083_v16 = vld [vmem:[#allocation47_spill] sm:$0xff]  ;;  %v3185_v9 = vadd.f32 %v10089_v53, %v10219_v19  ;;  %7794 = vmatpush3.bf16.msra.mxu0 %v8062_v60 }
 0x2f1   : > { %v3807_v13 = vpop.f32.mrf.mxu1  ;;  %v10434_v39 = vpop.f32.mrf.mxu0  ;;  %v3181_v0 = vadd.f32 %v11083_v16, %v10163_v36 }
 0x2f2   : > { %v3934_v57 = vadd.f32 %v3807_v13, %v10256_v45  ;;  %v10437_v2 = vadd.f32 %v10367_v62, %v3936_v34 }
 0x2f3   : > { %v7558_v24 = vpop.f32.mrf.mxu1  ;;  %v7617_v7 = vpop.f32.mrf.mxu0 }
 0x2f4   : > { %v10440_v55 = vadd.f32 %v7558_v24, %v10260_v33  ;;  %v10445_v6 = vadd.f32 %v10373_v25, %v3934_v57 }
 0x2f5   : > { %v3810_v35 = vpop.f32.mrf.mxu1  ;;  %v4353_v58 = vpop.f32.mrf.mxu0 }
 0x2f6   : > { %v10447_v45 = vadd.f32 %v3810_v35, %v3181_v0  ;;  %v3189_v35 = vadd.f32 %v10132_v29, %v10266_v5  ;;  %v11086_v5 = vld [vmem:[#allocation25_spill] sm:$0xff] }
 0x2f7   : > { %v7561_v62 = vpop.f32.mrf.mxu1  ;;  %v10450_v10 = vpop.f32.mrf.mxu0 }
 0x2f8   : > { %v3940_v4 = vadd.f32 %v7561_v62, %v10263_v38 }
 0x2f9   : > { %v3823_v33 = vpop.f32.mrf.mxu1  ;;  %v10453_v46 = vpop.f32.mrf.mxu0 }
 0x2fa   : > { %v3938_v43 = vadd.f32 %v3823_v33, %v10271_v61  ;;  %v10455_v36 = vadd.f32 %v7609_v3, %v3940_v4 }
 0x2fb   : > { %v7562_v25 = vpop.f32.mrf.mxu1  ;;  %v7621_v34 = vpop.f32.mrf.mxu0 }
 0x2fc   : > { %v10458_v20 = vadd.f32 %v7562_v25, %v10274_v12  ;;  %v10462_v13 = vadd.f32 %v4321_v21, %v3938_v43 }
 0x2fd   : > { %v3826_v38 = vpop.f32.mrf.mxu1  ;;  %v4369_v61 = vpop.f32.mrf.mxu0 }
 0x2fe   : > { %v10464_v57 = vadd.f32 %v3826_v38, %v3185_v9 }
 0x2ff   : > { %v7565_v22 = vpop.f32.mrf.mxu1  ;;  %v10467_v24 = vpop.f32.mrf.mxu0 }
 0x300   : > { %v3944_v3 = vadd.f32 %v7565_v22, %v10277_v32 }
 0x301   : > { %v3839_v16 = vpop.f32.mrf.mxu1  ;;  %v10470_v0 = vpop.f32.mrf.mxu0 }
 0x302   : > { %v3942_v12 = vadd.f32 %v3839_v16, %v10280_v42  ;;  %11084 = vst [vmem:[#allocation26_spill] sm:$0xff] %v10470_v0  ;;  %v10472_v53 = vadd.f32 %v7613_v44, %v3944_v3 }
 0x303   : > { %v7566_v19 = vpop.f32.mrf.mxu1  ;;  %v7625_v62 = vpop.f32.mrf.mxu0 }
 0x304   : > { %v10475_v21 = vadd.f32 %v7566_v19, %v10289_v37  ;;  %v10479_v4 = vadd.f32 %v4337_v18, %v3942_v12  ;;  %v3193_v18 = vadd.f32 %v11086_v5, %v10305_v51  ;;  %v11088_v19 = vld [vmem:[#allocation16_spill] sm:$0xff] }
 0x305   : > { %v3842_v32 = vpop.f32.mrf.mxu1  ;;  %v4385_v43 = vpop.f32.mrf.mxu0 }
 0x306   : > { %v10481_v33 = vadd.f32 %v3842_v32, %v3189_v35 }
 0x307   : > { %v7569_v25 = vpop.f32.mrf.mxu1  ;;  %v10484_v60 = vpop.f32.mrf.mxu0 }
 0x308   : > { %v3948_v42 = vadd.f32 %v7569_v25, %v10295_v15  ;;  %11085 = vst [vmem:[#allocation30_spill] sm:$0xff] %v10484_v60 }
 0x309   : > { %v3855_v44 = vpop.f32.mrf.mxu1  ;;  %v10494_v22 = vpop.f32.mrf.mxu0 }
 0x30a   : > { %v3946_v9 = vadd.f32 %v3855_v44, %v10302_v23  ;;  %v10487_v37 = vadd.f32 %v7617_v7, %v3948_v42  ;;  %11087 = vst [vmem:[#allocation17_spill] sm:$0xff] %v10494_v22 }
 0x30b   : > { %v7570_v38 = vpop.f32.mrf.mxu1  ;;  %v7629_v23 = vpop.f32.mrf.mxu0 }
 0x30c   : > { %v10490_v29 = vadd.f32 %v7570_v38, %v10310_v11  ;;  %v10496_v3 = vadd.f32 %v4353_v58, %v3946_v9 }
 0x30d   : > { %v3858_v16 = vpop.f32.mrf.mxu1  ;;  %v4401_v51 = vpop.f32.mrf.mxu0 }
 0x30e   : > { %v10498_v15 = vadd.f32 %v3858_v16, %v3193_v18 }
 0x30f   : > { %v7573_v12 = vpop.f32.mrf.mxu1  ;;  %v10513_v18 = vpop.f32.mrf.mxu0 }
 0x310   : > { %v3952_v35 = vadd.f32 %v7573_v12, %v11088_v19  ;;  %11089 = vst [vmem:[#allocation31_spill] sm:$0xff] %v10513_v18 }
 0x311   : > { %v3871_v7 = vpop.f32.mrf.mxu1 }
 0x312   : > { %v3950_v32 = vadd.f32 %v3871_v7, %v10336_v63  ;;  %v10502_v25 = vadd.f32 %v7621_v34, %v3952_v35 }
 0x313   : > { %v7574_v11 = vpop.f32.mrf.mxu1 }
 0x314   : > { %v10505_v42 = vadd.f32 %v7574_v11, %v10341_v1  ;;  %v10507_v44 = vadd.f32 %v4369_v61, %v3950_v32  ;;  %v10521_v61 = vpop.f32.mrf.mxu0 }
 0x315   : > { %v3874_v58 = vpop.f32.mrf.mxu1  ;;  %11091 = vst [vmem:[#allocation19_spill] sm:$0xff] %v10521_v61 }
 0x316   : > { %v10510_v9 = vadd.f32 %v3874_v58, %v10351_v26  ;;  %v7633_v7 = vpop.f32.mrf.mxu0 }
 0x317   : > { %v7577_v38 = vpop.f32.mrf.mxu1 }
 0x318   : > { %v3956_v5 = vadd.f32 %v7577_v38, %v10358_v27 }
 0x319   : > { %v3887_v16 = vpop.f32.mrf.mxu1 }
 0x31a   : > { %v3954_v63 = vadd.f32 %v3887_v16, %v10370_v48  ;;  %v10516_v34 = vadd.f32 %v7625_v62, %v3956_v5 }
 0x31b   : > { %v7578_v12 = vpop.f32.mrf.mxu1 }
 0x31c   : > { %v10519_v1 = vadd.f32 %v7578_v12, %v10376_v47  ;;  %v10523_v19 = vadd.f32 %v4385_v43, %v3954_v63  ;;  %v4417_v47 = vpop.f32.mrf.mxu0 }
 0x31d   : > { %v3890_v26 = vpop.f32.mrf.mxu1 }
 0x31e   : > { %11090 = vst [vmem:[#allocation18_spill] sm:$0xff] %v10519_v1  ;;  %v10526_v35 = vadd.f32 %v3890_v26, %v10385_v49  ;;  %v10540_v16 = vpop.f32.mrf.mxu0 }
 0x31f   : > { %v7581_v27 = vpop.f32.mrf.mxu1  ;;  %11095 = vst [vmem:[#allocation22_spill] sm:$0xff] %v10540_v16 }
 0x320   : > { %11092 = vst [vmem:[#allocation41_spill] sm:$0xff] %v10526_v35  ;;  %v3960_v32 = vadd.f32 %v7581_v27, %v10395_v31  ;;  %v10546_v26 = vpop.f32.mrf.mxu0 }
 0x321   : > { %v3903_v11 = vpop.f32.mrf.mxu1  ;;  %11096 = vst [vmem:[#allocation24_spill] sm:$0xff] %v10546_v26 }
 0x322   : > { %v3958_v48 = vadd.f32 %v3903_v11, %v10401_v52  ;;  %v10530_v62 = vadd.f32 %v7629_v23, %v3960_v32 }
 0x323   : > { %v7582_v58 = vpop.f32.mrf.mxu1 }
 0x324   : > { %v10533_v38 = vadd.f32 %v7582_v58, %v10404_v54  ;;  %v10535_v43 = vadd.f32 %v4401_v51, %v3958_v48  ;;  %v10556_v11 = vpop.f32.mrf.mxu0 }
 0x325   : > { %v3906_v5 = vpop.f32.mrf.mxu1 }
 0x326   : > { %11093 = vst [vmem:[#allocation20_spill] sm:$0xff] %v10533_v38  ;;  %v10538_v49 = vadd.f32 %v3906_v5, %v10410_v59  ;;  %v10564_v58 = vpop.f32.mrf.mxu0 }
 0x327   : > { %v7585_v63 = vpop.f32.mrf.mxu1 }
 0x328   : > { %11094 = vst [vmem:[#allocation21_spill] sm:$0xff] %v10538_v49  ;;  %v3964_v31 = vadd.f32 %v7585_v63, %v10416_v50 }
 0x329   : > { %v3919_v12 = vpop.f32.mrf.mxu1 }
 0x32a   : > { %v3962_v52 = vadd.f32 %v3919_v12, %v10422_v41  ;;  %v10544_v23 = vadd.f32 %v7633_v7, %v3964_v31 }
 0x32b   : > { %v7586_v54 = vpop.f32.mrf.mxu1 }
 0x32c   : > { %v10549_v51 = vadd.f32 %v7586_v54, %v10425_v8  ;;  %v10551_v27 = vadd.f32 %v4417_v47, %v3962_v52  ;;  %v10568_v47 = vpop.f32.mrf.mxu0 }
 0x32d   : > { %v3922_v59 = vpop.f32.mrf.mxu1 }
 0x32e   : > { %11097 = vst [vmem:[#allocation27_spill] sm:$0xff] %v10549_v51  ;;  %v10554_v32 = vadd.f32 %v3922_v59, %v10431_v28 }
 0x32f   : > { %v7653_v50 = vpop.f32.mrf.mxu1 }
 0x330   : > { %11098 = vst [vmem:[#allocation29_spill] sm:$0xff] %v10554_v32  ;;  %v10559_v48 = vadd.f32 %v7653_v50, %v10437_v2  ;;  %v10576_v2 = vpop.f32.mrf.mxu0 }
 0x331   : > { %v4692_v41 = vpop.f32.mrf.mxu1 }
 0x332   : > { %v10562_v7 = vadd.f32 %v4692_v41, %v10445_v6  ;;  %v10582_v54 = vpop.f32.mrf.mxu0 }
 0x333   : > { %v7654_v8 = vpop.f32.mrf.mxu1 }
 0x335   : > { %v10566_v5 = vpop.f32.mrf.mxu1 }
 0x337   : > { %v7657_v63 = vpop.f32.mrf.mxu1 }
 0x338   : > { %v10571_v28 = vadd.f32 %v7657_v63, %v10455_v36  ;;  %v10590_v63 = vpop.f32.mrf.mxu0 }
 0x339   : > { %v4708_v31 = vpop.f32.mrf.mxu1 }
 0x33a   : > { %v10574_v12 = vadd.f32 %v4708_v31, %v10462_v13  ;;  %v10596_v26 = vpop.f32.mrf.mxu0 }
 0x33b   : > { %v10578_v52 = vpop.f32.mrf.mxu1 }
 0x33d   : > { %v10580_v6 = vpop.f32.mrf.mxu1 }
 0x33f   : > { %v7661_v59 = vpop.f32.mrf.mxu1 }
 0x340   : > { %v10585_v50 = vadd.f32 %v7661_v59, %v10472_v53  ;;  %v10604_v59 = vpop.f32.mrf.mxu0 }
 0x341   : > { %v4724_v41 = vpop.f32.mrf.mxu1 }
 0x342   : > { %v10588_v36 = vadd.f32 %v4724_v41, %v10479_v4  ;;  %v10610_v61 = vpop.f32.mrf.mxu0 }
 0x343   : > { %v10592_v13 = vpop.f32.mrf.mxu1 }
 0x345   : > { %v10594_v31 = vpop.f32.mrf.mxu1 }
 0x347   : > { %v7665_v32 = vpop.f32.mrf.mxu1 }
 0x348   : > { %v10599_v16 = vadd.f32 %v7665_v32, %v10487_v37  ;;  %v10618_v32 = vpop.f32.mrf.mxu0 }
 0x349   : > { %v4740_v51 = vpop.f32.mrf.mxu1 }
 0x34a   : > { %v10602_v53 = vadd.f32 %v4740_v51, %v10496_v3  ;;  %v10624_v22 = vpop.f32.mrf.mxu0 }
 0x34b   : > { %v10606_v4 = vpop.f32.mrf.mxu1 }
 0x34d   : > { %v10608_v41 = vpop.f32.mrf.mxu1 }
 0x34f   : > { %v7669_v49 = vpop.f32.mrf.mxu1 }
 0x350   : > { %v10613_v18 = vadd.f32 %v7669_v49, %v10502_v25  ;;  %v10632_v49 = vpop.f32.mrf.mxu0 }
 0x351   : > { %v4756_v38 = vpop.f32.mrf.mxu1 }
 0x352   : > { %11099 = vst [vmem:[#allocation32_spill] sm:$0xff] %v10613_v18  ;;  %v10616_v37 = vadd.f32 %v4756_v38, %v10507_v44 }
 0x353   : > { %v10620_v3 = vpop.f32.mrf.mxu1 }
 0x354   : > { %11100 = vst [vmem:[#allocation34_spill] sm:$0xff] %v10616_v37  ;;  %v10638_v37 = vpop.f32.mrf.mxu0 }
 0x355   : > { %v10622_v51 = vpop.f32.mrf.mxu1 }
 0x356   : > { %11101 = vst [vmem:[#allocation33_spill] sm:$0xff] %v10622_v51 }
 0x357   : > { %v7673_v35 = vpop.f32.mrf.mxu1 }
 0x358   : > { %v10627_v60 = vadd.f32 %v7673_v35, %v10516_v34  ;;  %v10646_v35 = vpop.f32.mrf.mxu0 }
 0x359   : > { %v4772_v1 = vpop.f32.mrf.mxu1 }
 0x35a   : > { %11102 = vst [vmem:[#allocation35_spill] sm:$0xff] %v10627_v60  ;;  %v10630_v25 = vadd.f32 %v4772_v1, %v10523_v19 }
 0x35b   : > { %v10634_v44 = vpop.f32.mrf.mxu1 }
 0x35c   : > { %11103 = vst [vmem:[#allocation36_spill] sm:$0xff] %v10630_v25  ;;  %11104 = vst [vmem:[#allocation38_spill] sm:$0xff] %v10634_v44  ;;  %v10652_v25 = vpop.f32.mrf.mxu0 }
 0x35d   : > { %v10636_v38 = vpop.f32.mrf.mxu1 }
 0x35e   : > { %11105 = vst [vmem:[#allocation40_spill] sm:$0xff] %v10636_v38 }
 0x35f   : > { %v7677_v18 = vpop.f32.mrf.mxu1 }
 0x360   : > { %v10641_v51 = vadd.f32 %v7677_v18, %v10530_v62  ;;  %v10660_v62 = vpop.f32.mrf.mxu0 }
 0x361   : > { %v4788_v0 = vpop.f32.mrf.mxu1 }
 0x362   : > { %11106 = vst [vmem:[#allocation23_spill] sm:$0xff] %v10641_v51  ;;  %v10644_v34 = vadd.f32 %v4788_v0, %v10535_v43  ;;  %v4435_v43 = vadd.f32 %v10382_v14, %v10440_v55  ;;  %v4433_v51 = vadd.f32 %v10392_v30, %v10447_v45  ;;  %v10680_v14 = vld [vmem:[%s10965_s4] ss:$0 sm:$0xff]  ;;  %v4439_v45 = vadd.f32 %v10407_v17, %v10458_v20 }
 0x363   : > { %v10648_v1 = vpop.f32.mrf.mxu1  ;;  %v5579_v17 = vadd.f32 %v10582_v54, %v10571_v28 }
 0x364   : > { %11107 = vst [vmem:[#allocation39_spill] sm:$0xff] %v10644_v34 }
 0x365   : > { %v10650_v19 = vpop.f32.mrf.mxu1 }
 0x366   : > { %11108 = vst [vmem:[#allocation42_spill] sm:$0xff] %v10650_v19  ;;  %v4822_v19 = vadd.f32 %v7654_v8, %v4435_v43  ;;  %v4437_v43 = vadd.f32 %v10413_v40, %v10464_v57 }
 0x367   : > { %v7681_v60 = vpop.f32.mrf.mxu1 }
 0x368   : > { %v10655_v38 = vadd.f32 %v7681_v60, %v10544_v23  ;;  %v5575_v60 = vadd.f32 %v10556_v11, %v10559_v48  ;;  %v10672_v23 = vpop.f32.mrf.mxu0  ;;  %v5576_v30 = vadd.f32 %v10568_v47, %v4822_v19  ;;  %v4824_v20 = vadd.f32 %v10580_v6, %v4437_v43 }
 0x369   : > { %v4804_v44 = vpop.f32.mrf.mxu1  ;;  %v4443_v6 = vadd.f32 %v10428_v56, %v10475_v21  ;;  %v5583_v21 = vadd.f32 %v10610_v61, %v10585_v50 }
 0x36a   : > { %11109 = vst [vmem:[#allocation28_spill] sm:$0xff] %v10655_v38  ;;  %v10658_v18 = vadd.f32 %v4804_v44, %v10551_v27  ;;  %v4820_v44 = vadd.f32 %v10566_v5, %v4433_v51  ;;  %v5573_v38 = vadd.f32 %v10564_v58, %v10562_v7  ;;  %v10685_v11 = vpop.f32.mrf.mxu0  ;;  %v4826_v58 = vadd.f32 %v10578_v52, %v4439_v45 }
 0x36b   : > { %v10662_v0 = vpop.f32.mrf.mxu1  ;;  %v4830_v43 = vadd.f32 %v10592_v13, %v4443_v6  ;;  %v5581_v13 = vadd.f32 %v10618_v32, %v10588_v36 }
 0x36c   : > { %11110 = vst [vmem:[#allocation45_spill] sm:$0xff] %v10658_v18  ;;  %v5574_v7 = vadd.f32 %v10576_v2, %v4820_v44  ;;  %v5577_v2 = vadd.f32 %v10590_v63, %v10574_v12 }
 0x36d   : > { %v10666_v34 = vpop.f32.mrf.mxu1 }
 0x36f   : > { %v7749_v27 = vpop.f32.mrf.mxu1 }
 0x370   : > { %v6073_v18 = vadd.f32 %v7749_v27, %v5575_v60 }
 0x371   : > { %v5944_v55 = vpop.f32.mrf.mxu1 }
 0x372   : > { %v6071_v8 = vadd.f32 %v5944_v55, %v5573_v38  ;;  %v6112_v5 = vadd.f32 %v10680_v14, %v6073_v18  ;;  %v10697_v18 = vpop.f32.mrf.mxu0 }
 0x373   : > { %v7750_v48 = vpop.f32.mrf.mxu1 }
 0x374   : > { %v6074_v51 = vadd.f32 %v7750_v48, %v5576_v30  ;;  %v6110_v38 = vadd.f32 %v10680_v14, %v6071_v8  ;;  %v6144_v52 = vmax.f32 %v6112_v5, 0.0  ;;  %v5580_v8 = vadd.f32 %v10596_v26, %v4826_v58  ;;  %v10705_v54 = vpop.f32.mrf.mxu0 }
 0x375   : > { %v5947_v60 = vpop.f32.mrf.mxu1  ;;  %v5578_v5 = vadd.f32 %v10604_v59, %v4824_v20  ;;  %v4441_v26 = vadd.f32 %v10434_v39, %v10481_v33 }
 0x376   : > { %v6113_v47 = vadd.f32 %v10680_v14, %v6074_v51  ;;  %v6072_v19 = vadd.f32 %v5947_v60, %v5574_v7  ;;  %v6142_v30 = vmax.f32 %v6110_v38, 0.0 }
 0x377   : > { %v7753_v27 = vpop.f32.mrf.mxu1 }
 0x378   : > { %v6145_v44 = vmax.f32 %v6113_v47, 0.0  ;;  %v6111_v40 = vadd.f32 %v10680_v14, %v6072_v19  ;;  %v6077_v57 = vadd.f32 %v7753_v27, %v5579_v17  ;;  %v4828_v47 = vadd.f32 %v10594_v31, %v4441_v26  ;;  %v10717_v19 = vpop.f32.mrf.mxu0 }
 0x379   : > { %v5960_v55 = vpop.f32.mrf.mxu1  ;;  %v4447_v31 = vadd.f32 %v10450_v10, %v10490_v29  ;;  %v5587_v29 = vadd.f32 %v10638_v37, %v10599_v16 }
 0x37a   : > { %v6175_v45 = vpack.c.bf16 %v6145_v44, %v6144_v52  ;;  %v6143_v48 = vmax.f32 %v6111_v40, 0.0  ;;  %v6075_v28 = vadd.f32 %v5960_v55, %v5577_v2  ;;  %v6116_v12 = vadd.f32 %v10680_v14, %v6077_v57  ;;  %v10725_v40 = vpop.f32.mrf.mxu0 }
 0x37b   : > { %v7754_v51 = vpop.f32.mrf.mxu1  ;;  %v5584_v2 = vadd.f32 %v10624_v22, %v4830_v43  ;;  %v5582_v55 = vadd.f32 %v10632_v49, %v4828_v47  ;;  %v4445_v22 = vadd.f32 %v10453_v46, %v10498_v15 }
 0x37c   : > { %v6078_v63 = vadd.f32 %v7754_v51, %v5580_v8  ;;  %v6174_v7 = vpack.c.bf16 %v6143_v48, %v6142_v30  ;;  %v6114_v60 = vadd.f32 %v10680_v14, %v6075_v28  ;;  %v6148_v39 = vmax.f32 %v6116_v12, 0.0  ;;  %v10737_v51 = vpop.f32.mrf.mxu0 }
 0x37d   : > { %v5963_v58 = vpop.f32.mrf.mxu1  ;;  %v4834_v30 = vadd.f32 %v10606_v4, %v4447_v31  ;;  %v4832_v6 = vadd.f32 %v10608_v41, %v4445_v22  ;;  %v5585_v4 = vadd.f32 %v10646_v35, %v10602_v53  ;;  %v4451_v41 = vadd.f32 %v10467_v24, %v10505_v42  ;;  %v11112_v42 = vld [vmem:[#allocation32_spill] sm:$0xff] }
 0x37e   : > { %v6117_v38 = vadd.f32 %v10680_v14, %v6078_v63  ;;  %v6076_v56 = vadd.f32 %v5963_v58, %v5578_v5  ;;  %7795 = vmatprep.mubr.bf16.mxu0 %v6174_v7  ;;  %v6146_v52 = vmax.f32 %v6114_v60, 0.0  ;;  %v10745_v58 = vpop.f32.mrf.mxu0 }
 0x37f   : > { %v7757_v59 = vpop.f32.mrf.mxu1  ;;  %7796 = vmatmul.mubr.bf16.vlgmr.msra.gmra.mxu0 %v6175_v45  ;;  %v5588_v7 = vadd.f32 %v10652_v25, %v4834_v30  ;;  %v11111_v25 = vld [vmem:[#allocation26_spill] sm:$0xff] }
 0x380   : > { %v6149_v33 = vmax.f32 %v6117_v38, 0.0  ;;  %v6115_v17 = vadd.f32 %v10680_v14, %v6076_v56  ;;  %v6081_v20 = vadd.f32 %v7757_v59, %v5583_v21  ;;  %v5586_v38 = vadd.f32 %v10660_v62, %v4832_v6  ;;  %v11116_v30 = vld [vmem:[#allocation30_spill] sm:$0xff] }
 0x381   : > { %v5976_v27 = vpop.f32.mrf.mxu1  ;;  %v4838_v21 = vadd.f32 %v10620_v3, %v4451_v41  ;;  %v4449_v47 = vadd.f32 %v11111_v25, %v10510_v9 }
 0x382   : > { %v6177_v44 = vpack.c.bf16 %v6149_v33, %v6148_v39  ;;  %v6147_v61 = vmax.f32 %v6115_v17, 0.0  ;;  %v6079_v50 = vadd.f32 %v5976_v27, %v5581_v13  ;;  %v6120_v36 = vadd.f32 %v10680_v14, %v6081_v20  ;;  %v11113_v17 = vld [vmem:[#allocation33_spill] sm:$0xff]  ;;  %v7725_v27 = vpop.f32.mrf.mxu0 }
 0x383   : > { %v7758_v57 = vpop.f32.mrf.mxu1  ;;  %v5591_v33 = vadd.f32 %v10672_v23, %v11112_v42  ;;  %v4836_v20 = vadd.f32 %v11113_v17, %v4449_v47  ;;  %v5592_v31 = vadd.f32 %v10697_v18, %v4838_v21 }
 0x384   : > { %v6082_v32 = vadd.f32 %v7758_v57, %v5584_v2  ;;  %v6176_v8 = vpack.c.bf16 %v6147_v61, %v6146_v52  ;;  %v6118_v48 = vadd.f32 %v10680_v14, %v6079_v50  ;;  %v6152_v46 = vmax.f32 %v6120_v36, 0.0  ;;  %v11114_v2 = vld [vmem:[#allocation34_spill] sm:$0xff] }
 0x385   : > { %v5979_v45 = vpop.f32.mrf.mxu1  ;;  %v5589_v3 = vadd.f32 %v10685_v11, %v11114_v2 }
 0x386   : > { %v6121_v28 = vadd.f32 %v10680_v14, %v6082_v32  ;;  %v6080_v10 = vadd.f32 %v5979_v45, %v5582_v55  ;;  %7799 = vmatprep.mubr.bf16.mxu0 %v6176_v8  ;;  %v6150_v43 = vmax.f32 %v6118_v48, 0.0  ;;  %v5542_v55 = vpop.f32.mrf.mxu0  ;;  %v11115_v8 = vld [vmem:[#allocation18_spill] sm:$0xff] }
 0x387   : > { %v7761_v49 = vpop.f32.mrf.mxu1  ;;  %7800 = vmatmul.mubr.bf16.gmra.mxu0 %v6177_v44  ;;  %v4455_v22 = vadd.f32 %v11116_v30, %v11115_v8 }
 0x388   : > { %v6153_v15 = vmax.f32 %v6121_v28, 0.0  ;;  %v6119_v12 = vadd.f32 %v10680_v14, %v6080_v10  ;;  %v6085_v63 = vadd.f32 %v7761_v49, %v5587_v29  ;;  %v5590_v28 = vadd.f32 %v10705_v54, %v4836_v20  ;;  %v11117_v29 = vld [vmem:[#allocation38_spill] sm:$0xff]  ;;  %v11118_v49 = vld [vmem:[#allocation41_spill] sm:$0xff] }
 0x389   : > { %v5992_v5 = vpop.f32.mrf.mxu1  ;;  %v4842_v6 = vadd.f32 %v11117_v29, %v4455_v22 }
 0x38a   : > { %v6179_v26 = vpack.c.bf16 %v6153_v15, %v6152_v46  ;;  %v6151_v16 = vmax.f32 %v6119_v12, 0.0  ;;  %v6083_v37 = vadd.f32 %v5992_v5, %v5585_v4  ;;  %v6124_v53 = vadd.f32 %v10680_v14, %v6085_v63  ;;  %v11119_v4 = vld [vmem:[#allocation17_spill] sm:$0xff]  ;;  %v11120_v5 = vld [vmem:[#allocation35_spill] sm:$0xff] }
 0x38b   : > { %v7762_v60 = vpop.f32.mrf.mxu1  ;;  %v4453_v18 = vadd.f32 %v11119_v4, %v11118_v49  ;;  %v5596_v21 = vadd.f32 %v10737_v51, %v4842_v6 }
 0x38c   : > { %v6086_v35 = vadd.f32 %v7762_v60, %v5588_v7  ;;  %v6178_v56 = vpack.c.bf16 %v6151_v16, %v6150_v43  ;;  %v6122_v13 = vadd.f32 %v10680_v14, %v6083_v37  ;;  %v6156_v52 = vmax.f32 %v6124_v53, 0.0  ;;  %v7726_v43 = vpop.f32.mrf.mxu0  ;;  %v11122_v37 = vld [vmem:[#allocation36_spill] sm:$0xff] }
 0x38d   : > { %v5995_v59 = vpop.f32.mrf.mxu1  ;;  %v5595_v7 = vadd.f32 %v10717_v19, %v11120_v5  ;;  %v5593_v41 = vadd.f32 %v10725_v40, %v11122_v37 }
 0x38e   : > { %v6125_v39 = vadd.f32 %v10680_v14, %v6086_v35  ;;  %v6084_v24 = vadd.f32 %v5995_v59, %v5586_v38  ;;  %7803 = vmatprep.mubr.bf16.mxu0 %v6178_v56  ;;  %v6154_v57 = vmax.f32 %v6122_v13, 0.0  ;;  %v5545_v13 = vpop.f32.mrf.mxu0 }
 0x38f   : > { %v7765_v62 = vpop.f32.mrf.mxu1  ;;  %7804 = vmatmul.mubr.bf16.gmra.mxu0 %v6179_v26  ;;  %v11121_v26 = vld [vmem:[#allocation40_spill] sm:$0xff] }
 0x390   : > { %v6157_v9 = vmax.f32 %v6125_v39, 0.0  ;;  %v6123_v44 = vadd.f32 %v10680_v14, %v6084_v24  ;;  %v6089_v61 = vadd.f32 %v7765_v62, %v5591_v33  ;;  %v4840_v16 = vadd.f32 %v11121_v26, %v4453_v18  ;;  %v11123_v39 = vld [vmem:[#allocation20_spill] sm:$0xff]  ;;  %v11124_v24 = vld [vmem:[#allocation31_spill] sm:$0xff]  ;;  %v11132_v26 = vld [vmem:[#allocation29_spill] sm:$0xff] }
 0x391   : > { %v6008_v50 = vpop.f32.mrf.mxu1  ;;  %v4459_v42 = vadd.f32 %v11124_v24, %v11123_v39  ;;  %v11130_v18 = vld [vmem:[#allocation27_spill] sm:$0xff] }
 0x392   : > { %v6181_v36 = vpack.c.bf16 %v6157_v9, %v6156_v52  ;;  %v6155_v32 = vmax.f32 %v6123_v44, 0.0  ;;  %v6087_v23 = vadd.f32 %v6008_v50, %v5589_v3  ;;  %v6128_v48 = vadd.f32 %v10680_v14, %v6089_v61  ;;  %v11125_v3 = vld [vmem:[#allocation21_spill] sm:$0xff]  ;;  %v11126_v52 = vld [vmem:[#allocation19_spill] sm:$0xff]  ;;  %v7729_v9 = vpop.f32.mrf.mxu0 }
 0x393   : > { %v7766_v45 = vpop.f32.mrf.mxu1  ;;  %v5594_v20 = vadd.f32 %v10745_v58, %v4840_v16  ;;  %v4846_v2 = vadd.f32 %v10648_v1, %v4459_v42  ;;  %v4457_v51 = vadd.f32 %v11126_v52, %v11125_v3  ;;  %v11129_v58 = vld [vmem:[#allocation39_spill] sm:$0xff]  ;;  %v11133_v16 = vld [vmem:[#allocation24_spill] sm:$0xff] }
 0x394   : > { %v6090_v11 = vadd.f32 %v7766_v45, %v5592_v31  ;;  %v6180_v10 = vpack.c.bf16 %v6155_v32, %v6154_v57  ;;  %v6126_v15 = vadd.f32 %v10680_v14, %v6087_v23  ;;  %v6160_v60 = vmax.f32 %v6128_v48, 0.0  ;;  %v11127_v57 = vld [vmem:[#allocation23_spill] sm:$0xff]  ;;  %v11128_v32 = vld [vmem:[#allocation42_spill] sm:$0xff] }
 0x395   : > { %v6011_v46 = vpop.f32.mrf.mxu1  ;;  %v4844_v23 = vadd.f32 %v11128_v32, %v4457_v51  ;;  %v5597_v30 = vadd.f32 %v5542_v55, %v11129_v58  ;;  %v10809_v58 = vld [vmem:[%s10967_s6] ss:$0 sm:$0xff] }
 0x396   : > { %v6129_v12 = vadd.f32 %v10680_v14, %v6090_v11  ;;  %v6088_v63 = vadd.f32 %v6011_v46, %v5590_v28  ;;  %7807 = vmatprep.mubr.bf16.mxu0 %v6180_v10  ;;  %v6158_v25 = vmax.f32 %v6126_v15, 0.0  ;;  %v5558_v11 = vpop.f32.mrf.mxu0  ;;  %v5600_v10 = vadd.f32 %v7726_v43, %v4846_v2 }
 0x397   : > { %v7769_v54 = vpop.f32.mrf.mxu1  ;;  %7808 = vmatmul.mubr.bf16.gmra.mxu0 %v6181_v36  ;;  %v5599_v36 = vadd.f32 %v7725_v27, %v11127_v57  ;;  %v11131_v27 = vld [vmem:[#allocation22_spill] sm:$0xff]  ;;  %v5598_v55 = vadd.f32 %v5545_v13, %v4844_v23 }
 0x398   : > { %v6161_v53 = vmax.f32 %v6129_v12, 0.0  ;;  %v6127_v35 = vadd.f32 %v10680_v14, %v6088_v63  ;;  %v6093_v38 = vadd.f32 %v7769_v54, %v5595_v7  ;;  %v4463_v46 = vadd.f32 %v11131_v27, %v11130_v18  ;;  %v7730_v37 = vpop.f32.mrf.mxu0  ;;  %v6423_v18 = vld [vmem:[%s8444_s19 + $0x8] sm:$0xff] }
 0x399   : > { %v6024_v56 = vpop.f32.mrf.mxu1  ;;  %v4461_v54 = vadd.f32 %v11133_v16, %v11132_v26  ;;  %v6426_v16 = vld [vmem:[%s8444_s19 + $0x20] sm:$0xff] }
 0x39a   : > { %v6183_v47 = vpack.c.bf16 %v6161_v53, %v6160_v60  ;;  %v6159_v59 = vmax.f32 %v6127_v35, 0.0  ;;  %v6091_v19 = vadd.f32 %v6024_v56, %v5593_v41  ;;  %v6132_v17 = vadd.f32 %v10680_v14, %v6093_v38  ;;  %v11134_v41 = vld [vmem:[#allocation28_spill] sm:$0xff]  ;;  %v11135_v56 = vld [vmem:[#allocation45_spill] sm:$0xff]  ;;  %v5561_v24 = vpop.f32.mrf.mxu0 }
 0x39b   : > { %v7770_v33 = vpop.f32.mrf.mxu1  ;;  %v4850_v7 = vadd.f32 %v10662_v0, %v4463_v46  ;;  %v5603_v60 = vadd.f32 %v7729_v9, %v11134_v41 }
 0x39c   : > { %v6094_v40 = vadd.f32 %v7770_v33, %v5596_v21  ;;  %v6182_v62 = vpack.c.bf16 %v6159_v59, %v6158_v25  ;;  %v6130_v61 = vadd.f32 %v10680_v14, %v6091_v19  ;;  %v6164_v1 = vmax.f32 %v6132_v17, 0.0 }
 0x39d   : > { %v6027_v44 = vpop.f32.mrf.mxu1  ;;  %v5601_v21 = vadd.f32 %v5558_v11, %v11135_v56  ;;  %v4848_v25 = vadd.f32 %v10666_v34, %v4461_v54  ;;  %v5604_v39 = vadd.f32 %v7730_v37, %v4850_v7 }
 0x39e   : > { %v6133_v50 = vadd.f32 %v10680_v14, %v6094_v40  ;;  %v6092_v31 = vadd.f32 %v6027_v44, %v5594_v20  ;;  %7811 = vmatprep.mubr.bf16.mxu0 %v6182_v62  ;;  %v6162_v29 = vmax.f32 %v6130_v61, 0.0 }
 0x39f   : > { %v7773_v8 = vpop.f32.mrf.mxu1  ;;  %7812 = vmatmul.mubr.bf16.gmra.mxu0 %v6183_v47  ;;  %v5602_v2 = vadd.f32 %v5561_v24, %v4848_v25 }
 0x3a0   : > { %v6165_v22 = vmax.f32 %v6133_v50, 0.0  ;;  %v6131_v45 = vadd.f32 %v10680_v14, %v6092_v31  ;;  %v6097_v48 = vadd.f32 %v7773_v8, %v5599_v36 }
 0x3a1   : > { %v6040_v28 = vpop.f32.mrf.mxu1 }
 0x3a2   : > { %v6185_v6 = vpack.c.bf16 %v6165_v22, %v6164_v1  ;;  %v6163_v49 = vmax.f32 %v6131_v45, 0.0  ;;  %v6095_v4 = vadd.f32 %v6040_v28, %v5597_v30  ;;  %v6136_v12 = vadd.f32 %v10680_v14, %v6097_v48  ;;  %v6424_v1 = vld [vmem:[%s8444_s19 + $0x10] sm:$0xff] }
 0x3a3   : > { %v7774_v15 = vpop.f32.mrf.mxu1 }
 0x3a4   : > { %v6098_v63 = vadd.f32 %v7774_v15, %v5600_v10  ;;  %v6184_v5 = vpack.c.bf16 %v6163_v49, %v6162_v29  ;;  %v6134_v53 = vadd.f32 %v10680_v14, %v6095_v4  ;;  %v6168_v0 = vmax.f32 %v6136_v12, 0.0  ;;  %v6425_v10 = vld [vmem:[%s8444_s19 + $0x18] sm:$0xff] }
 0x3a5   : > { %v6043_v43 = vpop.f32.mrf.mxu1 }
 0x3a6   : > { %v6137_v35 = vadd.f32 %v10680_v14, %v6098_v63  ;;  %v6096_v38 = vadd.f32 %v6043_v43, %v5598_v55  ;;  %7815 = vmatprep.mubr.bf16.mxu0 %v6184_v5  ;;  %v6166_v33 = vmax.f32 %v6134_v53, 0.0  ;;  %v6428_v63 = vld [vmem:[%s8444_s19 + $0x30] sm:$0xff] }
 0x3a7   : > { %v7777_v47 = vpop.f32.mrf.mxu1  ;;  %7816 = vmatmul.mubr.bf16.gmra.mxu0 %v6185_v6 }
 0x3a8   : > { %v6169_v59 = vmax.f32 %v6137_v35, 0.0  ;;  %v6135_v19 = vadd.f32 %v10680_v14, %v6096_v38  ;;  %v6101_v13 = vadd.f32 %v7777_v47, %v5603_v60  ;;  %v6429_v60 = vld [vmem:[%s8444_s19 + $0x38] sm:$0xff] }
 0x3a9   : > { %v6056_v42 = vpop.f32.mrf.mxu1 }
 0x3aa   : > { %v6187_v17 = vpack.c.bf16 %v6169_v59, %v6168_v0  ;;  %v6167_v40 = vmax.f32 %v6135_v19, 0.0  ;;  %v6099_v20 = vadd.f32 %v6056_v42, %v5601_v21  ;;  %v6140_v3 = vadd.f32 %v10680_v14, %v6101_v13  ;;  %v6427_v21 = vld [vmem:[%s8444_s19 + $0x28] sm:$0xff]  ;;  %v6432_v19 = vld [vmem:[%s8444_s19 + $0x50] sm:$0xff] }
 0x3ab   : > { %v7778_v62 = vpop.f32.mrf.mxu1 }
 0x3ac   : > { %v6102_v52 = vadd.f32 %v7778_v62, %v5604_v39  ;;  %v6186_v34 = vpack.c.bf16 %v6167_v40, %v6166_v33  ;;  %v6138_v9 = vadd.f32 %v10680_v14, %v6099_v20  ;;  %v6172_v50 = vmax.f32 %v6140_v3, 0.0  ;;  %v6430_v33 = vld [vmem:[%s8444_s19 + $0x40] sm:$0xff] }
 0x3ad   : > { %v6059_v51 = vpop.f32.mrf.mxu1 }
 0x3ae   : > { %v6141_v44 = vadd.f32 %v10680_v14, %v6102_v52  ;;  %v6100_v61 = vadd.f32 %v6059_v51, %v5602_v2  ;;  %7819 = vmatprep.mubr.bf16.mxu0 %v6186_v34  ;;  %v6170_v36 = vmax.f32 %v6138_v9, 0.0  ;;  %v6433_v2 = vld [vmem:[%s8444_s19 + $0x58] sm:$0xff]  ;;  %v6431_v9 = vld [vmem:[%s8444_s19 + $0x48] sm:$0xff] }
 0x3af   : > { %7820 = vmatmul.mubr.bf16.gmra.mxu0 %v6187_v17 }
 0x3b0   : > { %v6173_v31 = vmax.f32 %v6141_v44, 0.0  ;;  %v6139_v57 = vadd.f32 %v10680_v14, %v6100_v61  ;;  %v6422_v14 = vld [vmem:[%s8444_s19] sm:$0xff] }
 0x3b2   : > { %v6189_v32 = vpack.c.bf16 %v6173_v31, %v6172_v50  ;;  %v6171_v23 = vmax.f32 %v6139_v57, 0.0  ;;  %v6436_v57 = vld [vmem:[%s8444_s19 + $0x70] sm:$0xff] }
 0x3b4   : > { %v6188_v8 = vpack.c.bf16 %v6171_v23, %v6170_v36 }
 0x3b6   : > { %7823 = vmatprep.mubr.bf16.mxu0 %v6188_v8 }
 0x3b7   : > { %7824 = vmatmul.mubr.bf16.gmra.mxu0 %v6189_v32 }
 0x43f   : > { %v7797_v30 = vpop.f32.mrf.mxu0 }
 0x440   : > { %v6304_v22 = vadd.f32 %v7797_v30, %v10809_v58  ;;  %v6434_v30 = vld [vmem:[%s8444_s19 + $0x60] sm:$0xff] }
 0x441   : > { %v6295_v45 = vpop.f32.mrf.mxu0 }
 0x442   : > { %v6456_v48 = vadd.f32 %v6424_v1, %v6304_v22  ;;  %v6296_v11 = vadd.f32 %v10809_v58, %v6295_v45 }
 0x443   : > { %v7798_v28 = vpop.f32.mrf.mxu0 }
 0x444   : > { %v6488_v29 = vmax.f32 %v6456_v48, 0.0  ;;  %v6454_v6 = vadd.f32 %v6422_v14, %v6296_v11  ;;  %v6307_v49 = vadd.f32 %v7798_v28, %v10809_v58  ;;  %v6437_v48 = vld [vmem:[%s8444_s19 + $0x78] sm:$0xff] }
 0x445   : > { %v6298_v4 = vpop.f32.mrf.mxu0 }
 0x446   : > { %6520 = vst [vmem:[%s10820_s12 + $0x10] sm:$0xff] %v6488_v29  ;;  %v6486_v27 = vmax.f32 %v6454_v6, 0.0  ;;  %v6457_v46 = vadd.f32 %v6425_v10, %v6307_v49  ;;  %v6299_v15 = vadd.f32 %v10809_v58, %v6298_v4  ;;  %v6435_v6 = vld [vmem:[%s8444_s19 + $0x68] sm:$0xff] }
 0x447   : > { %v7801_v12 = vpop.f32.mrf.mxu0 }
 0x448   : > { %6518 = vst [vmem:[%s10820_s12] sm:$0xff] %v6486_v27  ;;  %v6489_v55 = vmax.f32 %v6457_v46, 0.0  ;;  %v6455_v5 = vadd.f32 %v6423_v18, %v6299_v15  ;;  %v6320_v7 = vadd.f32 %v7801_v12, %v10809_v58  ;;  %v6440_v46 = vld [vmem:[%s8444_s19 + $0x90] sm:$0xff] }
 0x449   : > { %v6311_v26 = vpop.f32.mrf.mxu0 }
 0x44a   : > { %6521 = vst [vmem:[%s10820_s12 + $0x18] sm:$0xff] %v6489_v55  ;;  %v6487_v54 = vmax.f32 %v6455_v5, 0.0  ;;  %v6460_v37 = vadd.f32 %v6428_v63, %v6320_v7  ;;  %v6312_v43 = vadd.f32 %v10809_v58, %v6311_v26  ;;  %v6438_v5 = vld [vmem:[%s8444_s19 + $0x80] sm:$0xff] }
 0x44b   : > { %v7802_v41 = vpop.f32.mrf.mxu0 }
 0x44c   : > { %6519 = vst [vmem:[%s10820_s12 + $0x8] sm:$0xff] %v6487_v54  ;;  %v6492_v53 = vmax.f32 %v6460_v37, 0.0  ;;  %v6458_v35 = vadd.f32 %v6426_v16, %v6312_v43  ;;  %v6323_v38 = vadd.f32 %v7802_v41, %v10809_v58  ;;  %v6441_v37 = vld [vmem:[%s8444_s19 + $0x98] sm:$0xff] }
 0x44d   : > { %v6314_v56 = vpop.f32.mrf.mxu0 }
 0x44e   : > { %6524 = vst [vmem:[%s10820_s12 + $0x30] sm:$0xff] %v6492_v53  ;;  %v6490_v25 = vmax.f32 %v6458_v35, 0.0  ;;  %v6461_v47 = vadd.f32 %v6429_v60, %v6323_v38  ;;  %v6315_v0 = vadd.f32 %v10809_v58, %v6314_v56  ;;  %v6439_v35 = vld [vmem:[%s8444_s19 + $0x88] sm:$0xff] }
 0x44f   : > { %v7805_v59 = vpop.f32.mrf.mxu0 }
 0x450   : > { %6522 = vst [vmem:[%s10820_s12 + $0x20] sm:$0xff] %v6490_v25  ;;  %v6493_v13 = vmax.f32 %v6461_v47, 0.0  ;;  %v6459_v39 = vadd.f32 %v6427_v21, %v6315_v0  ;;  %v6336_v24 = vadd.f32 %v7805_v59, %v10809_v58  ;;  %v6444_v47 = vld [vmem:[%s8444_s19 + $0xb0] sm:$0xff] }
 0x451   : > { %v6327_v42 = vpop.f32.mrf.mxu0 }
 0x452   : > { %6525 = vst [vmem:[%s10820_s12 + $0x38] sm:$0xff] %v6493_v13  ;;  %v6491_v17 = vmax.f32 %v6459_v39, 0.0  ;;  %v6464_v40 = vadd.f32 %v6432_v19, %v6336_v24  ;;  %v6328_v20 = vadd.f32 %v10809_v58, %v6327_v42  ;;  %v6442_v39 = vld [vmem:[%s8444_s19 + $0xa0] sm:$0xff] }
 0x453   : > { %v7806_v62 = vpop.f32.mrf.mxu0 }
 0x454   : > { %6523 = vst [vmem:[%s10820_s12 + $0x28] sm:$0xff] %v6491_v17  ;;  %v6496_v3 = vmax.f32 %v6464_v40, 0.0  ;;  %v6462_v52 = vadd.f32 %v6430_v33, %v6328_v20  ;;  %v6339_v34 = vadd.f32 %v7806_v62, %v10809_v58  ;;  %v6445_v40 = vld [vmem:[%s8444_s19 + $0xb8] sm:$0xff] }
 0x455   : > { %v6330_v51 = vpop.f32.mrf.mxu0 }
 0x456   : > { %6528 = vst [vmem:[%s10820_s12 + $0x50] sm:$0xff] %v6496_v3  ;;  %v6494_v44 = vmax.f32 %v6462_v52, 0.0  ;;  %v6465_v61 = vadd.f32 %v6433_v2, %v6339_v34  ;;  %v6331_v50 = vadd.f32 %v10809_v58, %v6330_v51  ;;  %v6443_v52 = vld [vmem:[%s8444_s19 + $0xa8] sm:$0xff] }
 0x457   : > { %v7809_v31 = vpop.f32.mrf.mxu0 }
 0x458   : > { %6526 = vst [vmem:[%s10820_s12 + $0x40] sm:$0xff] %v6494_v44  ;;  %v6497_v36 = vmax.f32 %v6465_v61, 0.0  ;;  %v6463_v32 = vadd.f32 %v6431_v9, %v6331_v50  ;;  %v6352_v23 = vadd.f32 %v7809_v31, %v10809_v58  ;;  %v6448_v61 = vld [vmem:[%s8444_s19 + $0xd0] sm:$0xff] }
 0x459   : > { %v6343_v8 = vpop.f32.mrf.mxu0 }
 0x45a   : > { %6529 = vst [vmem:[%s10820_s12 + $0x58] sm:$0xff] %v6497_v36  ;;  %v6495_v1 = vmax.f32 %v6463_v32, 0.0  ;;  %v6468_v22 = vadd.f32 %v6436_v57, %v6352_v23  ;;  %v6344_v45 = vadd.f32 %v10809_v58, %v6343_v8  ;;  %v6446_v32 = vld [vmem:[%s8444_s19 + $0xc0] sm:$0xff] }
 0x45b   : > { %v7810_v14 = vpop.f32.mrf.mxu0 }
 0x45c   : > { %6527 = vst [vmem:[%s10820_s12 + $0x48] sm:$0xff] %v6495_v1  ;;  %v6500_v11 = vmax.f32 %v6468_v22, 0.0  ;;  %v6466_v28 = vadd.f32 %v6434_v30, %v6344_v45  ;;  %v6355_v10 = vadd.f32 %v7810_v14, %v10809_v58  ;;  %v6449_v22 = vld [vmem:[%s8444_s19 + $0xd8] sm:$0xff] }
 0x45d   : > { %v6346_v29 = vpop.f32.mrf.mxu0 }
 0x45e   : > { %6532 = vst [vmem:[%s10820_s12 + $0x70] sm:$0xff] %v6500_v11  ;;  %v6498_v49 = vmax.f32 %v6466_v28, 0.0  ;;  %v6469_v4 = vadd.f32 %v6437_v48, %v6355_v10  ;;  %v6347_v18 = vadd.f32 %v10809_v58, %v6346_v29  ;;  %v6447_v28 = vld [vmem:[%s8444_s19 + $0xc8] sm:$0xff] }
 0x45f   : > { %v7813_v27 = vpop.f32.mrf.mxu0 }
 0x460   : > { %6530 = vst [vmem:[%s10820_s12 + $0x60] sm:$0xff] %v6498_v49  ;;  %v6501_v15 = vmax.f32 %v6469_v4, 0.0  ;;  %v6467_v12 = vadd.f32 %v6435_v6, %v6347_v18  ;;  %v6368_v63 = vadd.f32 %v7813_v27, %v10809_v58  ;;  %v6452_v4 = vld [vmem:[%s8444_s19 + $0xf0] sm:$0xff] }
 0x461   : > { %v6359_v55 = vpop.f32.mrf.mxu0 }
 0x462   : > { %6533 = vst [vmem:[%s10820_s12 + $0x78] sm:$0xff] %v6501_v15  ;;  %v6499_v7 = vmax.f32 %v6467_v12, 0.0  ;;  %v6472_v26 = vadd.f32 %v6440_v46, %v6368_v63  ;;  %v6360_v16 = vadd.f32 %v10809_v58, %v6359_v55  ;;  %v6450_v12 = vld [vmem:[%s8444_s19 + $0xe0] sm:$0xff] }
 0x463   : > { %v7814_v54 = vpop.f32.mrf.mxu0 }
 0x464   : > { %6531 = vst [vmem:[%s10820_s12 + $0x68] sm:$0xff] %v6499_v7  ;;  %v6504_v43 = vmax.f32 %v6472_v26, 0.0  ;;  %v6470_v41 = vadd.f32 %v6438_v5, %v6360_v16  ;;  %v6371_v60 = vadd.f32 %v7814_v54, %v10809_v58  ;;  %v6453_v26 = vld [vmem:[%s8444_s19 + $0xf8] sm:$0xff] }
 0x465   : > { %v6362_v53 = vpop.f32.mrf.mxu0 }
 0x466   : > { %6536 = vst [vmem:[%s10820_s12 + $0x90] sm:$0xff] %v6504_v43  ;;  %v6502_v38 = vmax.f32 %v6470_v41, 0.0  ;;  %v6473_v56 = vadd.f32 %v6441_v37, %v6371_v60  ;;  %v6363_v21 = vadd.f32 %v10809_v58, %v6362_v53  ;;  %v6451_v41 = vld [vmem:[%s8444_s19 + $0xe8] sm:$0xff]  ;;  %s6551_s19 = scalar_lea.sflag [#allocation5], %s8438_s16 }
 0x467   : > { %v7817_v25 = vpop.f32.mrf.mxu0 }
 0x468   : > { %6534 = vst [vmem:[%s10820_s12 + $0x80] sm:$0xff] %v6502_v38  ;;  %v6505_v0 = vmax.f32 %v6473_v56, 0.0  ;;  %v6471_v59 = vadd.f32 %v6439_v35, %v6363_v21  ;;  %v6384_v19 = vadd.f32 %v7817_v25, %v10809_v58 }
 0x469   : > { %v6375_v13 = vpop.f32.mrf.mxu0 }
 0x46a   : > { %6537 = vst [vmem:[%s10820_s12 + $0x98] sm:$0xff] %v6505_v0  ;;  %v6503_v24 = vmax.f32 %v6471_v59, 0.0  ;;  %v6476_v42 = vadd.f32 %v6444_v47, %v6384_v19  ;;  %v6376_v33 = vadd.f32 %v10809_v58, %v6375_v13 }
 0x46b   : > { %v7818_v17 = vpop.f32.mrf.mxu0 }
 0x46c   : > { %6535 = vst [vmem:[%s10820_s12 + $0x88] sm:$0xff] %v6503_v24  ;;  %v6508_v20 = vmax.f32 %v6476_v42, 0.0  ;;  %v6474_v62 = vadd.f32 %v6442_v39, %v6376_v33  ;;  %v6387_v2 = vadd.f32 %v7818_v17, %v10809_v58 }
 0x46d   : > { %v6378_v3 = vpop.f32.mrf.mxu0 }
 0x46e   : > { %6540 = vst [vmem:[%s10820_s12 + $0xb0] sm:$0xff] %v6508_v20  ;;  %v6506_v34 = vmax.f32 %v6474_v62, 0.0  ;;  %v6477_v51 = vadd.f32 %v6445_v40, %v6387_v2  ;;  %v6379_v9 = vadd.f32 %v10809_v58, %v6378_v3 }
 0x46f   : > { %v7821_v44 = vpop.f32.mrf.mxu0 }
 0x470   : > { %6538 = vst [vmem:[%s10820_s12 + $0xa0] sm:$0xff] %v6506_v34  ;;  %v6509_v50 = vmax.f32 %v6477_v51, 0.0  ;;  %v6475_v31 = vadd.f32 %v6443_v52, %v6379_v9  ;;  %v6400_v57 = vadd.f32 %v7821_v44, %v10809_v58 }
 0x471   : > { %v6391_v36 = vpop.f32.mrf.mxu0 }
 0x472   : > { %6541 = vst [vmem:[%s10820_s12 + $0xb8] sm:$0xff] %v6509_v50  ;;  %v6507_v23 = vmax.f32 %v6475_v31, 0.0  ;;  %v6480_v8 = vadd.f32 %v6448_v61, %v6400_v57  ;;  %v6392_v30 = vadd.f32 %v10809_v58, %v6391_v36 }
 0x473   : > { %v7822_v1 = vpop.f32.mrf.mxu0 }
 0x474   : > { %6539 = vst [vmem:[%s10820_s12 + $0xa8] sm:$0xff] %v6507_v23  ;;  %v6512_v45 = vmax.f32 %v6480_v8, 0.0  ;;  %v6478_v14 = vadd.f32 %v6446_v32, %v6392_v30  ;;  %v6403_v48 = vadd.f32 %v7822_v1, %v10809_v58 }
 0x475   : > { %v6394_v11 = vpop.f32.mrf.mxu0 }
 0x476   : > { %6544 = vst [vmem:[%s10820_s12 + $0xd0] sm:$0xff] %v6512_v45  ;;  %v6510_v10 = vmax.f32 %v6478_v14, 0.0  ;;  %v6481_v29 = vadd.f32 %v6449_v22, %v6403_v48  ;;  %v6395_v6 = vadd.f32 %v10809_v58, %v6394_v11 }
 0x477   : > { %v7825_v49 = vpop.f32.mrf.mxu0 }
 0x478   : > { %6542 = vst [vmem:[%s10820_s12 + $0xc0] sm:$0xff] %v6510_v10  ;;  %v6513_v18 = vmax.f32 %v6481_v29, 0.0  ;;  %v6479_v27 = vadd.f32 %v6447_v28, %v6395_v6  ;;  %v6416_v46 = vadd.f32 %v7825_v49, %v10809_v58 }
 0x479   : > { %v6407_v15 = vpop.f32.mrf.mxu0 }
 0x47a   : > { %6545 = vst [vmem:[%s10820_s12 + $0xd8] sm:$0xff] %v6513_v18  ;;  %v6511_v63 = vmax.f32 %v6479_v27, 0.0  ;;  %v6484_v55 = vadd.f32 %v6452_v4, %v6416_v46  ;;  %v6408_v5 = vadd.f32 %v10809_v58, %v6407_v15 }
 0x47b   : > { %v7826_v7 = vpop.f32.mrf.mxu0 }
 0x47c   : > { %6543 = vst [vmem:[%s10820_s12 + $0xc8] sm:$0xff] %v6511_v63  ;;  %v6516_v16 = vmax.f32 %v6484_v55, 0.0  ;;  %v6482_v54 = vadd.f32 %v6450_v12, %v6408_v5  ;;  %v6419_v37 = vadd.f32 %v7826_v7, %v10809_v58 }
 0x47d   : > { %v6410_v43 = vpop.f32.mrf.mxu0 }
 0x47e   : > { %6548 = vst [vmem:[%s10820_s12 + $0xf0] sm:$0xff] %v6516_v16  ;;  %v6514_v60 = vmax.f32 %v6482_v54, 0.0  ;;  %v6485_v53 = vadd.f32 %v6453_v26, %v6419_v37  ;;  %v6411_v35 = vadd.f32 %v10809_v58, %v6410_v43 }
 0x480   : > { %6546 = vst [vmem:[%s10820_s12 + $0xe0] sm:$0xff] %v6514_v60  ;;  %v6517_v38 = vmax.f32 %v6485_v53, 0.0  ;;  %v6483_v56 = vadd.f32 %v6451_v41, %v6411_v35 }
 0x482   : > { %6549 = vst [vmem:[%s10820_s12 + $0xf8] sm:$0xff] %v6517_v38  ;;  %v6515_v21 = vmax.f32 %v6483_v56, 0.0 }
 0x484   : > { %6547 = vst [vmem:[%s10820_s12 + $0xe8] sm:$0xff] %v6515_v21 }
 0x485   : > { %8190 = shalt.err (!%p8187_p9)
}
 0x486   : > { %s8191_s11 = scalar_lea.hbm %s10914_s30, 4096  ;;  %s8195_s29 = scalar_lea.hbm %s10968_s7, 8192 }
 0x487   : > { %p8192_p1 = scmp.ne.s32.totalorder %s10914_s30, %s8191_s11  ;;  %p8196_p11 = scmp.lt.s32.totalorder %s10914_s30, %s10968_s7 }
 0x488   : > { %p8197_p13 = scmp.lt.s32.totalorder %s8195_s29, %s8191_s11 }
 0x489   : > { %p8193_p8 = pnand %p8192_p1, %p11136_p6 }
 0x48a   : > { %p8198_p2 = por %p8197_p13, %p8196_p11 }
 0x48b   : > { %p8194_p10 = pneg %p8193_p8 }
 0x48d   : > { %p8199_p4 = pnand %p8198_p2, %p8194_p10 }
 0x48f   : > { %8202 = shalt.err (!%p8199_p4)
}
 0x490   : > { %s8261_s1 = smov 128   ;;  %s8262_s18 = smov 8  }
 0x491   : > { %7857 = dma.vmem_to_hbm [thread:$0]  (%p11136_p6), %s10916_s22, 4096, %s10914_s30, %s6551_s19, %s8261_s1, %s8261_s1, %s8262_s18  }
 0x492 PF: > { %s6579_s9 = sand.u32 1, %s8237_s24   ;;  %p11137_p12 = scmp.ne.s32.totalorder %s10983_s8, 0 }
 0x493   : > { %p11138_p0 = scmp.ge.s32.totalorder %s8249_s27, 2  ;;  %s6580_s28 = scalar_lea.sflag [#allocation5], %s6579_s9 }
 0x495   : > { %p7874_p5 = pnand %p11138_p0, %p11137_p12 }
 0x497   : > { %p7875_p3 = pneg %p7874_p5 }
 0x499   : > { %8232 = dma.done.wait (%p7875_p3), %s6580_s28, 4096  }
 0x49a   : > { %8234 = vsyncadd (%p7875_p3), %s6580_s28, 4294963200  ;;  %p22_p7 = scmp.ge.s32.totalorder %s8383_s14, 4   ;;  %s11139_s24 = smov %s8241_s25 }
 0x49b   : > { %s11140_s25 = smov %s8245_s26  ;;  %s11141_s26 = smov %s8393_s17 }
 0x49c   : > { %s11142_s27 = smov %s8383_s14  ;;  %24 = sbr.rel (!%p22_p7) target bundleno = 9 (0x9), region = 116 }
 0x4a1   :  { %6585 = vsyncpa [#allocation4], 1 }
 0x4a2   :  { %6587 = vsyncpa [#allocation4 + $0x1], 1 }
 0x4a3   :  { %6588 = vsyncpa [#allocation7], 1 }
 0x4a4   :  { %6589 = vsyncpa [#allocation10], 1 }
 0x4a5   :  { %6590 = vsyncpa [#allocation5], 1 }
 0x4a6   :  { %6592 = vsyncpa [#allocation5 + $0x1], 1 }

</bundles_post_ra>
